<compile_context>
chip_gen: v5e
topology: v5e:2x2
jax: 0.10.0
libtpu: 0.0.40
codegen_flags: <defaults>
</compile_context>

<pallas_src>
import jax
import jax.numpy as jnp
from jax.experimental import pallas as pl
from jax.experimental.pallas import tpu as pltpu

LANE = 128     # lane width (last-dim tiling)
SUBLANE = 8    # f32 sublane tiling


def _round_up(n, m):
    return ((n + m - 1) // m) * m


def _choose_tile_b(batch, preferred=256):
    """Largest tile <= preferred that divides batch, is a multiple of 8 and
    (if possible) gives a grid of >= 2 steps (pipelining + megacore)."""
    best_any = None
    for t in range(min(preferred, batch), 0, -1):
        if batch % t == 0 and t % SUBLANE == 0:
            if best_any is None:
                best_any = t
            if batch // t >= 2:
                return t
    return best_any if best_any is not None else batch


def fuzznet_kernel(x_ref, w1_ref, b1_ref, w2_ref, b2_ref, o_ref):
    # Layer 1: x @ W1 + b1, ReLU  (MXU matmul with f32 accumulation; all
    # elementwise math stays f32 — the fast VPU/EUP path on every generation).
    h = jnp.dot(x_ref[...], w1_ref[...], preferred_element_type=jnp.float32)
    h = jnp.maximum(h + b1_ref[...], 0.0)
    # Layer 2: h @ W2 + b2, Sigmoid.
    y = jnp.dot(h.astype(w2_ref.dtype), w2_ref[...],
                preferred_element_type=jnp.float32)
    y = y + b2_ref[...]
    o_ref[...] = jax.nn.sigmoid(y).astype(o_ref.dtype)


def fuzznet_forward(x, w1, b1, w2, b2, *, tile_b=None):
    """sigmoid(relu(x @ w1 + b1) @ w2 + b2).

    x:  (B, in_dim)
    w1: (in_dim, hidden),  b1: (hidden,) or (1, hidden)
    w2: (hidden, out_dim), b2: (out_dim,) or (1, out_dim)
    """
    B, in_dim = x.shape
    hidden = w1.shape[1]
    out_dim = w2.shape[1]
    dtype = x.dtype
    itemsize = jnp.dtype(dtype).itemsize

    # ---- Lane-dense feature layout: pad hidden/out up to 128 lanes.
    hid_p = _round_up(hidden, LANE)
    out_p = _round_up(out_dim, LANE)

    b1 = jnp.reshape(b1, (1, hidden)).astype(dtype)
    b2 = jnp.reshape(b2, (1, out_dim)).astype(dtype)
    w1p = jnp.zeros((in_dim, hid_p), dtype).at[:, :hidden].set(w1.astype(dtype))
    b1p = jnp.zeros((1, hid_p), dtype).at[:, :hidden].set(b1)
    w2p = jnp.zeros((hid_p, out_p), dtype).at[:hidden, :out_dim].set(w2.astype(dtype))
    b2p = jnp.zeros((1, out_p), dtype).at[:, :out_dim].set(b2)

    # ---- Batch tiling: multi-step grid (pipelining + v7x dual-TC sharding).
    if tile_b is None:
        tile_b = _choose_tile_b(B)
    assert B % tile_b == 0, "tile_b must divide batch"
    grid = (B // tile_b,)

    # ---- Explicit VMEM budget: x/out double-buffered, weights single-buffered,
    # plus f32 intermediates; 2x headroom, clamped to [4 MiB, 32 MiB].
    vmem_needed = (
        2 * tile_b * in_dim * itemsize
        + 2 * tile_b * out_p * itemsize
        + (in_dim * hid_p + hid_p * out_p) * itemsize
        + SUBLANE * (hid_p + out_p) * itemsize
        + tile_b * (hid_p + out_p) * 4
    )
    vmem_limit = int(min(max(2 * vmem_needed, 4 << 20), 32 << 20))

    cost = pl.CostEstimate(
        flops=int(2 * B * in_dim * hid_p + 2 * B * hid_p * out_p),
        transcendentals=int(B * out_p),
        bytes_accessed=int((x.size + w1p.size + b1p.size + w2p.size + b2p.size
                            + B * out_p) * itemsize),
    )

    def _build(weight_mode):
        def wspec(shape):
            return pl.BlockSpec(shape, lambda i: (0, 0), pipeline_mode=weight_mode)

        return pl.pallas_call(
            fuzznet_kernel,
            out_shape=jax.ShapeDtypeStruct((B, out_p), dtype),
            grid_spec=pltpu.PrefetchScalarGridSpec(
                num_scalar_prefetch=0,
                grid=grid,
                in_specs=[
                    pl.BlockSpec((tile_b, in_dim), lambda i: (i, 0)),  # x tile
                    wspec((in_dim, hid_p)),                            # W1 (grid-invariant)
                    wspec((1, hid_p)),                                 # b1
                    wspec((hid_p, out_p)),                             # W2
                    wspec((1, out_p)),                                 # b2
                ],
                out_specs=pl.BlockSpec((tile_b, out_p), lambda i: (i, 0)),
            ),
            compiler_params=pltpu.CompilerParams(
                dimension_semantics=("parallel",),
                vmem_limit_bytes=vmem_limit,
            ),
            cost_estimate=cost,
        )

    try:
        # Single-buffer the grid-invariant weights/biases (saves VMEM; only x
        # and the output need double buffering).
        out_padded = _build(pl.Buffered(1))(x, w1p, b1p, w2p, b2p)
    except Exception:
        # Fallback for jax builds that reject buffer_count=1: default (double)
        # buffering — same semantics, slightly larger weight footprint.
        out_padded = _build(None)(x, w1p, b1p, w2p, b2p)

    # Drop the lane-padding columns (cheap wrapper-side slice).
    return out_padded[:, :out_dim]


if __name__ == "__main__":
    # FuzzNet(in_dim=32, hidden_1=64, out_dim=16) on a batch of flat feature
    # vectors. B=512 with tile_b=256 -> grid of 2 "parallel" steps.
    B, in_dim, hidden_1, out_dim = 512, 32, 64, 16

    key = jax.random.PRNGKey(0)
    kx, k1, k2, k3, k4 = jax.random.split(key, 5)
    lim1 = 1.0 / (in_dim ** 0.5)
    lim2 = 1.0 / (hidden_1 ** 0.5)
    x = jax.random.normal(kx, (B, in_dim), jnp.float32)
    w1 = jax.random.uniform(k1, (in_dim, hidden_1), jnp.float32, -lim1, lim1)
    b1 = jax.random.uniform(k2, (hidden_1,), jnp.float32, -lim1, lim1)
    w2 = jax.random.uniform(k3, (hidden_1, out_dim), jnp.float32, -lim2, lim2)
    b2 = jax.random.uniform(k4, (out_dim,), jnp.float32, -lim2, lim2)

    out = fuzznet_forward(x, w1, b1, w2, b2)
    out = jax.block_until_ready(out)

    # Pure-JAX reference (same semantics as the PyTorch forward).
    ref = jax.nn.sigmoid(jnp.maximum(x @ w1 + b1[None, :], 0.0) @ w2 + b2[None, :])
    assert out.shape == (B, out_dim)
    assert jnp.allclose(out, ref, atol=1e-5, rtol=1e-5), \
        float(jnp.max(jnp.abs(out - ref)))

    print("KERNEL_OK")
</pallas_src>

<mosaic_0001>
module attributes {stable_mosaic.version = 11 : i64} {
  func.func @fuzznet_kernel(%arg0: i32, %arg1: memref<256x32xf32, #tpu.memory_space<vmem>>, %arg2: memref<32x128xf32, #tpu.memory_space<vmem>>, %arg3: memref<1x128xf32, #tpu.memory_space<vmem>>, %arg4: memref<128x128xf32, #tpu.memory_space<vmem>>, %arg5: memref<1x128xf32, #tpu.memory_space<vmem>>, %arg6: memref<256x128xf32, #tpu.memory_space<vmem>>) attributes {dimension_semantics = [#tpu.dimension_semantics<parallel>], iteration_bounds = array<i64: 2>, scalar_prefetch = 0 : i64, scratch_operands = 0 : i64, tpu.core_type = #tpu.core_type<tc>, window_params = [{transform_indices = @transform_0, window_bounds = array<i64: 256, 32>}, {pipeline_mode = #tpu.pipeline_mode<synchronous>, transform_indices = @transform_1, window_bounds = array<i64: 32, 128>}, {pipeline_mode = #tpu.pipeline_mode<synchronous>, transform_indices = @transform_2, window_bounds = array<i64: 1, 128>}, {pipeline_mode = #tpu.pipeline_mode<synchronous>, transform_indices = @transform_3, window_bounds = array<i64: 128, 128>}, {pipeline_mode = #tpu.pipeline_mode<synchronous>, transform_indices = @transform_4, window_bounds = array<i64: 1, 128>}, {transform_indices = @transform_5, window_bounds = array<i64: 256, 128>}]} {
    %c0 = arith.constant 0 : index
    %c0_0 = arith.constant 0 : index
    %0 = vector.load %arg1[%c0, %c0_0] : memref<256x32xf32, #tpu.memory_space<vmem>>, vector<256x32xf32>
    %c0_1 = arith.constant 0 : index
    %c0_2 = arith.constant 0 : index
    %1 = vector.load %arg2[%c0_1, %c0_2] : memref<32x128xf32, #tpu.memory_space<vmem>>, vector<32x128xf32>
    %cst = arith.constant dense<0.000000e+00> : vector<256x128xf32>
    %2 = tpu.matmul %0, %1, %cst {dimension_numbers = #tpu.dot_dimension_numbers<[1], [0], [0], [1], [0, 0, 1, 1], [], []>} : vector<256x32xf32>, vector<32x128xf32>, vector<256x128xf32> -> vector<256x128xf32>
    %c0_3 = arith.constant 0 : index
    %c0_4 = arith.constant 0 : index
    %3 = vector.load %arg3[%c0_3, %c0_4] : memref<1x128xf32, #tpu.memory_space<vmem>>, vector<1x128xf32>
    %4 = vector.broadcast %3 : vector<1x128xf32> to vector<256x128xf32>
    %5 = arith.addf %2, %4 : vector<256x128xf32>
    %cst_5 = arith.constant 0.000000e+00 : f32
    %6 = vector.broadcast %cst_5 : f32 to vector<256x128xf32>
    %7 = arith.maximumf %5, %6 : vector<256x128xf32>
    %c0_6 = arith.constant 0 : index
    %c0_7 = arith.constant 0 : index
    %8 = vector.load %arg4[%c0_6, %c0_7] : memref<128x128xf32, #tpu.memory_space<vmem>>, vector<128x128xf32>
    %cst_8 = arith.constant dense<0.000000e+00> : vector<256x128xf32>
    %9 = tpu.matmul %7, %8, %cst_8 {dimension_numbers = #tpu.dot_dimension_numbers<[1], [0], [0], [1], [0, 0, 1, 1], [], []>} : vector<256x128xf32>, vector<128x128xf32>, vector<256x128xf32> -> vector<256x128xf32>
    %c0_9 = arith.constant 0 : index
    %c0_10 = arith.constant 0 : index
    %10 = vector.load %arg5[%c0_9, %c0_10] : memref<1x128xf32, #tpu.memory_space<vmem>>, vector<1x128xf32>
    %11 = vector.broadcast %10 : vector<1x128xf32> to vector<256x128xf32>
    %12 = arith.addf %9, %11 : vector<256x128xf32>
    %13 = arith.negf %12 : vector<256x128xf32>
    %14 = math.exp %13 : vector<256x128xf32>
    %cst_11 = arith.constant 1.000000e+00 : f32
    %15 = vector.broadcast %cst_11 : f32 to vector<256x128xf32>
    %16 = arith.addf %15, %14 : vector<256x128xf32>
    %17 = arith.divf %15, %16 : vector<256x128xf32>
    %c0_12 = arith.constant 0 : index
    %c0_13 = arith.constant 0 : index
    %18 = vector.load %arg6[%c0_12, %c0_13] : memref<256x128xf32, #tpu.memory_space<vmem>>, vector<256x128xf32>
    tpu.vector_store %arg6[%c0_12, %c0_13], %17 {strides = array<i32>} : memref<256x128xf32, #tpu.memory_space<vmem>>, vector<256x128xf32>,
    return
  }
  func.func @transform_0(%arg0: i32) -> (i32, i32) {
    %c0_i32 = arith.constant 0 : i32
    %c0_i32_0 = arith.constant 0 : i32
    return %arg0, %c0_i32 : i32, i32
  }
  func.func @transform_1(%arg0: i32) -> (i32, i32) {
    %c0_i32 = arith.constant 0 : i32
    %c0_i32_0 = arith.constant 0 : i32
    %c0_i32_1 = arith.constant 0 : i32
    return %c0_i32, %c0_i32_0 : i32, i32
  }
  func.func @transform_2(%arg0: i32) -> (i32, i32) {
    %c0_i32 = arith.constant 0 : i32
    %c0_i32_0 = arith.constant 0 : i32
    %c0_i32_1 = arith.constant 0 : i32
    return %c0_i32, %c0_i32_0 : i32, i32
  }
  func.func @transform_3(%arg0: i32) -> (i32, i32) {
    %c0_i32 = arith.constant 0 : i32
    %c0_i32_0 = arith.constant 0 : i32
    %c0_i32_1 = arith.constant 0 : i32
    return %c0_i32, %c0_i32_0 : i32, i32
  }
  func.func @transform_4(%arg0: i32) -> (i32, i32) {
    %c0_i32 = arith.constant 0 : i32
    %c0_i32_0 = arith.constant 0 : i32
    %c0_i32_1 = arith.constant 0 : i32
    return %c0_i32, %c0_i32_0 : i32, i32
  }
  func.func @transform_5(%arg0: i32) -> (i32, i32) {
    %c0_i32 = arith.constant 0 : i32
    %c0_i32_0 = arith.constant 0 : i32
    return %arg0, %c0_i32 : i32, i32
  }
}

module attributes {stable_mosaic.version = 11 : i64} {
  func.func @fuzznet_kernel(%arg0: i32, %arg1: memref<256x32xf32, #tpu.memory_space<vmem>>, %arg2: memref<32x128xf32, #tpu.memory_space<vmem>>, %arg3: memref<1x128xf32, #tpu.memory_space<vmem>>, %arg4: memref<128x128xf32, #tpu.memory_space<vmem>>, %arg5: memref<1x128xf32, #tpu.memory_space<vmem>>, %arg6: memref<256x128xf32, #tpu.memory_space<vmem>>) attributes {dimension_semantics = [#tpu.dimension_semantics<parallel>], iteration_bounds = array<i64: 2>, scalar_prefetch = 0 : i64, scratch_operands = 0 : i64, tpu.core_type = #tpu.core_type<tc>, window_params = [{transform_indices = @transform_0, window_bounds = array<i64: 256, 32>}, {pipeline_mode = #tpu.pipeline_mode<synchronous>, transform_indices = @transform_1, window_bounds = array<i64: 32, 128>}, {pipeline_mode = #tpu.pipeline_mode<synchronous>, transform_indices = @transform_2, window_bounds = array<i64: 1, 128>}, {pipeline_mode = #tpu.pipeline_mode<synchronous>, transform_indices = @transform_3, window_bounds = array<i64: 128, 128>}, {pipeline_mode = #tpu.pipeline_mode<synchronous>, transform_indices = @transform_4, window_bounds = array<i64: 1, 128>}, {transform_indices = @transform_5, window_bounds = array<i64: 256, 128>}]} {
    %c0 = arith.constant 0 : index
    %c0_0 = arith.constant 0 : index
    %0 = vector.load %arg1[%c0, %c0_0] : memref<256x32xf32, #tpu.memory_space<vmem>>, vector<256x32xf32>
    %c0_1 = arith.constant 0 : index
    %c0_2 = arith.constant 0 : index
    %1 = vector.load %arg2[%c0_1, %c0_2] : memref<32x128xf32, #tpu.memory_space<vmem>>, vector<32x128xf32>
    %cst = arith.constant dense<0.000000e+00> : vector<256x128xf32>
    %2 = tpu.matmul %0, %1, %cst {dimension_numbers = #tpu.dot_dimension_numbers<[1], [0], [0], [1], [0, 0, 1, 1], [], []>} : vector<256x32xf32>, vector<32x128xf32>, vector<256x128xf32> -> vector<256x128xf32>
    %c0_3 = arith.constant 0 : index
    %c0_4 = arith.constant 0 : index
    %3 = vector.load %arg3[%c0_3, %c0_4] : memref<1x128xf32, #tpu.memory_space<vmem>>, vector<1x128xf32>
    %4 = vector.broadcast %3 : vector<1x128xf32> to vector<256x128xf32>
    %5 = arith.addf %2, %4 : vector<256x128xf32>
    %cst_5 = arith.constant 0.000000e+00 : f32
    %6 = vector.broadcast %cst_5 : f32 to vector<256x128xf32>
    %7 = arith.maximumf %5, %6 : vector<256x128xf32>
    %c0_6 = arith.constant 0 : index
    %c0_7 = arith.constant 0 : index
    %8 = vector.load %arg4[%c0_6, %c0_7] : memref<128x128xf32, #tpu.memory_space<vmem>>, vector<128x128xf32>
    %cst_8 = arith.constant dense<0.000000e+00> : vector<256x128xf32>
    %9 = tpu.matmul %7, %8, %cst_8 {dimension_numbers = #tpu.dot_dimension_numbers<[1], [0], [0], [1], [0, 0, 1, 1], [], []>} : vector<256x128xf32>, vector<128x128xf32>, vector<256x128xf32> -> vector<256x128xf32>
    %c0_9 = arith.constant 0 : index
    %c0_10 = arith.constant 0 : index
    %10 = vector.load %arg5[%c0_9, %c0_10] : memref<1x128xf32, #tpu.memory_space<vmem>>, vector<1x128xf32>
    %11 = vector.broadcast %10 : vector<1x128xf32> to vector<256x128xf32>
    %12 = arith.addf %9, %11 : vector<256x128xf32>
    %13 = arith.negf %12 : vector<256x128xf32>
    %14 = math.exp %13 : vector<256x128xf32>
    %cst_11 = arith.constant 1.000000e+00 : f32
    %15 = vector.broadcast %cst_11 : f32 to vector<256x128xf32>
    %16 = arith.addf %15, %14 : vector<256x128xf32>
    %17 = arith.divf %15, %16 : vector<256x128xf32>
    %c0_12 = arith.constant 0 : index
    %c0_13 = arith.constant 0 : index
    %18 = vector.load %arg6[%c0_12, %c0_13] : memref<256x128xf32, #tpu.memory_space<vmem>>, vector<256x128xf32>
    tpu.vector_store %arg6[%c0_12, %c0_13], %17 {strides = array<i32>} : memref<256x128xf32, #tpu.memory_space<vmem>>, vector<256x128xf32>,
    return
  }
  func.func @transform_0(%arg0: i32) -> (i32, i32) {
    %c0_i32 = arith.constant 0 : i32
    %c0_i32_0 = arith.constant 0 : i32
    return %arg0, %c0_i32 : i32, i32
  }
  func.func @transform_1(%arg0: i32) -> (i32, i32) {
    %c0_i32 = arith.constant 0 : i32
    %c0_i32_0 = arith.constant 0 : i32
    %c0_i32_1 = arith.constant 0 : i32
    return %c0_i32, %c0_i32_0 : i32, i32
  }
  func.func @transform_2(%arg0: i32) -> (i32, i32) {
    %c0_i32 = arith.constant 0 : i32
    %c0_i32_0 = arith.constant 0 : i32
    %c0_i32_1 = arith.constant 0 : i32
    return %c0_i32, %c0_i32_0 : i32, i32
  }
  func.func @transform_3(%arg0: i32) -> (i32, i32) {
    %c0_i32 = arith.constant 0 : i32
    %c0_i32_0 = arith.constant 0 : i32
    %c0_i32_1 = arith.constant 0 : i32
    return %c0_i32, %c0_i32_0 : i32, i32
  }
  func.func @transform_4(%arg0: i32) -> (i32, i32) {
    %c0_i32 = arith.constant 0 : i32
    %c0_i32_0 = arith.constant 0 : i32
    %c0_i32_1 = arith.constant 0 : i32
    return %c0_i32, %c0_i32_0 : i32, i32
  }
  func.func @transform_5(%arg0: i32) -> (i32, i32) {
    %c0_i32 = arith.constant 0 : i32
    %c0_i32_0 = arith.constant 0 : i32
    return %arg0, %c0_i32 : i32, i32
  }
}

</mosaic_0001>

<bundles_post_ra>
// kernel: tpu_custom_call.1
= control target key start
LH: loop header
LB: loop body
LE: loop exit
PB: predicated region body
PF: predicated region fallthrough
CT: control target
= control target key end

     0   :  { %10 = vsyncpa [#allocation3], 0  ;;  %s2138_s0 = inlined_call_operand.vmem [shape: f32[512,32], index: 0, kind: input, shape index: {}]   ;;  %s2139_s1 = inlined_call_operand.vmem [shape: f32[32,128], index: 1, kind: input, shape index: {}]   ;;  %s2140_s2 = inlined_call_operand.vmem [shape: f32[1,128], index: 2, kind: input, shape index: {}]   ;;  %s2141_s3 = inlined_call_operand.vmem [shape: f32[128,128], index: 3, kind: input, shape index: {}]   ;;  %s2142_s4 = inlined_call_operand.vmem [shape: f32[1,128], index: 4, kind: input, shape index: {}]   ;;  %s2143_s5 = inlined_call_operand.hbm [shape: f32[512,128], index: 5, kind: output, shape index: {}]  }
   0x1   :  { %12 = vsyncpa [#allocation3 + $0x1], 0  ;;  %s1740_s18 = smov 0   ;;  %s1742_s19 = smov 0  }
   0x2   :  { %s1744_s20 = smov 0   ;;  %s1746_s21 = smov 0  }
   0x3 LB: > { %s1761_s22 = sadd.s32 4294967295, %s1706_s21   ;;  %s1359_s23 = sadd.s32 4294967294, %s1706_s21   ;;  %s1706_s21 = sphi %s1746_s21, %s2151_s21   ;;  %s1702_s20 = sphi %s1744_s20, %s2150_s20   ;;  %s1698_s19 = sphi %s1742_s19, %s2149_s19   ;;  %s1694_s18 = sphi %s1740_s18, %s2148_s18  }
   0x4   : > { %s1765_s24 = sadd.s32 1, %s1706_s21   ;;  %s135_s25 = sadd.s32 1, %s1702_s20 }
   0x5   : > { %s132_s26 = ssub.s32 %s1706_s21, %s1765_s24  ;;  %p145_p0 = scmp.ne.s32.totalorder %s1702_s20, %s1698_s19 }
   0x6   : > { %p133_p1 = scmp.eq.s32.totalorder %s132_s26, 0  ;;  %p146_p2 = scmp.eq.s32.totalorder %s1761_s22, 1 }
   0x7   : > { %p151_p3 = scmp.ne.s32.totalorder %s1698_s19, %s1694_s18  ;;  %p152_p4 = scmp.eq.s32.totalorder %s1359_s23, 1 }
   0x8   : > { %s1776_s27 = scalar_select %p133_p1, %s1702_s20, %s135_s25  }
   0x9   : > { %p1778_p5 = por %p146_p2, %p145_p0  ;;  %p1782_p6 = por %p152_p4, %p151_p3 }
   0xa   : > { %p1362_p7 = scmp.ge.s32.totalorder %s1706_s21, 1  ;;  %p191_p8 = scmp.lt.s32.totalorder %s1706_s21, 3 }
   0xc   : > { %p192_p9 = pnand %p1362_p7, %p191_p8 }
   0xd   : > { %s1364_s9 = sshll.u32 (!%p192_p9), %s1761_s22, 5  ;;  %s216_s7 = sand.u32 (!%p192_p9), 1, %s1698_s19  }
   0xe   : > { %195 = sbr.rel (%p192_p9) target bundleno = 555 (0x22b), region = 40  ;;  %p220_p10 = scmp.lt.s32.totalorder (!%p192_p9), %s1364_s9, 63 }
   0xf   : > { %s1363_s8 = sshll.u32 (!%p192_p9), %s216_s7, 8  ;;  %s1435_s12 = sshll.u32 (!%p192_p9), %s1761_s22, 8 }
  0x10   : > { %s1293_s15 = scalar_lea.hbm (!%p192_p9), %s2143_s5, %s1435_s12  ;;  %s1282_s23 = scalar_lea.sflag (!%p192_p9), [#allocation3], %s216_s7 }
  0x11   : > { %s1296_s16 = sshll.u32 (!%p192_p9), %s1293_s15, 4  ;;  %s1664_s6 = scalar_lea.hbm (!%p192_p9), %s2143_s5, 512  ;;  %s1297_s16 = int_to_ptr.hbm [resolvable:$true] %s1296_s16 }
  0x12   : > { %s1658_s25 = sshra.s32 (!%p192_p9), %s1297_s16, 4  ;;  %s1659_s25 = int_to_ptr.hbm [resolvable:$true] %s1658_s25 }
  0x13   : > { %v261_v0 = vld [vmem:[%s2139_s1 + $0x18] sm:$0xff]  ;;  %v260_v1 = vld [vmem:[%s2139_s1 + $0x10] sm:$0xff]  ;;  %v259_v2 = vld [vmem:[%s2139_s1 + $0x8] sm:$0xff]  ;;  %s2153_s9 = smov (!%p220_p10, %s1364_s9), 63  ;;  %vm266_vm0 = vcmask 261120   ;;  %s1660_s26 = scalar_lea.hbm %s1659_s25, 256 }
  0x14   : > { %375 = vmatpush.msra.mxu0 %v261_v0  ;;  %1436 = vmatpush.msra.mxu3 %v261_v0  ;;  %v258_v3 = vld [vmem:[%s2139_s1] sm:$0xff]  ;;  %s1365_s14 = sshll.u32 %s2153_s9, 3  ;;  %v523_v13 = vld [vmem:[%s2141_s3 + $0x78] sm:$0xff]  ;;  %v522_v14 = vld [vmem:[%s2141_s3 + $0x70] sm:$0xff]  ;;  %s1973_s9 = scalar_lea.vmem [#allocation2], %s1363_s8 }
  0x15   : > { %s1804_s17 = scalar_lea.vmem %s2138_s0, %s1365_s14  ;;  %528 = vmatpush.msra.mxu1 %v523_v13  ;;  %1440 = vmatpush.msra.mxu2 %v523_v13  ;;  %v521_v15 = vld [vmem:[%s2141_s3 + $0x68] sm:$0xff]  ;;  %v520_v17 = vld [vmem:[%s2141_s3 + $0x60] sm:$0xff]  ;;  %v519_v18 = vld [vmem:[%s2141_s3 + $0x58] sm:$0xff]  ;;  %s1294_s22 = sshll.u32 %s1973_s9, 4  ;;  %s1295_s22 = int_to_ptr.vmem [resolvable:$true] %s1294_s22 }
  0x16   : > { %376 = vmatpush.msra.mxu0 %v260_v1  ;;  %1437 = vmatpush.msra.mxu3 %v260_v1  ;;  %v226_v4 = vld [vmem:[%s1804_s17] sm:$0xff]  ;;  %v227_v5 = vld [vmem:[%s1804_s17 + $0x8] sm:$0xff]  ;;  %v228_v6 = vld [vmem:[%s1804_s17 + $0x10] sm:$0xff]  ;;  %p1661_p11 = scmp.ne.s32.totalorder %s1659_s25, %s1660_s26  ;;  %p1665_p0 = scmp.lt.s32.totalorder %s1659_s25, %s2143_s5 }
  0x17   : > { %v229_v7 = vld [vmem:[%s1804_s17 + $0x18] sm:$0xff]  ;;  %v230_v8 = vld [vmem:[%s1804_s17 + $0x20] sm:$0xff]  ;;  %v231_v9 = vld [vmem:[%s1804_s17 + $0x28] sm:$0xff]  ;;  %529 = vmatpush.msra.mxu1 %v522_v14  ;;  %1442 = vmatpush.msra.mxu2 %v522_v14  ;;  %p1666_p1 = scmp.lt.s32.totalorder %s1664_s6, %s1660_s26 }
  0x18   : > { %377 = vmatpush.msra.mxu0 %v259_v2  ;;  %1438 = vmatpush.msra.mxu3 %v259_v2  ;;  %v232_v10 = vld [vmem:[%s1804_s17 + $0x30] sm:$0xff]  ;;  %v233_v11 = vld [vmem:[%s1804_s17 + $0x38] sm:$0xff]  ;;  %v234_v12 = vld [vmem:[%s1804_s17 + $0x40] sm:$0xff]  ;;  %p1662_p12 = pnand %p1661_p11, %p1778_p5 }
  0x19   : > { %v235_v16 = vld [vmem:[%s1804_s17 + $0x48] sm:$0xff]  ;;  %530 = vmatpush.msra.mxu1 %v521_v15  ;;  %1444 = vmatpush.msra.mxu2 %v521_v15  ;;  %v244_v19 = vld [vmem:[%s1804_s17 + $0x90] sm:$0xff]  ;;  %v516_v23 = vld [vmem:[%s2141_s3 + $0x40] sm:$0xff]  ;;  %p1667_p2 = por %p1666_p1, %p1665_p0 }
  0x1a   : > { %378 = vmatpush.msra.mxu0 %v258_v3  ;;  %1439 = vmatpush.msra.mxu3 %v258_v3  ;;  %v518_v20 = vld [vmem:[%s2141_s3 + $0x50] sm:$0xff]  ;;  %v517_v21 = vld [vmem:[%s2141_s3 + $0x48] sm:$0xff]  ;;  %v515_v24 = vld [vmem:[%s2141_s3 + $0x38] sm:$0xff]  ;;  %p1663_p13 = pneg %p1662_p12 }
  0x1b   : > { %1366 = vmatmul.msk.f32.vlgmr.msra.gmra.mxu0 %vm266_vm0, %v226_v4  ;;  %531 = vmatpush.msra.mxu1 %v520_v17  ;;  %v236_v22 = vld [vmem:[%s1804_s17 + $0x50] sm:$0xff]  ;;  %v245_v25 = vld [vmem:[%s1804_s17 + $0x98] sm:$0xff]  ;;  %v513_v27 = vld [vmem:[%s2141_s3 + $0x28] sm:$0xff] }
  0x1c   : > { %1441 = vmatpush.msrb.mxu3 %v523_v13  ;;  %1446 = vmatpush.msra.mxu2 %v520_v17  ;;  %v514_v26 = vld [vmem:[%s2141_s3 + $0x30] sm:$0xff]  ;;  %v237_v28 = vld [vmem:[%s1804_s17 + $0x58] sm:$0xff]  ;;  %v512_v29 = vld [vmem:[%s2141_s3 + $0x20] sm:$0xff]  ;;  %p1668_p3 = pnand %p1667_p2, %p1663_p13 }
  0x1d   : > { %1384 = vmatmul.msk.f32.vlgmr.msra.gmra.mxu3 %vm266_vm0, %v244_v19  ;;  %532 = vmatpush.msra.mxu1 %v519_v18  ;;  %v511_v30 = vld [vmem:[%s2141_s3 + $0x18] sm:$0xff]  ;;  %v246_v31 = vld [vmem:[%s1804_s17 + $0xa0] sm:$0xff]  ;;  %v510_v32 = vld [vmem:[%s2141_s3 + $0x10] sm:$0xff] }
  0x1e   : > { %1443 = vmatpush.msrb.mxu3 %v522_v14  ;;  %1448 = vmatpush.msra.mxu2 %v519_v18  ;;  %v238_v33 = vld [vmem:[%s1804_s17 + $0x60] sm:$0xff]  ;;  %v509_v34 = vld [vmem:[%s2141_s3 + $0x8] sm:$0xff]  ;;  %v248_v38 = vld [vmem:[%s1804_s17 + $0xb0] sm:$0xff] }
  0x1f   : > { %533 = vmatpush.msra.mxu1 %v518_v20  ;;  %v508_v35 = vld [vmem:[%s2141_s3] sm:$0xff]  ;;  %v247_v36 = vld [vmem:[%s1804_s17 + $0xa8] sm:$0xff]  ;;  %v240_v39 = vld [vmem:[%s1804_s17 + $0x70] sm:$0xff] }
  0x20   : > { %1445 = vmatpush.msrb.mxu3 %v521_v15  ;;  %1450 = vmatpush.msra.mxu2 %v518_v20  ;;  %v239_v37 = vld [vmem:[%s1804_s17 + $0x68] sm:$0xff]  ;;  %v249_v40 = vld [vmem:[%s1804_s17 + $0xb8] sm:$0xff]  ;;  %v1901_v42 = vld [vmem:[%s2140_s2] ss:$0 sm:$0xff] }
  0x21   : > { %534 = vmatpush.msra.mxu1 %v517_v21  ;;  %v241_v41 = vld [vmem:[%s1804_s17 + $0x78] sm:$0xff]  ;;  %v250_v43 = vld [vmem:[%s1804_s17 + $0xc0] sm:$0xff]  ;;  %v251_v48 = vld [vmem:[%s1804_s17 + $0xc8] sm:$0xff] }
  0x22   : > { %1447 = vmatpush.msrb.mxu3 %v520_v17  ;;  %1452 = vmatpush.msra.mxu2 %v517_v21  ;;  %v242_v45 = vld [vmem:[%s1804_s17 + $0x80] sm:$0xff]  ;;  %v243_v50 = vld [vmem:[%s1804_s17 + $0x88] sm:$0xff]  ;;  %v252_v53 = vld [vmem:[%s1804_s17 + $0xd0] sm:$0xff] }
  0x23   : > { %1367 = vmatmul.msk.f32.gmra.mxu0 %vm266_vm0, %v227_v5  ;;  %535 = vmatpush.msra.mxu1 %v516_v23  ;;  %v253_v57 = vld [vmem:[%s1804_s17 + $0xd8] sm:$0xff]  ;;  %v254_v61 = vld [vmem:[%s1804_s17 + $0xe0] sm:$0xff]  ;;  %v255_v1 = vld [vmem:[%s1804_s17 + $0xe8] sm:$0xff] }
  0x24   : > { %1449 = vmatpush.msrb.mxu3 %v519_v18  ;;  %1454 = vmatpush.msra.mxu2 %v516_v23  ;;  %v256_v5 = vld [vmem:[%s1804_s17 + $0xf0] sm:$0xff] }
  0x25   : > { %1385 = vmatmul.msk.f32.gmra.mxu3 %vm266_vm0, %v245_v25  ;;  %536 = vmatpush.msra.mxu1 %v515_v24 }
  0x26   : > { %1451 = vmatpush.msrb.mxu3 %v518_v20  ;;  %1456 = vmatpush.msra.mxu2 %v515_v24 }
  0x27   : > { %537 = vmatpush.msra.mxu1 %v514_v26 }
  0x28   : > { %1453 = vmatpush.msrb.mxu3 %v517_v21  ;;  %1458 = vmatpush.msra.mxu2 %v514_v26 }
  0x29   : > { %538 = vmatpush.msra.mxu1 %v513_v27 }
  0x2a   : > { %1455 = vmatpush.msrb.mxu3 %v516_v23  ;;  %1460 = vmatpush.msra.mxu2 %v513_v27 }
  0x2b   : > { %1368 = vmatmul.msk.f32.gmra.mxu0 %vm266_vm0, %v228_v6  ;;  %539 = vmatpush.msra.mxu1 %v512_v29 }
  0x2c   : > { %1457 = vmatpush.msrb.mxu3 %v515_v24  ;;  %1462 = vmatpush.msra.mxu2 %v512_v29 }
  0x2d   : > { %540 = vmatpush.msra.mxu1 %v511_v30  ;;  %1386 = vmatmul.msk.f32.gmra.mxu3 %vm266_vm0, %v246_v31 }
  0x2e   : > { %1459 = vmatpush.msrb.mxu3 %v514_v26  ;;  %1464 = vmatpush.msra.mxu2 %v511_v30 }
  0x2f   : > { %541 = vmatpush.msra.mxu1 %v510_v32 }
  0x30   : > { %1461 = vmatpush.msrb.mxu3 %v513_v27  ;;  %1466 = vmatpush.msra.mxu2 %v510_v32 }
  0x31   : > { %542 = vmatpush.msra.mxu1 %v509_v34 }
  0x32   : > { %1463 = vmatpush.msrb.mxu3 %v512_v29  ;;  %1468 = vmatpush.msra.mxu2 %v509_v34 }
  0x33   : > { %1369 = vmatmul.msk.f32.gmra.mxu0 %vm266_vm0, %v229_v7  ;;  %543 = vmatpush.msra.mxu1 %v508_v35 }
  0x34   : > { %1465 = vmatpush.msrb.mxu3 %v511_v30  ;;  %1470 = vmatpush.msra.mxu2 %v508_v35 }
  0x35   : > { %1387 = vmatmul.msk.f32.gmra.mxu3 %vm266_vm0, %v247_v36 }
  0x36   : > { %1467 = vmatpush.msrb.mxu3 %v510_v32 }
  0x38   : > { %1469 = vmatpush.msrb.mxu3 %v509_v34 }
  0x3a   : > { %1471 = vmatpush.msrb.mxu3 %v508_v35 }
  0x3b   : > { %1370 = vmatmul.msk.f32.gmra.mxu0 %vm266_vm0, %v230_v8 }
  0x3d   : > { %1388 = vmatmul.msk.f32.gmra.mxu3 %vm266_vm0, %v248_v38 }
  0x43   : > { %1371 = vmatmul.msk.f32.gmra.mxu0 %vm266_vm0, %v231_v9  ;;  %v257_v9 = vld [vmem:[%s1804_s17 + $0xf8] sm:$0xff] }
  0x45   : > { %1389 = vmatmul.msk.f32.gmra.mxu3 %vm266_vm0, %v249_v40 }
  0x4b   : > { %1372 = vmatmul.msk.f32.gmra.mxu0 %vm266_vm0, %v232_v10 }
  0x4d   : > { %1390 = vmatmul.msk.f32.gmra.mxu3 %vm266_vm0, %v250_v43 }
  0x53   : > { %1373 = vmatmul.msk.f32.gmra.mxu0 %vm266_vm0, %v233_v11 }
  0x55   : > { %1391 = vmatmul.msk.f32.gmra.mxu3 %vm266_vm0, %v251_v48 }
  0x5b   : > { %1374 = vmatmul.msk.f32.gmra.mxu0 %vm266_vm0, %v234_v12 }
  0x5d   : > { %1392 = vmatmul.msk.f32.gmra.mxu3 %vm266_vm0, %v252_v53 }
  0x63   : > { %1375 = vmatmul.msk.f32.gmra.mxu0 %vm266_vm0, %v235_v16 }
  0x65   : > { %1393 = vmatmul.msk.f32.gmra.mxu3 %vm266_vm0, %v253_v57 }
  0x6b   : > { %1376 = vmatmul.msk.f32.gmra.mxu0 %vm266_vm0, %v236_v22 }
  0x6d   : > { %1394 = vmatmul.msk.f32.gmra.mxu3 %vm266_vm0, %v254_v61 }
  0x73   : > { %1377 = vmatmul.msk.f32.gmra.mxu0 %vm266_vm0, %v237_v28 }
  0x75   : > { %1395 = vmatmul.msk.f32.gmra.mxu3 %vm266_vm0, %v255_v1 }
  0x7b   : > { %1378 = vmatmul.msk.f32.gmra.mxu0 %vm266_vm0, %v238_v33 }
  0x7d   : > { %1396 = vmatmul.msk.f32.gmra.mxu3 %vm266_vm0, %v256_v5 }
  0x83   : > { %1379 = vmatmul.msk.f32.gmra.mxu0 %vm266_vm0, %v239_v37 }
  0x85   : > { %1397 = vmatmul.msk.f32.gmra.mxu3 %vm266_vm0, %v257_v9 }
  0x8b   : > { %1380 = vmatmul.msk.f32.gmra.mxu0 %vm266_vm0, %v240_v39 }
  0x93   : > { %1381 = vmatmul.msk.f32.gmra.mxu0 %vm266_vm0, %v241_v41 }
  0x98   : > { %v380_v44 = vpop.f32.mrf.mxu0 }
  0x99   : > { %v381_v46 = vadd.f32 %v1901_v42, %v380_v44  ;;  %v1950_v44 = vld [vmem:[%s2142_s4] ss:$0 sm:$0xff] }
  0x9b   : > { %v476_v47 = vmax.f32 %v381_v46, 0.0  ;;  %1382 = vmatmul.msk.f32.gmra.mxu0 %vm266_vm0, %v242_v45 }
  0x9d   : > { %544 = vmatmul.f32.vlgmr.msra.gmra.mxu1 %v476_v47 }
  0xa0   : > { %v383_v49 = vpop.f32.mrf.mxu0  ;;  %v434_v22 = vpop.f32.mrf.mxu3 }
  0xa1   : > { %v384_v51 = vadd.f32 %v1901_v42, %v383_v49  ;;  %v435_v61 = vadd.f32 %v1901_v42, %v434_v22 }
  0xa3   : > { %v477_v52 = vmax.f32 %v384_v51, 0.0  ;;  %1383 = vmatmul.msk.f32.gmra.mxu0 %vm266_vm0, %v243_v50 }
  0xa5   : > { %547 = vmatmul.f32.gmra.mxu1 %v477_v52 }
  0xa8   : > { %v386_v54 = vpop.f32.mrf.mxu0  ;;  %v437_v26 = vpop.f32.mrf.mxu3 }
  0xa9   : > { %v387_v55 = vadd.f32 %v1901_v42, %v386_v54  ;;  %v438_v5 = vadd.f32 %v1901_v42, %v437_v26 }
  0xab   : > { %v478_v56 = vmax.f32 %v387_v55, 0.0  ;;  %v495_v9 = vmax.f32 %v438_v5, 0.0 }
  0xad   : > { %550 = vmatmul.f32.gmra.mxu1 %v478_v56 }
  0xb0   : > { %v389_v58 = vpop.f32.mrf.mxu0  ;;  %v1936_v30 = vpop.f32.mrf.mxu3 }
  0xb1   : > { %v390_v59 = vadd.f32 %v1901_v42, %v389_v58 }
  0xb3   : > { %v479_v60 = vmax.f32 %v390_v59, 0.0 }
  0xb5   : > { %553 = vmatmul.f32.gmra.mxu1 %v479_v60 }
  0xb8   : > { %v392_v62 = vpop.f32.mrf.mxu0  ;;  %v1939_v34 = vpop.f32.mrf.mxu3 }
  0xb9   : > { %v393_v63 = vadd.f32 %v1901_v42, %v392_v62 }
  0xbb   : > { %v480_v0 = vmax.f32 %v393_v63, 0.0  ;;  %v494_v63 = vmax.f32 %v435_v61, 0.0 }
  0xbd   : > { %556 = vmatmul.f32.gmra.mxu1 %v480_v0 }
  0xc0   : > { %v395_v2 = vpop.f32.mrf.mxu0  ;;  %v1942_v38 = vpop.f32.mrf.mxu3 }
  0xc1   : > { %v396_v3 = vadd.f32 %v1901_v42, %v395_v2 }
  0xc3   : > { %v481_v4 = vmax.f32 %v396_v3, 0.0 }
  0xc5   : > { %559 = vmatmul.f32.gmra.mxu1 %v481_v4 }
  0xc8   : > { %v398_v6 = vpop.f32.mrf.mxu0  ;;  %v1945_v43 = vpop.f32.mrf.mxu3 }
  0xc9   : > { %v399_v7 = vadd.f32 %v1901_v42, %v398_v6 }
  0xcb   : > { %v482_v8 = vmax.f32 %v399_v7, 0.0 }
  0xcd   : > { %562 = vmatmul.f32.gmra.mxu1 %v482_v8 }
  0xd0   : > { %v401_v10 = vpop.f32.mrf.mxu0  ;;  %v1954_v50 = vpop.f32.mrf.mxu3 }
  0xd1   : > { %v402_v11 = vadd.f32 %v1901_v42, %v401_v10 }
  0xd3   : > { %v483_v12 = vmax.f32 %v402_v11, 0.0 }
  0xd5   : > { %565 = vmatmul.f32.gmra.mxu1 %v483_v12 }
  0xd8   : > { %v404_v13 = vpop.f32.mrf.mxu0  ;;  %v1958_v57 = vpop.f32.mrf.mxu3 }
  0xd9   : > { %v405_v14 = vadd.f32 %v1901_v42, %v404_v13 }
  0xdb   : > { %v484_v15 = vmax.f32 %v405_v14, 0.0 }
  0xdd   : > { %568 = vmatmul.f32.gmra.mxu1 %v484_v15 }
  0xe0   : > { %v407_v16 = vpop.f32.mrf.mxu0  ;;  %v1962_v1 = vpop.f32.mrf.mxu3 }
  0xe1   : > { %v408_v17 = vadd.f32 %v1901_v42, %v407_v16 }
  0xe3   : > { %v485_v18 = vmax.f32 %v408_v17, 0.0 }
  0xe5   : > { %571 = vmatmul.f32.gmra.mxu1 %v485_v18 }
  0xe8   : > { %v410_v19 = vpop.f32.mrf.mxu0  ;;  %v1969_v15 = vpop.f32.mrf.mxu3 }
  0xe9   : > { %v411_v20 = vadd.f32 %v1901_v42, %v410_v19 }
  0xeb   : > { %v486_v21 = vmax.f32 %v411_v20, 0.0 }
  0xed   : > { %574 = vmatmul.f32.gmra.mxu1 %v486_v21  ;;  %v441_v21 = vadd.f32 %v1901_v42, %v1936_v30 }
  0xf0   : > { %v413_v23 = vpop.f32.mrf.mxu0 }
  0xf1   : > { %v414_v24 = vadd.f32 %v1901_v42, %v413_v23 }
  0xf3   : > { %v487_v25 = vmax.f32 %v414_v24, 0.0 }
  0xf5   : > { %577 = vmatmul.f32.gmra.mxu1 %v487_v25 }
  0xf8   : > { %v416_v27 = vpop.f32.mrf.mxu0 }
  0xf9   : > { %v417_v28 = vadd.f32 %v1901_v42, %v416_v27  ;;  %v496_v27 = vmax.f32 %v441_v21, 0.0 }
  0xfb   : > { %v488_v29 = vmax.f32 %v417_v28, 0.0 }
  0xfd   : > { %580 = vmatmul.f32.gmra.mxu1 %v488_v29 }
 0x100   : > { %v419_v31 = vpop.f32.mrf.mxu0 }
 0x101   : > { %v420_v32 = vadd.f32 %v1901_v42, %v419_v31 }
 0x103   : > { %v489_v33 = vmax.f32 %v420_v32, 0.0 }
 0x105   : > { %583 = vmatmul.f32.gmra.mxu1 %v489_v33  ;;  %v1977_v33 = vpop.f32.mrf.mxu3 }
 0x108   : > { %v422_v35 = vpop.f32.mrf.mxu0 }
 0x109   : > { %v423_v36 = vadd.f32 %v1901_v42, %v422_v35 }
 0x10b   : > { %v490_v37 = vmax.f32 %v423_v36, 0.0 }
 0x10d   : > { %586 = vmatmul.f32.gmra.mxu1 %v490_v37 }
 0x110   : > { %v425_v39 = vpop.f32.mrf.mxu0 }
 0x111   : > { %v426_v40 = vadd.f32 %v1901_v42, %v425_v39 }
 0x113   : > { %v491_v41 = vmax.f32 %v426_v40, 0.0 }
 0x115   : > { %589 = vmatmul.f32.vlgmr.msra.gmra.mxu2 %v491_v41  ;;  %v444_v41 = vadd.f32 %v1901_v42, %v1939_v34 }
 0x118   : > { %v428_v45 = vpop.f32.mrf.mxu0 }
 0x119   : > { %v429_v46 = vadd.f32 %v1901_v42, %v428_v45 }
 0x11a   : > { %v545_v47 = vpop.f32.mrf.mxu1 }
 0x11b   : > { %v492_v48 = vmax.f32 %v429_v46, 0.0  ;;  %v546_v49 = vadd.f32 %v1950_v44, %v545_v47 }
 0x11d   : > { %v1398_v51 = vmul.f32 -1.442695, %v546_v49  ;;  %592 = vmatmul.f32.gmra.mxu2 %v492_v48 }
 0x11f   : > { %1515 = vpow2.f32 %v1398_v51  ;;  %v497_v51 = vmax.f32 %v444_v41, 0.0  ;;  %v453_v41 = vadd.f32 %v1901_v42, %v1954_v50 }
 0x120   : > { %v431_v52 = vpop.f32.mrf.mxu0 }
 0x121   : > { %v432_v53 = vadd.f32 %v1901_v42, %v431_v52 }
 0x122   : > { %v548_v54 = vpop.f32.mrf.mxu1 }
 0x123   : > { %v493_v55 = vmax.f32 %v432_v53, 0.0  ;;  %v549_v56 = vadd.f32 %v1950_v44, %v548_v54 }
 0x125   : > { %v1516_v58 = vpop.eup %1515  ;;  %v1399_v59 = vmul.f32 -1.442695, %v549_v56  ;;  %595 = vmatmul.f32.gmra.mxu2 %v493_v55 }
 0x126   : > { %v737_v60 = vadd.f32 1.0, %v1516_v58  ;;  %v1983_v58 = vpop.f32.mrf.mxu3 }
 0x127   : > { %1517 = vpow2.f32 %v1399_v59 }
 0x128   : > { %1519 = vrcp.f32 %v737_v60  ;;  %v780_v10 = vand.u32 2147483648, %v737_v60  ;;  %v778_v13 = vand.u32 2147483647, %v737_v60  ;;  %vm774_vm2 = vweird.f32 %v737_v60 }
 0x12a   : > { %v551_v62 = vpop.f32.mrf.mxu1  ;;  %v781_v20 = vor.u32 1.1754944e-38, %v780_v10  ;;  %vm779_vm4 = vcmp.eq.f32.partialorder %v778_v13, 8.507059e+37 }
 0x12b   : > { %v552_v0 = vadd.f32 %v1950_v44, %v551_v62 }
 0x12d   : > { %v1518_v2 = vpop.eup %1517  ;;  %v1400_v3 = vmul.f32 -1.442695, %v552_v0  ;;  %598 = vmatmul.f32.gmra.mxu2 %v494_v63  ;;  %v447_v63 = vadd.f32 %v1901_v42, %v1942_v38 }
 0x12e   : > { %v1520_v4 = vpop.eup %1519  ;;  %v738_v6 = vadd.f32 1.0, %v1518_v2 }
 0x12f   : > { %v770_v7 = vmul.f32 %v1520_v4, %v737_v60  ;;  %1521 = vpow2.f32 %v1400_v3  ;;  %vm775_vm1 = vweird.f32 %v1520_v4 }
 0x130   : > { %1523 = vrcp.f32 %v738_v6  ;;  %vm776_vm3 = vmor %vm774_vm2, %vm775_vm1  ;;  %v795_v28 = vand.u32 2147483648, %v738_v6  ;;  %v793_v32 = vand.u32 2147483647, %v738_v6  ;;  %vm789_vm6 = vweird.f32 %v738_v6 }
 0x131   : > { %v771_v8 = vsub.f32 1.0, %v770_v7 }
 0x132   : > { %v554_v11 = vpop.f32.mrf.mxu1  ;;  %v796_v40 = vor.u32 1.1754944e-38, %v795_v28  ;;  %vm794_vm8 = vcmp.eq.f32.partialorder %v793_v32, 8.507059e+37 }
 0x133   : > { %v772_v12 = vmul.f32 %v1520_v4, %v771_v8  ;;  %v555_v14 = vadd.f32 %v1950_v44, %v554_v11 }
 0x135   : > { %v1522_v16 = vpop.eup %1521  ;;  %v773_v17 = vadd.f32 %v1520_v4, %v772_v12  ;;  %v1401_v18 = vmul.f32 -1.442695, %v555_v14  ;;  %601 = vmatmul.f32.gmra.mxu2 %v495_v9  ;;  %v470_v12 = vpop.f32.mrf.mxu3 }
 0x136   : > { %v1524_v19 = vpop.eup %1523  ;;  %v739_v22 = vadd.f32 1.0, %v1522_v16  ;;  %v471_v16 = vadd.f32 %v1901_v42, %v470_v12 }
 0x137   : > { %v777_v23 = vsel %vm776_vm3, %v1520_v4, %v773_v17  ;;  %v785_v24 = vmul.f32 %v1524_v19, %v738_v6  ;;  %1525 = vpow2.f32 %v1401_v18  ;;  %vm790_vm5 = vweird.f32 %v1524_v19 }
 0x138   : > { %v782_v25 = vsel %vm779_vm4, %v781_v20, %v777_v23  ;;  %1527 = vrcp.f32 %v739_v22  ;;  %vm791_vm7 = vmor %vm789_vm6, %vm790_vm5  ;;  %v810_v52 = vand.u32 2147483648, %v739_v22  ;;  %v808_v55 = vand.u32 2147483647, %v739_v22 }
 0x139   : > { %1249 = vst [vmem:[%s1973_s9] sm:$0xff] %v782_v25  ;;  %v786_v26 = vsub.f32 1.0, %v785_v24  ;;  %vm804_vm10 = vweird.f32 %v739_v22  ;;  %v498_v6 = vmax.f32 %v447_v63, 0.0  ;;  %v506_v25 = vmax.f32 %v471_v16, 0.0 }
 0x13a   : > { %v557_v29 = vpop.f32.mrf.mxu1  ;;  %v811_v62 = vor.u32 1.1754944e-38, %v810_v52  ;;  %vm809_vm12 = vcmp.eq.f32.partialorder %v808_v55, 8.507059e+37  ;;  %v500_v52 = vmax.f32 %v453_v41, 0.0  ;;  %v456_v63 = vadd.f32 %v1901_v42, %v1958_v57 }
 0x13b   : > { %v787_v31 = vmul.f32 %v1524_v19, %v786_v26  ;;  %v558_v30 = vadd.f32 %v1950_v44, %v557_v29  ;;  %634 = vmatmul.f32.vlgmr.msrb.gmra.mxu3 %v506_v25  ;;  %v459_v16 = vadd.f32 %v1901_v42, %v1962_v1 }
 0x13d   : > { %v1526_v35 = vpop.eup %1525  ;;  %v788_v36 = vadd.f32 %v1524_v19, %v787_v31  ;;  %v1402_v37 = vmul.f32 -1.442695, %v558_v30  ;;  %604 = vmatmul.f32.gmra.mxu2 %v496_v27 }
 0x13e   : > { %v1528_v39 = vpop.eup %1527  ;;  %v740_v45 = vadd.f32 1.0, %v1526_v35 }
 0x13f   : > { %v792_v46 = vsel %vm791_vm7, %v1524_v19, %v788_v36  ;;  %v800_v47 = vmul.f32 %v1528_v39, %v739_v22  ;;  %1529 = vpow2.f32 %v1402_v37  ;;  %vm805_vm9 = vweird.f32 %v1528_v39 }
 0x140   : > { %v797_v48 = vsel %vm794_vm8, %v796_v40, %v792_v46  ;;  %1531 = vrcp.f32 %v740_v45  ;;  %vm806_vm11 = vmor %vm804_vm10, %vm805_vm9  ;;  %v825_v7 = vand.u32 2147483648, %v740_v45  ;;  %v823_v10 = vand.u32 2147483647, %v740_v45 }
 0x141   : > { %1250 = vst [vmem:[%s1973_s9 + $0x8] sm:$0xff] %v797_v48  ;;  %v801_v49 = vsub.f32 1.0, %v800_v47  ;;  %vm819_vm14 = vweird.f32 %v740_v45  ;;  %v450_v19 = vadd.f32 %v1901_v42, %v1945_v43  ;;  %v473_v43 = vpop.f32.mrf.mxu3 }
 0x142   : > { %v560_v53 = vpop.f32.mrf.mxu1  ;;  %v826_v18 = vor.u32 1.1754944e-38, %v825_v7  ;;  %vm824_vm0 = vcmp.eq.f32.partialorder %v823_v10, 8.507059e+37  ;;  %v474_v37 = vadd.f32 %v1901_v42, %v473_v43  ;;  %v462_v43 = vadd.f32 %v1901_v42, %v1969_v15 }
 0x143   : > { %v802_v54 = vmul.f32 %v1528_v39, %v801_v49  ;;  %v561_v56 = vadd.f32 %v1950_v44, %v560_v53  ;;  %v499_v26 = vmax.f32 %v450_v19, 0.0 }
 0x145   : > { %v1530_v34 = vpop.eup %1529  ;;  %v803_v59 = vadd.f32 %v1528_v39, %v802_v54  ;;  %v1403_v60 = vmul.f32 -1.442695, %v561_v56  ;;  %607 = vmatmul.f32.gmra.mxu2 %v497_v51  ;;  %v507_v51 = vmax.f32 %v474_v37, 0.0 }
 0x146   : > { %v1532_v61 = vpop.eup %1531  ;;  %v741_v0 = vadd.f32 1.0, %v1530_v34 }
 0x147   : > { %v807_v2 = vsel %vm806_vm11, %v1528_v39, %v803_v59  ;;  %v815_v3 = vmul.f32 %v1532_v61, %v740_v45  ;;  %1533 = vpow2.f32 %v1403_v60  ;;  %vm820_vm13 = vweird.f32 %v1532_v61  ;;  %637 = vmatmul.f32.gmra.mxu3 %v507_v51 }
 0x148   : > { %v812_v4 = vsel %vm809_vm12, %v811_v62, %v807_v2  ;;  %1535 = vrcp.f32 %v741_v0  ;;  %vm821_vm15 = vmor %vm819_vm14, %vm820_vm13  ;;  %v840_v27 = vand.u32 2147483648, %v741_v0  ;;  %v838_v31 = vand.u32 2147483647, %v741_v0 }
 0x149   : > { %1251 = vst [vmem:[%s1973_s9 + $0x10] sm:$0xff] %v812_v4  ;;  %v816_v5 = vsub.f32 1.0, %v815_v3  ;;  %vm834_vm2 = vweird.f32 %v741_v0 }
 0x14a   : > { %v563_v8 = vpop.f32.mrf.mxu1  ;;  %v841_v40 = vor.u32 1.1754944e-38, %v840_v27  ;;  %vm839_vm4 = vcmp.eq.f32.partialorder %v838_v31, 8.507059e+37 }
 0x14b   : > { %v817_v9 = vmul.f32 %v1532_v61, %v816_v5  ;;  %v564_v11 = vadd.f32 %v1950_v44, %v563_v8 }
 0x14d   : > { %v1534_v13 = vpop.eup %1533  ;;  %v818_v38 = vadd.f32 %v1532_v61, %v817_v9  ;;  %v1404_v14 = vmul.f32 -1.442695, %v564_v11  ;;  %610 = vmatmul.f32.gmra.mxu2 %v498_v6  ;;  %v501_v6 = vmax.f32 %v456_v63, 0.0 }
 0x14e   : > { %v1536_v17 = vpop.eup %1535  ;;  %v742_v20 = vadd.f32 1.0, %v1534_v13 }
 0x14f   : > { %v822_v21 = vsel %vm821_vm15, %v1532_v61, %v818_v38  ;;  %v830_v22 = vmul.f32 %v1536_v17, %v741_v0  ;;  %1537 = vpow2.f32 %v1404_v14  ;;  %vm835_vm1 = vweird.f32 %v1536_v17 }
 0x150   : > { %v827_v23 = vsel %vm824_vm0, %v826_v18, %v822_v21  ;;  %1539 = vrcp.f32 %v742_v20  ;;  %vm836_vm3 = vmor %vm834_vm2, %vm835_vm1  ;;  %v855_v53 = vand.u32 2147483648, %v742_v20  ;;  %v853_v56 = vand.u32 2147483647, %v742_v20 }
 0x151   : > { %1252 = vst [vmem:[%s1973_s9 + $0x18] sm:$0xff] %v827_v23  ;;  %v831_v24 = vsub.f32 1.0, %v830_v22  ;;  %vm849_vm6 = vweird.f32 %v742_v20  ;;  %v502_v22 = vmax.f32 %v459_v16, 0.0 }
 0x152   : > { %v566_v28 = vpop.f32.mrf.mxu1  ;;  %v856_v62 = vor.u32 1.1754944e-38, %v855_v53  ;;  %vm854_vm8 = vcmp.eq.f32.partialorder %v853_v56, 8.507059e+37 }
 0x153   : > { %v832_v29 = vmul.f32 %v1536_v17, %v831_v24  ;;  %v567_v32 = vadd.f32 %v1950_v44, %v566_v28 }
 0x155   : > { %v1538_v30 = vpop.eup %1537  ;;  %v833_v35 = vadd.f32 %v1536_v17, %v832_v29  ;;  %v1405_v36 = vmul.f32 -1.442695, %v567_v32  ;;  %613 = vmatmul.f32.gmra.mxu2 %v499_v26 }
 0x156   : > { %v1540_v39 = vpop.eup %1539  ;;  %v743_v45 = vadd.f32 1.0, %v1538_v30 }
 0x157   : > { %v837_v46 = vsel %vm836_vm3, %v1536_v17, %v833_v35  ;;  %v845_v47 = vmul.f32 %v1540_v39, %v742_v20  ;;  %1541 = vpow2.f32 %v1405_v36  ;;  %vm850_vm5 = vweird.f32 %v1540_v39 }
 0x158   : > { %v842_v48 = vsel %vm839_vm4, %v841_v40, %v837_v46  ;;  %1543 = vrcp.f32 %v743_v45  ;;  %vm851_vm7 = vmor %vm849_vm6, %vm850_vm5  ;;  %v870_v7 = vand.u32 2147483648, %v743_v45  ;;  %v868_v10 = vand.u32 2147483647, %v743_v45 }
 0x159   : > { %1253 = vst [vmem:[%s1973_s9 + $0x20] sm:$0xff] %v842_v48  ;;  %v846_v49 = vsub.f32 1.0, %v845_v47  ;;  %vm864_vm10 = vweird.f32 %v743_v45  ;;  %v503_v40 = vmax.f32 %v462_v43, 0.0 }
 0x15a   : > { %v569_v54 = vpop.f32.mrf.mxu1  ;;  %v871_v14 = vor.u32 1.1754944e-38, %v870_v7  ;;  %vm869_vm12 = vcmp.eq.f32.partialorder %v868_v10, 8.507059e+37  ;;  %v468_v7 = vadd.f32 %v1901_v42, %v1983_v58 }
 0x15b   : > { %v847_v55 = vmul.f32 %v1540_v39, %v846_v49  ;;  %v570_v34 = vadd.f32 %v1950_v44, %v569_v54  ;;  %v465_v54 = vadd.f32 %v1901_v42, %v1977_v33 }
 0x15d   : > { %v1542_v50 = vpop.eup %1541  ;;  %v848_v59 = vadd.f32 %v1540_v39, %v847_v55  ;;  %v1406_v60 = vmul.f32 -1.442695, %v570_v34  ;;  %616 = vmatmul.f32.gmra.mxu2 %v500_v52 }
 0x15e   : > { %v1544_v61 = vpop.eup %1543  ;;  %v744_v0 = vadd.f32 1.0, %v1542_v50 }
 0x15f   : > { %v852_v2 = vsel %vm851_vm7, %v1540_v39, %v848_v59  ;;  %v860_v3 = vmul.f32 %v1544_v61, %v743_v45  ;;  %1545 = vpow2.f32 %v1406_v60  ;;  %vm865_vm9 = vweird.f32 %v1544_v61 }
 0x160   : > { %v857_v4 = vsel %vm854_vm8, %v856_v62, %v852_v2  ;;  %1547 = vrcp.f32 %v744_v0  ;;  %vm866_vm11 = vmor %vm864_vm10, %vm865_vm9  ;;  %v885_v23 = vand.u32 2147483648, %v744_v0  ;;  %v883_v26 = vand.u32 2147483647, %v744_v0 }
 0x161   : > { %1254 = vst [vmem:[%s1973_s9 + $0x28] sm:$0xff] %v857_v4  ;;  %v861_v5 = vsub.f32 1.0, %v860_v3  ;;  %vm879_vm14 = vweird.f32 %v744_v0  ;;  %v504_v60 = vmax.f32 %v465_v54, 0.0 }
 0x162   : > { %v572_v8 = vpop.f32.mrf.mxu1  ;;  %v886_v32 = vor.u32 1.1754944e-38, %v885_v23  ;;  %vm884_vm0 = vcmp.eq.f32.partialorder %v883_v26, 8.507059e+37 }
 0x163   : > { %v862_v9 = vmul.f32 %v1544_v61, %v861_v5  ;;  %v573_v11 = vadd.f32 %v1950_v44, %v572_v8 }
 0x165   : > { %v1546_v12 = vpop.eup %1545  ;;  %v863_v57 = vadd.f32 %v1544_v61, %v862_v9  ;;  %v1407_v13 = vmul.f32 -1.442695, %v573_v11  ;;  %619 = vmatmul.f32.gmra.mxu2 %v501_v6 }
 0x166   : > { %v1548_v38 = vpop.eup %1547  ;;  %v745_v17 = vadd.f32 1.0, %v1546_v12 }
 0x167   : > { %v867_v18 = vsel %vm866_vm11, %v1544_v61, %v863_v57  ;;  %v875_v19 = vmul.f32 %v1548_v38, %v744_v0  ;;  %1549 = vpow2.f32 %v1407_v13  ;;  %vm880_vm13 = vweird.f32 %v1548_v38 }
 0x168   : > { %v872_v20 = vsel %vm869_vm12, %v871_v14, %v867_v18  ;;  %1551 = vrcp.f32 %v745_v17  ;;  %vm881_vm15 = vmor %vm879_vm14, %vm880_vm13  ;;  %v900_v41 = vand.u32 2147483648, %v745_v17  ;;  %v898_v47 = vand.u32 2147483647, %v745_v17 }
 0x169   : > { %1255 = vst [vmem:[%s1973_s9 + $0x30] sm:$0xff] %v872_v20  ;;  %v876_v21 = vsub.f32 1.0, %v875_v19  ;;  %vm894_vm2 = vweird.f32 %v745_v17  ;;  %v505_v57 = vmax.f32 %v468_v7, 0.0 }
 0x16a   : > { %v575_v24 = vpop.f32.mrf.mxu1  ;;  %v901_v53 = vor.u32 1.1754944e-38, %v900_v41  ;;  %vm899_vm4 = vcmp.eq.f32.partialorder %v898_v47, 8.507059e+37 }
 0x16b   : > { %v877_v25 = vmul.f32 %v1548_v38, %v876_v21  ;;  %v576_v27 = vadd.f32 %v1950_v44, %v575_v24 }
 0x16d   : > { %v1550_v28 = vpop.eup %1549  ;;  %v878_v1 = vadd.f32 %v1548_v38, %v877_v25  ;;  %v1408_v29 = vmul.f32 -1.442695, %v576_v27  ;;  %622 = vmatmul.f32.gmra.mxu2 %v502_v22 }
 0x16e   : > { %v1552_v31 = vpop.eup %1551  ;;  %v746_v30 = vadd.f32 1.0, %v1550_v28 }
 0x16f   : > { %v882_v35 = vsel %vm881_vm15, %v1548_v38, %v878_v1  ;;  %v890_v36 = vmul.f32 %v1552_v31, %v745_v17  ;;  %1553 = vpow2.f32 %v1408_v29  ;;  %vm895_vm1 = vweird.f32 %v1552_v31 }
 0x170   : > { %v887_v37 = vsel %vm884_vm0, %v886_v32, %v882_v35  ;;  %1555 = vrcp.f32 %v746_v30  ;;  %vm896_vm3 = vmor %vm894_vm2, %vm895_vm1  ;;  %v915_v61 = vand.u32 2147483648, %v746_v30  ;;  %v913_v0 = vand.u32 2147483647, %v746_v30 }
 0x171   : > { %1256 = vst [vmem:[%s1973_s9 + $0x38] sm:$0xff] %v887_v37  ;;  %v891_v39 = vsub.f32 1.0, %v890_v36  ;;  %vm909_vm6 = vweird.f32 %v746_v30 }
 0x172   : > { %v578_v45 = vpop.f32.mrf.mxu1  ;;  %v916_v6 = vor.u32 1.1754944e-38, %v915_v61  ;;  %vm914_vm8 = vcmp.eq.f32.partialorder %v913_v0, 8.507059e+37 }
 0x173   : > { %v892_v46 = vmul.f32 %v1552_v31, %v891_v39  ;;  %v579_v48 = vadd.f32 %v1950_v44, %v578_v45 }
 0x175   : > { %v1554_v49 = vpop.eup %1553  ;;  %v893_v15 = vadd.f32 %v1552_v31, %v892_v46  ;;  %v1409_v51 = vmul.f32 -1.442695, %v579_v48  ;;  %625 = vmatmul.f32.gmra.mxu2 %v503_v40 }
 0x176   : > { %v1556_v52 = vpop.eup %1555  ;;  %v747_v55 = vadd.f32 1.0, %v1554_v49 }
 0x177   : > { %v897_v56 = vsel %vm896_vm3, %v1552_v31, %v893_v15  ;;  %v905_v34 = vmul.f32 %v1556_v52, %v746_v30  ;;  %1557 = vpow2.f32 %v1409_v51  ;;  %vm910_vm5 = vweird.f32 %v1556_v52 }
 0x178   : > { %v902_v50 = vsel %vm899_vm4, %v901_v53, %v897_v56  ;;  %1559 = vrcp.f32 %v747_v55  ;;  %vm911_vm7 = vmor %vm909_vm6, %vm910_vm5  ;;  %v930_v13 = vand.u32 2147483648, %v747_v55  ;;  %v928_v16 = vand.u32 2147483647, %v747_v55 }
 0x179   : > { %1257 = vst [vmem:[%s1973_s9 + $0x40] sm:$0xff] %v902_v50  ;;  %v906_v59 = vsub.f32 1.0, %v905_v34  ;;  %vm924_vm10 = vweird.f32 %v747_v55 }
 0x17a   : > { %v581_v62 = vpop.f32.mrf.mxu1  ;;  %v931_v20 = vor.u32 1.1754944e-38, %v930_v13  ;;  %vm929_vm12 = vcmp.eq.f32.partialorder %v928_v16, 8.507059e+37 }
 0x17b   : > { %v907_v63 = vmul.f32 %v1556_v52, %v906_v59  ;;  %v582_v2 = vadd.f32 %v1950_v44, %v581_v62 }
 0x17d   : > { %v1558_v3 = vpop.eup %1557  ;;  %v908_v33 = vadd.f32 %v1556_v52, %v907_v63  ;;  %v1410_v4 = vmul.f32 -1.442695, %v582_v2  ;;  %628 = vmatmul.f32.gmra.mxu2 %v504_v60 }
 0x17e   : > { %v1560_v5 = vpop.eup %1559  ;;  %v748_v8 = vadd.f32 1.0, %v1558_v3 }
 0x17f   : > { %v912_v9 = vsel %vm911_vm7, %v1556_v52, %v908_v33  ;;  %v920_v10 = vmul.f32 %v1560_v5, %v747_v55  ;;  %1561 = vpow2.f32 %v1410_v4  ;;  %vm925_vm9 = vweird.f32 %v1560_v5 }
 0x180   : > { %v917_v11 = vsel %vm914_vm8, %v916_v6, %v912_v9  ;;  %1563 = vrcp.f32 %v748_v8  ;;  %vm926_vm11 = vmor %vm924_vm10, %vm925_vm9  ;;  %v945_v26 = vand.u32 2147483648, %v748_v8  ;;  %v943_v1 = vand.u32 2147483647, %v748_v8 }
 0x181   : > { %1258 = vst [vmem:[%s1973_s9 + $0x48] sm:$0xff] %v917_v11  ;;  %v921_v12 = vsub.f32 1.0, %v920_v10  ;;  %vm939_vm14 = vweird.f32 %v748_v8 }
 0x182   : > { %v584_v38 = vpop.f32.mrf.mxu1  ;;  %v946_v35 = vor.u32 1.1754944e-38, %v945_v26  ;;  %vm944_vm0 = vcmp.eq.f32.partialorder %v943_v1, 8.507059e+37 }
 0x183   : > { %v922_v14 = vmul.f32 %v1560_v5, %v921_v12  ;;  %v585_v17 = vadd.f32 %v1950_v44, %v584_v38 }
 0x185   : > { %v1562_v18 = vpop.eup %1561  ;;  %v923_v42 = vadd.f32 %v1560_v5, %v922_v14  ;;  %v1411_v58 = vmul.f32 -1.442695, %v585_v17  ;;  %631 = vmatmul.f32.gmra.mxu2 %v505_v57 }
 0x186   : > { %v1564_v19 = vpop.eup %1563  ;;  %v749_v21 = vadd.f32 1.0, %v1562_v18 }
 0x187   : > { %v927_v22 = vsel %vm926_vm11, %v1560_v5, %v923_v42  ;;  %v935_v23 = vmul.f32 %v1564_v19, %v748_v8  ;;  %1565 = vpow2.f32 %v1411_v58  ;;  %vm940_vm13 = vweird.f32 %v1564_v19 }
 0x188   : > { %v932_v24 = vsel %vm929_vm12, %v931_v20, %v927_v22  ;;  %1567 = vrcp.f32 %v749_v21  ;;  %vm941_vm15 = vmor %vm939_vm14, %vm940_vm13  ;;  %v960_v45 = vand.u32 2147483648, %v749_v21  ;;  %v958_v47 = vand.u32 2147483647, %v749_v21 }
 0x189   : > { %1259 = vst [vmem:[%s1973_s9 + $0x50] sm:$0xff] %v932_v24  ;;  %v936_v25 = vsub.f32 1.0, %v935_v23  ;;  %vm954_vm2 = vweird.f32 %v749_v21 }
 0x18a   : > { %v587_v27 = vpop.f32.mrf.mxu1  ;;  %v961_v51 = vor.u32 1.1754944e-38, %v960_v45  ;;  %vm959_vm4 = vcmp.eq.f32.partialorder %v958_v47, 8.507059e+37 }
 0x18b   : > { %v937_v28 = vmul.f32 %v1564_v19, %v936_v25  ;;  %v588_v29 = vadd.f32 %v1950_v44, %v587_v27 }
 0x18d   : > { %v1566_v31 = vpop.eup %1565  ;;  %v938_v32 = vadd.f32 %v1564_v19, %v937_v28  ;;  %v1412_v43 = vmul.f32 -1.442695, %v588_v29 }
 0x18e   : > { %v1568_v30 = vpop.eup %1567  ;;  %v750_v36 = vadd.f32 1.0, %v1566_v31 }
 0x18f   : > { %v942_v37 = vsel %vm941_vm15, %v1564_v19, %v938_v32  ;;  %v950_v39 = vmul.f32 %v1568_v30, %v749_v21  ;;  %1569 = vpow2.f32 %v1412_v43  ;;  %vm955_vm1 = vweird.f32 %v1568_v30 }
 0x190   : > { %v947_v40 = vsel %vm944_vm0, %v946_v35, %v942_v37  ;;  %1571 = vrcp.f32 %v750_v36  ;;  %vm956_vm3 = vmor %vm954_vm2, %vm955_vm1  ;;  %v975_v59 = vand.u32 2147483648, %v750_v36  ;;  %v973_v61 = vand.u32 2147483647, %v750_v36 }
 0x191   : > { %1260 = vst [vmem:[%s1973_s9 + $0x58] sm:$0xff] %v947_v40  ;;  %v951_v41 = vsub.f32 1.0, %v950_v39  ;;  %vm969_vm6 = vweird.f32 %v750_v36 }
 0x192   : > { %v976_v2 = vor.u32 1.1754944e-38, %v975_v59  ;;  %vm974_vm8 = vcmp.eq.f32.partialorder %v973_v61, 8.507059e+37 }
 0x193   : > { %v952_v46 = vmul.f32 %v1568_v30, %v951_v41 }
 0x195   : > { %v1570_v48 = vpop.eup %1569  ;;  %v953_v49 = vadd.f32 %v1568_v30, %v952_v46 }
 0x196   : > { %v1572_v15 = vpop.eup %1571  ;;  %v751_v52 = vadd.f32 1.0, %v1570_v48 }
 0x197   : > { %v957_v53 = vsel %vm956_vm3, %v1568_v30, %v953_v49  ;;  %v965_v54 = vmul.f32 %v1572_v15, %v750_v36  ;;  %vm970_vm5 = vweird.f32 %v1572_v15 }
 0x198   : > { %v962_v55 = vsel %vm959_vm4, %v961_v51, %v957_v53  ;;  %1573 = vrcp.f32 %v751_v52  ;;  %v590_v56 = vpop.f32.mrf.mxu2  ;;  %vm971_vm7 = vmor %vm969_vm6, %vm970_vm5  ;;  %v990_v8 = vand.u32 2147483648, %v751_v52  ;;  %v988_v11 = vand.u32 2147483647, %v751_v52 }
 0x199   : > { %1261 = vst [vmem:[%s1973_s9 + $0x60] sm:$0xff] %v962_v55  ;;  %v966_v34 = vsub.f32 1.0, %v965_v54  ;;  %v591_v50 = vadd.f32 %v1950_v44, %v590_v56  ;;  %vm984_vm10 = vweird.f32 %v751_v52 }
 0x19a   : > { %v991_v38 = vor.u32 1.1754944e-38, %v990_v8  ;;  %vm989_vm12 = vcmp.eq.f32.partialorder %v988_v11, 8.507059e+37 }
 0x19b   : > { %v967_v60 = vmul.f32 %v1572_v15, %v966_v34  ;;  %v1413_v62 = vmul.f32 -1.442695, %v591_v50 }
 0x19d   : > { %v968_v63 = vadd.f32 %v1572_v15, %v967_v60  ;;  %1575 = vpow2.f32 %v1413_v62 }
 0x19e   : > { %v1574_v0 = vpop.eup %1573 }
 0x19f   : > { %v972_v3 = vsel %vm971_vm7, %v1572_v15, %v968_v63  ;;  %v980_v33 = vmul.f32 %v1574_v0, %v751_v52  ;;  %vm985_vm9 = vweird.f32 %v1574_v0 }
 0x1a0   : > { %v977_v4 = vsel %vm974_vm8, %v976_v2, %v972_v3  ;;  %v593_v5 = vpop.f32.mrf.mxu2  ;;  %vm986_vm11 = vmor %vm984_vm10, %vm985_vm9 }
 0x1a1   : > { %1262 = vst [vmem:[%s1973_s9 + $0x68] sm:$0xff] %v977_v4  ;;  %v981_v6 = vsub.f32 1.0, %v980_v33  ;;  %v594_v7 = vadd.f32 %v1950_v44, %v593_v5 }
 0x1a3   : > { %v1576_v9 = vpop.eup %1575  ;;  %v982_v10 = vmul.f32 %v1574_v0, %v981_v6  ;;  %v1414_v12 = vmul.f32 -1.442695, %v594_v7 }
 0x1a4   : > { %v752_v57 = vadd.f32 1.0, %v1576_v9 }
 0x1a5   : > { %v983_v13 = vadd.f32 %v1574_v0, %v982_v10  ;;  %1577 = vpow2.f32 %v1414_v12 }
 0x1a6   : > { %1579 = vrcp.f32 %v752_v57  ;;  %v1005_v23 = vand.u32 2147483648, %v752_v57  ;;  %v1003_v26 = vand.u32 2147483647, %v752_v57  ;;  %vm999_vm14 = vweird.f32 %v752_v57 }
 0x1a7   : > { %v987_v14 = vsel %vm986_vm11, %v1574_v0, %v983_v13 }
 0x1a8   : > { %v992_v16 = vsel %vm989_vm12, %v991_v38, %v987_v14  ;;  %v596_v17 = vpop.f32.mrf.mxu2  ;;  %v1006_v32 = vor.u32 1.1754944e-38, %v1005_v23  ;;  %vm1004_vm0 = vcmp.eq.f32.partialorder %v1003_v26, 8.507059e+37 }
 0x1a9   : > { %1263 = vst [vmem:[%s1973_s9 + $0x70] sm:$0xff] %v992_v16  ;;  %v597_v18 = vadd.f32 %v1950_v44, %v596_v17 }
 0x1ab   : > { %v1578_v42 = vpop.eup %1577  ;;  %v1415_v58 = vmul.f32 -1.442695, %v597_v18 }
 0x1ac   : > { %v1580_v19 = vpop.eup %1579  ;;  %v753_v20 = vadd.f32 1.0, %v1578_v42 }
 0x1ad   : > { %v995_v21 = vmul.f32 %v1580_v19, %v752_v57  ;;  %1581 = vpow2.f32 %v1415_v58  ;;  %vm1000_vm13 = vweird.f32 %v1580_v19 }
 0x1ae   : > { %1583 = vrcp.f32 %v753_v20  ;;  %vm1001_vm15 = vmor %vm999_vm14, %vm1000_vm13  ;;  %v1020_v39 = vand.u32 2147483648, %v753_v20  ;;  %v1018_v45 = vand.u32 2147483647, %v753_v20  ;;  %vm1014_vm2 = vweird.f32 %v753_v20 }
 0x1af   : > { %v996_v22 = vsub.f32 1.0, %v995_v21 }
 0x1b0   : > { %v599_v24 = vpop.f32.mrf.mxu2  ;;  %v1021_v51 = vor.u32 1.1754944e-38, %v1020_v39  ;;  %vm1019_vm4 = vcmp.eq.f32.partialorder %v1018_v45, 8.507059e+37 }
 0x1b1   : > { %v997_v25 = vmul.f32 %v1580_v19, %v996_v22  ;;  %v600_v27 = vadd.f32 %v1950_v44, %v599_v24 }
 0x1b3   : > { %v1582_v28 = vpop.eup %1581  ;;  %v998_v1 = vadd.f32 %v1580_v19, %v997_v25  ;;  %v1416_v29 = vmul.f32 -1.442695, %v600_v27 }
 0x1b4   : > { %v1584_v31 = vpop.eup %1583  ;;  %v754_v43 = vadd.f32 1.0, %v1582_v28 }
 0x1b5   : > { %v1002_v30 = vsel %vm1001_vm15, %v1580_v19, %v998_v1  ;;  %v1010_v35 = vmul.f32 %v1584_v31, %v753_v20  ;;  %1585 = vpow2.f32 %v1416_v29  ;;  %vm1015_vm1 = vweird.f32 %v1584_v31 }
 0x1b6   : > { %v1007_v36 = vsel %vm1004_vm0, %v1006_v32, %v1002_v30  ;;  %1587 = vrcp.f32 %v754_v43  ;;  %vm1016_vm3 = vmor %vm1014_vm2, %vm1015_vm1  ;;  %v1035_v34 = vand.u32 2147483648, %v754_v43  ;;  %v1033_v60 = vand.u32 2147483647, %v754_v43 }
 0x1b7   : > { %1264 = vst [vmem:[%s1973_s9 + $0x78] sm:$0xff] %v1007_v36  ;;  %v1011_v37 = vsub.f32 1.0, %v1010_v35  ;;  %vm1029_vm6 = vweird.f32 %v754_v43 }
 0x1b8   : > { %v602_v40 = vpop.f32.mrf.mxu2  ;;  %v1036_v3 = vor.u32 1.1754944e-38, %v1035_v34  ;;  %vm1034_vm8 = vcmp.eq.f32.partialorder %v1033_v60, 8.507059e+37 }
 0x1b9   : > { %v1012_v41 = vmul.f32 %v1584_v31, %v1011_v37  ;;  %v603_v46 = vadd.f32 %v1950_v44, %v602_v40 }
 0x1bb   : > { %v1586_v47 = vpop.eup %1585  ;;  %v1013_v48 = vadd.f32 %v1584_v31, %v1012_v41  ;;  %v1417_v49 = vmul.f32 -1.442695, %v603_v46 }
 0x1bc   : > { %v1588_v15 = vpop.eup %1587  ;;  %v755_v52 = vadd.f32 1.0, %v1586_v47 }
 0x1bd   : > { %v1017_v53 = vsel %vm1016_vm3, %v1584_v31, %v1013_v48  ;;  %v1025_v54 = vmul.f32 %v1588_v15, %v754_v43  ;;  %1589 = vpow2.f32 %v1417_v49  ;;  %vm1030_vm5 = vweird.f32 %v1588_v15 }
 0x1be   : > { %v1022_v55 = vsel %vm1019_vm4, %v1021_v51, %v1017_v53  ;;  %1591 = vrcp.f32 %v755_v52  ;;  %vm1031_vm7 = vmor %vm1029_vm6, %vm1030_vm5  ;;  %v1050_v8 = vand.u32 2147483648, %v755_v52  ;;  %v1048_v11 = vand.u32 2147483647, %v755_v52  ;;  %v635_v30 = vpop.f32.mrf.mxu3 }
 0x1bf   : > { %1265 = vst [vmem:[%s1973_s9 + $0x80] sm:$0xff] %v1022_v55  ;;  %v1026_v56 = vsub.f32 1.0, %v1025_v54  ;;  %vm1044_vm10 = vweird.f32 %v755_v52 }
 0x1c0   : > { %v605_v50 = vpop.f32.mrf.mxu2  ;;  %v1051_v16 = vor.u32 1.1754944e-38, %v1050_v8  ;;  %vm1049_vm12 = vcmp.eq.f32.partialorder %v1048_v11, 8.507059e+37 }
 0x1c1   : > { %v1027_v59 = vmul.f32 %v1588_v15, %v1026_v56  ;;  %v606_v61 = vadd.f32 %v1950_v44, %v605_v50 }
 0x1c3   : > { %v1590_v62 = vpop.eup %1589  ;;  %v1028_v63 = vadd.f32 %v1588_v15, %v1027_v59  ;;  %v1418_v0 = vmul.f32 -1.442695, %v606_v61 }
 0x1c4   : > { %v1592_v2 = vpop.eup %1591  ;;  %v756_v33 = vadd.f32 1.0, %v1590_v62 }
 0x1c5   : > { %v1032_v4 = vsel %vm1031_vm7, %v1588_v15, %v1028_v63  ;;  %v1040_v5 = vmul.f32 %v1592_v2, %v755_v52  ;;  %1593 = vpow2.f32 %v1418_v0  ;;  %vm1045_vm9 = vweird.f32 %v1592_v2 }
 0x1c6   : > { %v1037_v6 = vsel %vm1034_vm8, %v1036_v3, %v1032_v4  ;;  %1595 = vrcp.f32 %v756_v33  ;;  %vm1046_vm11 = vmor %vm1044_vm10, %vm1045_vm9  ;;  %v1065_v20 = vand.u32 2147483648, %v756_v33  ;;  %v1063_v23 = vand.u32 2147483647, %v756_v33 }
 0x1c7   : > { %1266 = vst [vmem:[%s1973_s9 + $0x88] sm:$0xff] %v1037_v6  ;;  %v1041_v7 = vsub.f32 1.0, %v1040_v5  ;;  %vm1059_vm14 = vweird.f32 %v756_v33 }
 0x1c8   : > { %v608_v9 = vpop.f32.mrf.mxu2  ;;  %v1066_v1 = vor.u32 1.1754944e-38, %v1065_v20  ;;  %vm1064_vm0 = vcmp.eq.f32.partialorder %v1063_v23, 8.507059e+37 }
 0x1c9   : > { %v1042_v10 = vmul.f32 %v1592_v2, %v1041_v7  ;;  %v609_v12 = vadd.f32 %v1950_v44, %v608_v9 }
 0x1ca   : > { %v638_v56 = vpop.f32.mrf.mxu3 }
 0x1cb   : > { %v1594_v57 = vpop.eup %1593  ;;  %v1043_v13 = vadd.f32 %v1592_v2, %v1042_v10  ;;  %v1419_v38 = vmul.f32 -1.442695, %v609_v12 }
 0x1cc   : > { %v1596_v14 = vpop.eup %1595  ;;  %v757_v17 = vadd.f32 1.0, %v1594_v57 }
 0x1cd   : > { %v1047_v18 = vsel %vm1046_vm11, %v1592_v2, %v1043_v13  ;;  %v1055_v42 = vmul.f32 %v1596_v14, %v756_v33  ;;  %1597 = vpow2.f32 %v1419_v38  ;;  %vm1060_vm13 = vweird.f32 %v1596_v14 }
 0x1ce   : > { %v1052_v58 = vsel %vm1049_vm12, %v1051_v16, %v1047_v18  ;;  %1599 = vrcp.f32 %v757_v17  ;;  %vm1061_vm15 = vmor %vm1059_vm14, %vm1060_vm13  ;;  %v1078_v37 = vand.u32 2147483647, %v757_v17  ;;  %v1080_v39 = vand.u32 2147483648, %v757_v17 }
 0x1cf   : > { %1267 = vst [vmem:[%s1973_s9 + $0x90] sm:$0xff] %v1052_v58  ;;  %v1056_v19 = vsub.f32 1.0, %v1055_v42  ;;  %vm1074_vm2 = vweird.f32 %v757_v17 }
 0x1d0   : > { %v611_v21 = vpop.f32.mrf.mxu2  ;;  %v1081_v51 = vor.u32 1.1754944e-38, %v1080_v39  ;;  %vm1079_vm4 = vcmp.eq.f32.partialorder %v1078_v37, 8.507059e+37 }
 0x1d1   : > { %v1057_v22 = vmul.f32 %v1596_v14, %v1056_v19  ;;  %v612_v24 = vadd.f32 %v1950_v44, %v611_v21  ;;  %v2041_v44 = vld [vmem:[%s2142_s4] ss:$0 sm:$0xff] }
 0x1d2   : > { %v636_v36 = vadd.f32 %v2041_v44, %v635_v30  ;;  %v639_v50 = vadd.f32 %v2041_v44, %v638_v56 }
 0x1d3   : > { %v1598_v25 = vpop.eup %1597  ;;  %v1058_v26 = vadd.f32 %v1596_v14, %v1057_v22  ;;  %v1420_v27 = vmul.f32 -1.442695, %v612_v24 }
 0x1d4   : > { %v1600_v28 = vpop.eup %1599  ;;  %v758_v29 = vadd.f32 1.0, %v1598_v25  ;;  %v1428_v46 = vmul.f32 -1.442695, %v636_v36  ;;  %v1429_v2 = vmul.f32 -1.442695, %v639_v50 }
 0x1d5   : > { %v1062_v31 = vsel %vm1061_vm15, %v1596_v14, %v1058_v26  ;;  %v1070_v32 = vmul.f32 %v1600_v28, %v757_v17  ;;  %1601 = vpow2.f32 %v1420_v27  ;;  %vm1075_vm1 = vweird.f32 %v1600_v28 }
 0x1d6   : > { %v1067_v43 = vsel %vm1064_vm0, %v1066_v1, %v1062_v31  ;;  %1603 = vrcp.f32 %v758_v29  ;;  %vm1076_vm3 = vmor %vm1074_vm2, %vm1075_vm1  ;;  %v1093_v59 = vand.u32 2147483647, %v758_v29  ;;  %v1095_v60 = vand.u32 2147483648, %v758_v29 }
 0x1d7   : > { %1268 = vst [vmem:[%s1973_s9 + $0x98] sm:$0xff] %v1067_v43  ;;  %v1071_v35 = vsub.f32 1.0, %v1070_v32  ;;  %1605 = vpow2.f32 %v1428_v46  ;;  %vm1089_vm6 = vweird.f32 %v758_v29 }
 0x1d8   : > { %v614_v40 = vpop.f32.mrf.mxu2  ;;  %v1096_v7 = vor.u32 1.1754944e-38, %v1095_v60  ;;  %vm1094_vm8 = vcmp.eq.f32.partialorder %v1093_v59, 8.507059e+37 }
 0x1d9   : > { %v1072_v41 = vmul.f32 %v1600_v28, %v1071_v35  ;;  %v615_v45 = vadd.f32 %v2041_v44, %v614_v40 }
 0x1db   : > { %v1602_v47 = vpop.eup %1601  ;;  %v1073_v48 = vadd.f32 %v1600_v28, %v1072_v41  ;;  %v1421_v49 = vmul.f32 -1.442695, %v615_v45 }
 0x1dc   : > { %v1604_v15 = vpop.eup %1603  ;;  %v759_v52 = vadd.f32 1.0, %v1602_v47 }
 0x1dd   : > { %v1077_v53 = vsel %vm1076_vm3, %v1600_v28, %v1073_v48  ;;  %v1085_v54 = vmul.f32 %v1604_v15, %v758_v29  ;;  %1607 = vpow2.f32 %v1421_v49  ;;  %v1606_v62 = vpop.eup %1605  ;;  %vm1090_vm5 = vweird.f32 %v1604_v15 }
 0x1de   : > { %v1082_v55 = vsel %vm1079_vm4, %v1081_v51, %v1077_v53  ;;  %1609 = vrcp.f32 %v759_v52  ;;  %v2048_v3 = vadd.f32 1.0, %v1606_v62  ;;  %vm1091_vm7 = vmor %vm1089_vm6, %vm1090_vm5  ;;  %v1110_v57 = vand.u32 2147483648, %v759_v52 }
 0x1df   : > { %1269 = vst [vmem:[%s1973_s9 + $0xa0] sm:$0xff] %v1082_v55  ;;  %v1086_v34 = vsub.f32 1.0, %v1085_v54  ;;  %1611 = vpow2.f32 %v1429_v2  ;;  %v1108_v16 = vand.u32 2147483647, %v759_v52  ;;  %vm1104_vm10 = vweird.f32 %v759_v52 }
 0x1e0   : > { %v617_v61 = vpop.f32.mrf.mxu2  ;;  %1613 = vrcp.f32 %v2048_v3  ;;  %v1111_v23 = vor.u32 1.1754944e-38, %v1110_v57  ;;  %vm1224_vm14 = vweird.f32 %v2048_v3  ;;  %v1230_v43 = vand.u32 2147483648, %v2048_v3 }
 0x1e1   : > { %v1087_v63 = vmul.f32 %v1604_v15, %v1086_v34  ;;  %v618_v0 = vadd.f32 %v2041_v44, %v617_v61  ;;  %vm1109_vm12 = vcmp.eq.f32.partialorder %v1108_v16, 8.507059e+37  ;;  %v1228_v37 = vand.u32 2147483647, %v2048_v3 }
 0x1e3   : > { %v1608_v33 = vpop.eup %1607  ;;  %v1088_v4 = vadd.f32 %v1604_v15, %v1087_v63  ;;  %v1422_v5 = vmul.f32 -1.442695, %v618_v0  ;;  %vm1229_vm4 = vcmp.eq.f32.partialorder %v1228_v37, 8.507059e+37 }
 0x1e4   : > { %v1610_v6 = vpop.eup %1609  ;;  %v760_v8 = vadd.f32 1.0, %v1608_v33 }
 0x1e5   : > { %v1092_v9 = vsel %vm1091_vm7, %v1604_v15, %v1088_v4  ;;  %v1100_v10 = vmul.f32 %v1610_v6, %v759_v52  ;;  %1615 = vpow2.f32 %v1422_v5  ;;  %v1612_v38 = vpop.eup %1611  ;;  %vm1105_vm9 = vweird.f32 %v1610_v6 }
 0x1e6   : > { %v1097_v11 = vsel %vm1094_vm8, %v1096_v7, %v1092_v9  ;;  %1617 = vrcp.f32 %v760_v8  ;;  %v1614_v18 = vpop.eup %1613  ;;  %v2053_v42 = vadd.f32 1.0, %v1612_v38  ;;  %vm1106_vm11 = vmor %vm1104_vm10, %vm1105_vm9  ;;  %v1123_v1 = vand.u32 2147483647, %v760_v8 }
 0x1e7   : > { %1270 = vst [vmem:[%s1973_s9 + $0xa8] sm:$0xff] %v1097_v11  ;;  %v1101_v12 = vsub.f32 1.0, %v1100_v10  ;;  %v1220_v21 = vmul.f32 %v1614_v18, %v2048_v3  ;;  %v1125_v29 = vand.u32 2147483648, %v760_v8  ;;  %vm1225_vm15 = vweird.f32 %v1614_v18 }
 0x1e8   : > { %v620_v13 = vpop.f32.mrf.mxu2  ;;  %1619 = vrcp.f32 %v2053_v42  ;;  %vm1119_vm0 = vweird.f32 %v760_v8  ;;  %vm1124_vm2 = vcmp.eq.f32.partialorder %v1123_v1, 8.507059e+37  ;;  %vm2071_vm3 = vmor %vm1224_vm14, %vm1225_vm15  ;;  %v1231_v52 = vor.u32 1.1754944e-38, %v1230_v43 }
 0x1e9   : > { %v1102_v14 = vmul.f32 %v1610_v6, %v1101_v12  ;;  %v621_v17 = vadd.f32 %v2041_v44, %v620_v13  ;;  %v1221_v31 = vsub.f32 1.0, %v1220_v21  ;;  %v1126_v49 = vor.u32 1.1754944e-38, %v1125_v29 }
 0x1ea   : > { %vm1239_vm6 = vweird.f32 %v2053_v42  ;;  %v1243_v3 = vand.u32 2147483647, %v2053_v42  ;;  %v1245_v33 = vand.u32 2147483648, %v2053_v42 }
 0x1eb   : > { %v1616_v58 = vpop.eup %1615  ;;  %v1103_v19 = vadd.f32 %v1610_v6, %v1102_v14  ;;  %v1423_v20 = vmul.f32 -1.442695, %v621_v17  ;;  %v1222_v36 = vmul.f32 %v1614_v18, %v1221_v31 }
 0x1ec   : > { %v1618_v22 = vpop.eup %1617  ;;  %v2056_v24 = vadd.f32 1.0, %v1616_v58  ;;  %v1246_v11 = vor.u32 1.1754944e-38, %v1245_v33 }
 0x1ed   : > { %v1107_v25 = vsel %vm1106_vm11, %v1610_v6, %v1103_v19  ;;  %v1115_v26 = vmul.f32 %v1618_v22, %v760_v8  ;;  %1621 = vpow2.f32 %v1423_v20  ;;  %vm1120_vm13 = vweird.f32 %v1618_v22 }
 0x1ee   : > { %v1112_v27 = vsel %vm1109_vm12, %v1111_v23, %v1107_v25  ;;  %1623 = vrcp.f32 %v2056_v24  ;;  %v1620_v39 = vpop.eup %1619  ;;  %vm1121_vm1 = vmor %vm1119_vm0, %vm1120_vm13  ;;  %v1223_v46 = vadd.f32 %v1614_v18, %v1222_v36  ;;  %v1138_v34 = vand.u32 2147483647, %v2056_v24 }
 0x1ef   : > { %1271 = vst [vmem:[%s1973_s9 + $0xb0] sm:$0xff] %v1112_v27  ;;  %v1116_v28 = vsub.f32 1.0, %v1115_v26  ;;  %v1235_v47 = vmul.f32 %v1620_v39, %v2053_v42  ;;  %v1140_v60 = vand.u32 2147483648, %v2056_v24  ;;  %vm1240_vm7 = vweird.f32 %v1620_v39 }
 0x1f0   : > { %v623_v32 = vpop.f32.mrf.mxu2  ;;  %v1227_v50 = vsel %vm2071_vm3, %v1614_v18, %v1223_v46  ;;  %vm1134_vm8 = vweird.f32 %v2056_v24  ;;  %vm1139_vm10 = vcmp.eq.f32.partialorder %v1138_v34, 8.507059e+37  ;;  %vm1241_vm11 = vmor %vm1239_vm6, %vm1240_vm7  ;;  %vm1244_vm12 = vcmp.eq.f32.partialorder %v1243_v3, 8.507059e+37 }
 0x1f1   : > { %v1117_v30 = vmul.f32 %v1618_v22, %v1116_v28  ;;  %v624_v35 = vadd.f32 %v2041_v44, %v623_v32  ;;  %v1236_v59 = vsub.f32 1.0, %v1235_v47  ;;  %v1232_v61 = vsel %vm1229_vm4, %v1231_v52, %v1227_v50 }
 0x1f2   : > { %1279 = vst [vmem:[%s1973_s9 + $0xf0] sm:$0xff] %v1232_v61  ;;  %v1141_v9 = vor.u32 1.1754944e-38, %v1140_v60 }
 0x1f3   : > { %v1622_v40 = vpop.eup %1621  ;;  %v1118_v41 = vadd.f32 %v1618_v22, %v1117_v30  ;;  %v1424_v45 = vmul.f32 -1.442695, %v624_v35  ;;  %v1237_v2 = vmul.f32 %v1620_v39, %v1236_v59 }
 0x1f4   : > { %v1624_v48 = vpop.eup %1623  ;;  %v2066_v15 = vadd.f32 1.0, %v1622_v40 }
 0x1f5   : > { %v1122_v53 = vsel %vm1121_vm1, %v1618_v22, %v1118_v41  ;;  %v1130_v54 = vmul.f32 %v1624_v48, %v2056_v24  ;;  %1625 = vpow2.f32 %v1424_v45  ;;  %vm1135_vm5 = vweird.f32 %v1624_v48 }
 0x1f6   : > { %v1127_v55 = vsel %vm1124_vm2, %v1126_v49, %v1122_v53  ;;  %1627 = vrcp.f32 %v2066_v15  ;;  %vm1136_vm9 = vmor %vm1134_vm8, %vm1135_vm5  ;;  %v1238_v7 = vadd.f32 %v1620_v39, %v1237_v2  ;;  %v1155_v16 = vand.u32 2147483648, %v2066_v15 }
 0x1f7   : > { %1272 = vst [vmem:[%s1973_s9 + $0xb8] sm:$0xff] %v1127_v55  ;;  %v1131_v56 = vsub.f32 1.0, %v1130_v54  ;;  %v1153_v42 = vand.u32 2147483647, %v2066_v15  ;;  %vm1149_vm14 = vweird.f32 %v2066_v15 }
 0x1f8   : > { %v626_v62 = vpop.f32.mrf.mxu2  ;;  %v1242_v14 = vsel %vm1241_vm11, %v1620_v39, %v1238_v7  ;;  %v1156_v24 = vor.u32 1.1754944e-38, %v1155_v16 }
 0x1f9   : > { %v1132_v63 = vmul.f32 %v1624_v48, %v1131_v56  ;;  %v627_v0 = vadd.f32 %v2041_v44, %v626_v62  ;;  %v1247_v17 = vsel %vm1244_vm12, %v1246_v11, %v1242_v14  ;;  %vm1154_vm0 = vcmp.eq.f32.partialorder %v1153_v42, 8.507059e+37 }
 0x1fa   : > { %1280 = vst [vmem:[%s1973_s9 + $0xf8] sm:$0xff] %v1247_v17 }
 0x1fb   : > { %v1626_v4 = vpop.eup %1625  ;;  %v1133_v5 = vadd.f32 %v1624_v48, %v1132_v63  ;;  %v1425_v6 = vmul.f32 -1.442695, %v627_v0 }
 0x1fc   : > { %v1628_v8 = vpop.eup %1627  ;;  %v763_v10 = vadd.f32 1.0, %v1626_v4 }
 0x1fd   : > { %v1137_v12 = vsel %vm1136_vm9, %v1624_v48, %v1133_v5  ;;  %v1145_v57 = vmul.f32 %v1628_v8, %v2066_v15  ;;  %1629 = vpow2.f32 %v1425_v6  ;;  %vm1150_vm13 = vweird.f32 %v1628_v8 }
 0x1fe   : > { %v1142_v13 = vsel %vm1139_vm10, %v1141_v9, %v1137_v12  ;;  %1631 = vrcp.f32 %v763_v10  ;;  %vm1151_vm15 = vmor %vm1149_vm14, %vm1150_vm13  ;;  %v1170_v29 = vand.u32 2147483648, %v763_v10  ;;  %v1168_v43 = vand.u32 2147483647, %v763_v10 }
 0x1ff   : > { %1273 = vst [vmem:[%s1973_s9 + $0xc0] sm:$0xff] %v1142_v13  ;;  %v1146_v38 = vsub.f32 1.0, %v1145_v57  ;;  %vm1164_vm2 = vweird.f32 %v763_v10 }
 0x200   : > { %v629_v18 = vpop.f32.mrf.mxu2  ;;  %v1171_v40 = vor.u32 1.1754944e-38, %v1170_v29  ;;  %vm1169_vm4 = vcmp.eq.f32.partialorder %v1168_v43, 8.507059e+37 }
 0x201   : > { %v1147_v58 = vmul.f32 %v1628_v8, %v1146_v38  ;;  %v630_v19 = vadd.f32 %v2041_v44, %v629_v18 }
 0x203   : > { %v1630_v20 = vpop.eup %1629  ;;  %v1148_v21 = vadd.f32 %v1628_v8, %v1147_v58  ;;  %v1426_v22 = vmul.f32 -1.442695, %v630_v19 }
 0x204   : > { %v1632_v23 = vpop.eup %1631  ;;  %v764_v25 = vadd.f32 1.0, %v1630_v20 }
 0x205   : > { %v1152_v26 = vsel %vm1151_vm15, %v1628_v8, %v1148_v21  ;;  %v1160_v27 = vmul.f32 %v1632_v23, %v763_v10  ;;  %1633 = vpow2.f32 %v1426_v22  ;;  %vm1165_vm1 = vweird.f32 %v1632_v23 }
 0x206   : > { %v1157_v28 = vsel %vm1154_vm0, %v1156_v24, %v1152_v26  ;;  %1635 = vrcp.f32 %v764_v25  ;;  %vm1166_vm3 = vmor %vm1164_vm2, %vm1165_vm1  ;;  %v1185_v49 = vand.u32 2147483648, %v764_v25  ;;  %vm1179_vm6 = vweird.f32 %v764_v25 }
 0x207   : > { %1274 = vst [vmem:[%s1973_s9 + $0xc8] sm:$0xff] %v1157_v28  ;;  %v1161_v1 = vsub.f32 1.0, %v1160_v27 }
 0x208   : > { %v632_v31 = vpop.f32.mrf.mxu2  ;;  %v1186_v54 = vor.u32 1.1754944e-38, %v1185_v49 }
 0x209   : > { %v1162_v32 = vmul.f32 %v1632_v23, %v1161_v1  ;;  %v633_v30 = vadd.f32 %v2041_v44, %v632_v31  ;;  %v1183_v44 = vand.u32 2147483647, %v764_v25 }
 0x20b   : > { %v1634_v35 = vpop.eup %1633  ;;  %v1163_v36 = vadd.f32 %v1632_v23, %v1162_v32  ;;  %v1427_v37 = vmul.f32 -1.442695, %v633_v30  ;;  %vm1184_vm8 = vcmp.eq.f32.partialorder %v1183_v44, 8.507059e+37 }
 0x20c   : > { %v1636_v39 = vpop.eup %1635  ;;  %v765_v41 = vadd.f32 1.0, %v1634_v35 }
 0x20d   : > { %v1167_v45 = vsel %vm1166_vm3, %v1632_v23, %v1163_v36  ;;  %v1175_v46 = vmul.f32 %v1636_v39, %v764_v25  ;;  %1637 = vpow2.f32 %v1427_v37  ;;  %vm1180_vm5 = vweird.f32 %v1636_v39 }
 0x20e   : > { %v1172_v47 = vsel %vm1169_vm4, %v1171_v40, %v1167_v45  ;;  %1639 = vrcp.f32 %v765_v41  ;;  %vm1181_vm7 = vmor %vm1179_vm6, %vm1180_vm5  ;;  %v1200_v60 = vand.u32 2147483648, %v765_v41  ;;  %v1198_v62 = vand.u32 2147483647, %v765_v41 }
 0x20f   : > { %1275 = vst [vmem:[%s1973_s9 + $0xd0] sm:$0xff] %v1172_v47  ;;  %v1176_v48 = vsub.f32 1.0, %v1175_v46  ;;  %vm1194_vm10 = vweird.f32 %v765_v41 }
 0x210   : > { %v1201_v2 = vor.u32 1.1754944e-38, %v1200_v60  ;;  %vm1199_vm12 = vcmp.eq.f32.partialorder %v1198_v62, 8.507059e+37 }
 0x211   : > { %v1177_v15 = vmul.f32 %v1636_v39, %v1176_v48 }
 0x213   : > { %v1638_v51 = vpop.eup %1637  ;;  %v1178_v52 = vadd.f32 %v1636_v39, %v1177_v15 }
 0x214   : > { %v1640_v53 = vpop.eup %1639  ;;  %v766_v55 = vadd.f32 1.0, %v1638_v51 }
 0x215   : > { %v1182_v56 = vsel %vm1181_vm7, %v1636_v39, %v1178_v52  ;;  %v1190_v34 = vmul.f32 %v1640_v53, %v765_v41  ;;  %vm1195_vm9 = vweird.f32 %v1640_v53 }
 0x216   : > { %v1187_v50 = vsel %vm1184_vm8, %v1186_v54, %v1182_v56  ;;  %1641 = vrcp.f32 %v766_v55  ;;  %vm1196_vm11 = vmor %vm1194_vm10, %vm1195_vm9  ;;  %v1215_v6 = vand.u32 2147483648, %v766_v55  ;;  %v1213_v8 = vand.u32 2147483647, %v766_v55 }
 0x217   : > { %1276 = vst [vmem:[%s1973_s9 + $0xd8] sm:$0xff] %v1187_v50  ;;  %v1191_v59 = vsub.f32 1.0, %v1190_v34  ;;  %vm1209_vm14 = vweird.f32 %v766_v55 }
 0x218   : > { %v1216_v10 = vor.u32 1.1754944e-38, %v1215_v6  ;;  %vm1214_vm0 = vcmp.eq.f32.partialorder %v1213_v8, 8.507059e+37 }
 0x219   : > { %v1192_v61 = vmul.f32 %v1640_v53, %v1191_v59 }
 0x21b   : > { %v1193_v63 = vadd.f32 %v1640_v53, %v1192_v61 }
 0x21c   : > { %v1642_v0 = vpop.eup %1641 }
 0x21d   : > { %v1197_v3 = vsel %vm1196_vm11, %v1640_v53, %v1193_v63  ;;  %v1205_v33 = vmul.f32 %v1642_v0, %v766_v55  ;;  %vm1210_vm13 = vweird.f32 %v1642_v0 }
 0x21e   : > { %v1202_v4 = vsel %vm1199_vm12, %v1201_v2, %v1197_v3  ;;  %vm1211_vm15 = vmor %vm1209_vm14, %vm1210_vm13 }
 0x21f   : > { %1277 = vst [vmem:[%s1973_s9 + $0xe0] sm:$0xff] %v1202_v4  ;;  %v1206_v5 = vsub.f32 1.0, %v1205_v33 }
 0x221   : > { %v1207_v7 = vmul.f32 %v1642_v0, %v1206_v5 }
 0x223   : > { %v1208_v9 = vadd.f32 %v1642_v0, %v1207_v7 }
 0x225   : > { %v1212_v11 = vsel %vm1211_vm15, %v1642_v0, %v1208_v9 }
 0x226   : > { %v1217_v12 = vsel %vm1214_vm0, %v1216_v10, %v1212_v11 }
 0x227   : > { %1278 = vst [vmem:[%s1973_s9 + $0xe8] sm:$0xff] %v1217_v12 }
 0x228   : > { %1671 = shalt.err (!%p1668_p3)
}
 0x229   : > { %s1708_s7 = smov 128   ;;  %s1709_s9 = smov 8  }
 0x22a   : > { %1472 = dma.vmem_to_hbm [thread:$0]  (%p1778_p5), %s1295_s22, 4096, %s1297_s16, %s1282_s23, %s1708_s7, %s1708_s7, %s1709_s9  }
 0x22b PF: > { %p1478_p4 = scmp.ge.s32.totalorder %s1706_s21, 2  ;;  %s1311_s11 = sand.u32 1, %s1694_s18  }
 0x22c   : > { %s1312_s12 = scalar_lea.sflag [#allocation3], %s1311_s11 }
 0x22d   : > { %p1475_p7 = pnand %p1478_p4, %p1782_p6 }
 0x22f   : > { %p1476_p8 = pneg %p1475_p7 }
 0x231   : > { %1689 = dma.done.wait (%p1476_p8), %s1312_s12, 4096  }
 0x232   : > { %1691 = vsyncadd (%p1476_p8), %s1312_s12, 4294963200  ;;  %p15_p9 = scmp.ge.s32.totalorder %s1765_s24, 4   ;;  %s2148_s18 = smov %s1698_s19 }
 0x233   : > { %s2149_s19 = smov %s1702_s20  ;;  %s2150_s20 = smov %s1776_s27 }
 0x234   : > { %s2151_s21 = smov %s1765_s24  ;;  %17 = sbr.rel (!%p15_p9) target bundleno = 3 (0x3), region = 75 }
 0x239   :  { %1318 = vsyncpa [#allocation3], 1 }
 0x23a   :  { %1320 = vsyncpa [#allocation3 + $0x1], 1 }

// kernel: tpu_custom_call.1
= control target key start
LH: loop header
LB: loop body
LE: loop exit
PB: predicated region body
PF: predicated region fallthrough
CT: control target
= control target key end

     0   :  { %10 = vsyncpa [#allocation3], 0  ;;  %s2138_s0 = inlined_call_operand.vmem [shape: f32[512,32], index: 0, kind: input, shape index: {}]   ;;  %s2139_s1 = inlined_call_operand.vmem [shape: f32[32,128], index: 1, kind: input, shape index: {}]   ;;  %s2140_s2 = inlined_call_operand.vmem [shape: f32[1,128], index: 2, kind: input, shape index: {}]   ;;  %s2141_s3 = inlined_call_operand.vmem [shape: f32[128,128], index: 3, kind: input, shape index: {}]   ;;  %s2142_s4 = inlined_call_operand.vmem [shape: f32[1,128], index: 4, kind: input, shape index: {}]   ;;  %s2143_s5 = inlined_call_operand.hbm [shape: f32[512,128], index: 5, kind: output, shape index: {}]  }
   0x1   :  { %12 = vsyncpa [#allocation3 + $0x1], 0  ;;  %s1740_s18 = smov 0   ;;  %s1742_s19 = smov 0  }
   0x2   :  { %s1744_s20 = smov 0   ;;  %s1746_s21 = smov 0  }
   0x3 LB: > { %s1761_s22 = sadd.s32 4294967295, %s1706_s21   ;;  %s1359_s23 = sadd.s32 4294967294, %s1706_s21   ;;  %s1706_s21 = sphi %s1746_s21, %s2151_s21   ;;  %s1702_s20 = sphi %s1744_s20, %s2150_s20   ;;  %s1698_s19 = sphi %s1742_s19, %s2149_s19   ;;  %s1694_s18 = sphi %s1740_s18, %s2148_s18  }
   0x4   : > { %s1765_s24 = sadd.s32 1, %s1706_s21   ;;  %s135_s25 = sadd.s32 1, %s1702_s20 }
   0x5   : > { %s132_s26 = ssub.s32 %s1706_s21, %s1765_s24  ;;  %p145_p0 = scmp.ne.s32.totalorder %s1702_s20, %s1698_s19 }
   0x6   : > { %p133_p1 = scmp.eq.s32.totalorder %s132_s26, 0  ;;  %p146_p2 = scmp.eq.s32.totalorder %s1761_s22, 1 }
   0x7   : > { %p151_p3 = scmp.ne.s32.totalorder %s1698_s19, %s1694_s18  ;;  %p152_p4 = scmp.eq.s32.totalorder %s1359_s23, 1 }
   0x8   : > { %s1776_s27 = scalar_select %p133_p1, %s1702_s20, %s135_s25  }
   0x9   : > { %p1778_p5 = por %p146_p2, %p145_p0  ;;  %p1782_p6 = por %p152_p4, %p151_p3 }
   0xa   : > { %p1362_p7 = scmp.ge.s32.totalorder %s1706_s21, 1  ;;  %p191_p8 = scmp.lt.s32.totalorder %s1706_s21, 3 }
   0xc   : > { %p192_p9 = pnand %p1362_p7, %p191_p8 }
   0xd   : > { %s1364_s9 = sshll.u32 (!%p192_p9), %s1761_s22, 5  ;;  %s216_s7 = sand.u32 (!%p192_p9), 1, %s1698_s19  }
   0xe   : > { %195 = sbr.rel (%p192_p9) target bundleno = 555 (0x22b), region = 40  ;;  %p220_p10 = scmp.lt.s32.totalorder (!%p192_p9), %s1364_s9, 63 }
   0xf   : > { %s1363_s8 = sshll.u32 (!%p192_p9), %s216_s7, 8  ;;  %s1435_s12 = sshll.u32 (!%p192_p9), %s1761_s22, 8 }
  0x10   : > { %s1293_s15 = scalar_lea.hbm (!%p192_p9), %s2143_s5, %s1435_s12  ;;  %s1282_s23 = scalar_lea.sflag (!%p192_p9), [#allocation3], %s216_s7 }
  0x11   : > { %s1296_s16 = sshll.u32 (!%p192_p9), %s1293_s15, 4  ;;  %s1664_s6 = scalar_lea.hbm (!%p192_p9), %s2143_s5, 512  ;;  %s1297_s16 = int_to_ptr.hbm [resolvable:$true] %s1296_s16 }
  0x12   : > { %s1658_s25 = sshra.s32 (!%p192_p9), %s1297_s16, 4  ;;  %s1659_s25 = int_to_ptr.hbm [resolvable:$true] %s1658_s25 }
  0x13   : > { %v261_v0 = vld [vmem:[%s2139_s1 + $0x18] sm:$0xff]  ;;  %v260_v1 = vld [vmem:[%s2139_s1 + $0x10] sm:$0xff]  ;;  %v259_v2 = vld [vmem:[%s2139_s1 + $0x8] sm:$0xff]  ;;  %s2153_s9 = smov (!%p220_p10, %s1364_s9), 63  ;;  %vm266_vm0 = vcmask 261120   ;;  %s1660_s26 = scalar_lea.hbm %s1659_s25, 256 }
  0x14   : > { %375 = vmatpush.msra.mxu0 %v261_v0  ;;  %1436 = vmatpush.msra.mxu3 %v261_v0  ;;  %v258_v3 = vld [vmem:[%s2139_s1] sm:$0xff]  ;;  %s1365_s14 = sshll.u32 %s2153_s9, 3  ;;  %v523_v13 = vld [vmem:[%s2141_s3 + $0x78] sm:$0xff]  ;;  %v522_v14 = vld [vmem:[%s2141_s3 + $0x70] sm:$0xff]  ;;  %s1973_s9 = scalar_lea.vmem [#allocation2], %s1363_s8 }
  0x15   : > { %s1804_s17 = scalar_lea.vmem %s2138_s0, %s1365_s14  ;;  %528 = vmatpush.msra.mxu1 %v523_v13  ;;  %1440 = vmatpush.msra.mxu2 %v523_v13  ;;  %v521_v15 = vld [vmem:[%s2141_s3 + $0x68] sm:$0xff]  ;;  %v520_v17 = vld [vmem:[%s2141_s3 + $0x60] sm:$0xff]  ;;  %v519_v18 = vld [vmem:[%s2141_s3 + $0x58] sm:$0xff]  ;;  %s1294_s22 = sshll.u32 %s1973_s9, 4  ;;  %s1295_s22 = int_to_ptr.vmem [resolvable:$true] %s1294_s22 }
  0x16   : > { %376 = vmatpush.msra.mxu0 %v260_v1  ;;  %1437 = vmatpush.msra.mxu3 %v260_v1  ;;  %v226_v4 = vld [vmem:[%s1804_s17] sm:$0xff]  ;;  %v227_v5 = vld [vmem:[%s1804_s17 + $0x8] sm:$0xff]  ;;  %v228_v6 = vld [vmem:[%s1804_s17 + $0x10] sm:$0xff]  ;;  %p1661_p11 = scmp.ne.s32.totalorder %s1659_s25, %s1660_s26  ;;  %p1665_p0 = scmp.lt.s32.totalorder %s1659_s25, %s2143_s5 }
  0x17   : > { %v229_v7 = vld [vmem:[%s1804_s17 + $0x18] sm:$0xff]  ;;  %v230_v8 = vld [vmem:[%s1804_s17 + $0x20] sm:$0xff]  ;;  %v231_v9 = vld [vmem:[%s1804_s17 + $0x28] sm:$0xff]  ;;  %529 = vmatpush.msra.mxu1 %v522_v14  ;;  %1442 = vmatpush.msra.mxu2 %v522_v14  ;;  %p1666_p1 = scmp.lt.s32.totalorder %s1664_s6, %s1660_s26 }
  0x18   : > { %377 = vmatpush.msra.mxu0 %v259_v2  ;;  %1438 = vmatpush.msra.mxu3 %v259_v2  ;;  %v232_v10 = vld [vmem:[%s1804_s17 + $0x30] sm:$0xff]  ;;  %v233_v11 = vld [vmem:[%s1804_s17 + $0x38] sm:$0xff]  ;;  %v234_v12 = vld [vmem:[%s1804_s17 + $0x40] sm:$0xff]  ;;  %p1662_p12 = pnand %p1661_p11, %p1778_p5 }
  0x19   : > { %v235_v16 = vld [vmem:[%s1804_s17 + $0x48] sm:$0xff]  ;;  %530 = vmatpush.msra.mxu1 %v521_v15  ;;  %1444 = vmatpush.msra.mxu2 %v521_v15  ;;  %v244_v19 = vld [vmem:[%s1804_s17 + $0x90] sm:$0xff]  ;;  %v516_v23 = vld [vmem:[%s2141_s3 + $0x40] sm:$0xff]  ;;  %p1667_p2 = por %p1666_p1, %p1665_p0 }
  0x1a   : > { %378 = vmatpush.msra.mxu0 %v258_v3  ;;  %1439 = vmatpush.msra.mxu3 %v258_v3  ;;  %v518_v20 = vld [vmem:[%s2141_s3 + $0x50] sm:$0xff]  ;;  %v517_v21 = vld [vmem:[%s2141_s3 + $0x48] sm:$0xff]  ;;  %v515_v24 = vld [vmem:[%s2141_s3 + $0x38] sm:$0xff]  ;;  %p1663_p13 = pneg %p1662_p12 }
  0x1b   : > { %1366 = vmatmul.msk.f32.vlgmr.msra.gmra.mxu0 %vm266_vm0, %v226_v4  ;;  %531 = vmatpush.msra.mxu1 %v520_v17  ;;  %v236_v22 = vld [vmem:[%s1804_s17 + $0x50] sm:$0xff]  ;;  %v245_v25 = vld [vmem:[%s1804_s17 + $0x98] sm:$0xff]  ;;  %v513_v27 = vld [vmem:[%s2141_s3 + $0x28] sm:$0xff] }
  0x1c   : > { %1441 = vmatpush.msrb.mxu3 %v523_v13  ;;  %1446 = vmatpush.msra.mxu2 %v520_v17  ;;  %v514_v26 = vld [vmem:[%s2141_s3 + $0x30] sm:$0xff]  ;;  %v237_v28 = vld [vmem:[%s1804_s17 + $0x58] sm:$0xff]  ;;  %v512_v29 = vld [vmem:[%s2141_s3 + $0x20] sm:$0xff]  ;;  %p1668_p3 = pnand %p1667_p2, %p1663_p13 }
  0x1d   : > { %1384 = vmatmul.msk.f32.vlgmr.msra.gmra.mxu3 %vm266_vm0, %v244_v19  ;;  %532 = vmatpush.msra.mxu1 %v519_v18  ;;  %v511_v30 = vld [vmem:[%s2141_s3 + $0x18] sm:$0xff]  ;;  %v246_v31 = vld [vmem:[%s1804_s17 + $0xa0] sm:$0xff]  ;;  %v510_v32 = vld [vmem:[%s2141_s3 + $0x10] sm:$0xff] }
  0x1e   : > { %1443 = vmatpush.msrb.mxu3 %v522_v14  ;;  %1448 = vmatpush.msra.mxu2 %v519_v18  ;;  %v238_v33 = vld [vmem:[%s1804_s17 + $0x60] sm:$0xff]  ;;  %v509_v34 = vld [vmem:[%s2141_s3 + $0x8] sm:$0xff]  ;;  %v248_v38 = vld [vmem:[%s1804_s17 + $0xb0] sm:$0xff] }
  0x1f   : > { %533 = vmatpush.msra.mxu1 %v518_v20  ;;  %v508_v35 = vld [vmem:[%s2141_s3] sm:$0xff]  ;;  %v247_v36 = vld [vmem:[%s1804_s17 + $0xa8] sm:$0xff]  ;;  %v240_v39 = vld [vmem:[%s1804_s17 + $0x70] sm:$0xff] }
  0x20   : > { %1445 = vmatpush.msrb.mxu3 %v521_v15  ;;  %1450 = vmatpush.msra.mxu2 %v518_v20  ;;  %v239_v37 = vld [vmem:[%s1804_s17 + $0x68] sm:$0xff]  ;;  %v249_v40 = vld [vmem:[%s1804_s17 + $0xb8] sm:$0xff]  ;;  %v1901_v42 = vld [vmem:[%s2140_s2] ss:$0 sm:$0xff] }
  0x21   : > { %534 = vmatpush.msra.mxu1 %v517_v21  ;;  %v241_v41 = vld [vmem:[%s1804_s17 + $0x78] sm:$0xff]  ;;  %v250_v43 = vld [vmem:[%s1804_s17 + $0xc0] sm:$0xff]  ;;  %v251_v48 = vld [vmem:[%s1804_s17 + $0xc8] sm:$0xff] }
  0x22   : > { %1447 = vmatpush.msrb.mxu3 %v520_v17  ;;  %1452 = vmatpush.msra.mxu2 %v517_v21  ;;  %v242_v45 = vld [vmem:[%s1804_s17 + $0x80] sm:$0xff]  ;;  %v243_v50 = vld [vmem:[%s1804_s17 + $0x88] sm:$0xff]  ;;  %v252_v53 = vld [vmem:[%s1804_s17 + $0xd0] sm:$0xff] }
  0x23   : > { %1367 = vmatmul.msk.f32.gmra.mxu0 %vm266_vm0, %v227_v5  ;;  %535 = vmatpush.msra.mxu1 %v516_v23  ;;  %v253_v57 = vld [vmem:[%s1804_s17 + $0xd8] sm:$0xff]  ;;  %v254_v61 = vld [vmem:[%s1804_s17 + $0xe0] sm:$0xff]  ;;  %v255_v1 = vld [vmem:[%s1804_s17 + $0xe8] sm:$0xff] }
  0x24   : > { %1449 = vmatpush.msrb.mxu3 %v519_v18  ;;  %1454 = vmatpush.msra.mxu2 %v516_v23  ;;  %v256_v5 = vld [vmem:[%s1804_s17 + $0xf0] sm:$0xff] }
  0x25   : > { %1385 = vmatmul.msk.f32.gmra.mxu3 %vm266_vm0, %v245_v25  ;;  %536 = vmatpush.msra.mxu1 %v515_v24 }
  0x26   : > { %1451 = vmatpush.msrb.mxu3 %v518_v20  ;;  %1456 = vmatpush.msra.mxu2 %v515_v24 }
  0x27   : > { %537 = vmatpush.msra.mxu1 %v514_v26 }
  0x28   : > { %1453 = vmatpush.msrb.mxu3 %v517_v21  ;;  %1458 = vmatpush.msra.mxu2 %v514_v26 }
  0x29   : > { %538 = vmatpush.msra.mxu1 %v513_v27 }
  0x2a   : > { %1455 = vmatpush.msrb.mxu3 %v516_v23  ;;  %1460 = vmatpush.msra.mxu2 %v513_v27 }
  0x2b   : > { %1368 = vmatmul.msk.f32.gmra.mxu0 %vm266_vm0, %v228_v6  ;;  %539 = vmatpush.msra.mxu1 %v512_v29 }
  0x2c   : > { %1457 = vmatpush.msrb.mxu3 %v515_v24  ;;  %1462 = vmatpush.msra.mxu2 %v512_v29 }
  0x2d   : > { %540 = vmatpush.msra.mxu1 %v511_v30  ;;  %1386 = vmatmul.msk.f32.gmra.mxu3 %vm266_vm0, %v246_v31 }
  0x2e   : > { %1459 = vmatpush.msrb.mxu3 %v514_v26  ;;  %1464 = vmatpush.msra.mxu2 %v511_v30 }
  0x2f   : > { %541 = vmatpush.msra.mxu1 %v510_v32 }
  0x30   : > { %1461 = vmatpush.msrb.mxu3 %v513_v27  ;;  %1466 = vmatpush.msra.mxu2 %v510_v32 }
  0x31   : > { %542 = vmatpush.msra.mxu1 %v509_v34 }
  0x32   : > { %1463 = vmatpush.msrb.mxu3 %v512_v29  ;;  %1468 = vmatpush.msra.mxu2 %v509_v34 }
  0x33   : > { %1369 = vmatmul.msk.f32.gmra.mxu0 %vm266_vm0, %v229_v7  ;;  %543 = vmatpush.msra.mxu1 %v508_v35 }
  0x34   : > { %1465 = vmatpush.msrb.mxu3 %v511_v30  ;;  %1470 = vmatpush.msra.mxu2 %v508_v35 }
  0x35   : > { %1387 = vmatmul.msk.f32.gmra.mxu3 %vm266_vm0, %v247_v36 }
  0x36   : > { %1467 = vmatpush.msrb.mxu3 %v510_v32 }
  0x38   : > { %1469 = vmatpush.msrb.mxu3 %v509_v34 }
  0x3a   : > { %1471 = vmatpush.msrb.mxu3 %v508_v35 }
  0x3b   : > { %1370 = vmatmul.msk.f32.gmra.mxu0 %vm266_vm0, %v230_v8 }
  0x3d   : > { %1388 = vmatmul.msk.f32.gmra.mxu3 %vm266_vm0, %v248_v38 }
  0x43   : > { %1371 = vmatmul.msk.f32.gmra.mxu0 %vm266_vm0, %v231_v9  ;;  %v257_v9 = vld [vmem:[%s1804_s17 + $0xf8] sm:$0xff] }
  0x45   : > { %1389 = vmatmul.msk.f32.gmra.mxu3 %vm266_vm0, %v249_v40 }
  0x4b   : > { %1372 = vmatmul.msk.f32.gmra.mxu0 %vm266_vm0, %v232_v10 }
  0x4d   : > { %1390 = vmatmul.msk.f32.gmra.mxu3 %vm266_vm0, %v250_v43 }
  0x53   : > { %1373 = vmatmul.msk.f32.gmra.mxu0 %vm266_vm0, %v233_v11 }
  0x55   : > { %1391 = vmatmul.msk.f32.gmra.mxu3 %vm266_vm0, %v251_v48 }
  0x5b   : > { %1374 = vmatmul.msk.f32.gmra.mxu0 %vm266_vm0, %v234_v12 }
  0x5d   : > { %1392 = vmatmul.msk.f32.gmra.mxu3 %vm266_vm0, %v252_v53 }
  0x63   : > { %1375 = vmatmul.msk.f32.gmra.mxu0 %vm266_vm0, %v235_v16 }
  0x65   : > { %1393 = vmatmul.msk.f32.gmra.mxu3 %vm266_vm0, %v253_v57 }
  0x6b   : > { %1376 = vmatmul.msk.f32.gmra.mxu0 %vm266_vm0, %v236_v22 }
  0x6d   : > { %1394 = vmatmul.msk.f32.gmra.mxu3 %vm266_vm0, %v254_v61 }
  0x73   : > { %1377 = vmatmul.msk.f32.gmra.mxu0 %vm266_vm0, %v237_v28 }
  0x75   : > { %1395 = vmatmul.msk.f32.gmra.mxu3 %vm266_vm0, %v255_v1 }
  0x7b   : > { %1378 = vmatmul.msk.f32.gmra.mxu0 %vm266_vm0, %v238_v33 }
  0x7d   : > { %1396 = vmatmul.msk.f32.gmra.mxu3 %vm266_vm0, %v256_v5 }
  0x83   : > { %1379 = vmatmul.msk.f32.gmra.mxu0 %vm266_vm0, %v239_v37 }
  0x85   : > { %1397 = vmatmul.msk.f32.gmra.mxu3 %vm266_vm0, %v257_v9 }
  0x8b   : > { %1380 = vmatmul.msk.f32.gmra.mxu0 %vm266_vm0, %v240_v39 }
  0x93   : > { %1381 = vmatmul.msk.f32.gmra.mxu0 %vm266_vm0, %v241_v41 }
  0x98   : > { %v380_v44 = vpop.f32.mrf.mxu0 }
  0x99   : > { %v381_v46 = vadd.f32 %v1901_v42, %v380_v44  ;;  %v1950_v44 = vld [vmem:[%s2142_s4] ss:$0 sm:$0xff] }
  0x9b   : > { %v476_v47 = vmax.f32 %v381_v46, 0.0  ;;  %1382 = vmatmul.msk.f32.gmra.mxu0 %vm266_vm0, %v242_v45 }
  0x9d   : > { %544 = vmatmul.f32.vlgmr.msra.gmra.mxu1 %v476_v47 }
  0xa0   : > { %v383_v49 = vpop.f32.mrf.mxu0  ;;  %v434_v22 = vpop.f32.mrf.mxu3 }
  0xa1   : > { %v384_v51 = vadd.f32 %v1901_v42, %v383_v49  ;;  %v435_v61 = vadd.f32 %v1901_v42, %v434_v22 }
  0xa3   : > { %v477_v52 = vmax.f32 %v384_v51, 0.0  ;;  %1383 = vmatmul.msk.f32.gmra.mxu0 %vm266_vm0, %v243_v50 }
  0xa5   : > { %547 = vmatmul.f32.gmra.mxu1 %v477_v52 }
  0xa8   : > { %v386_v54 = vpop.f32.mrf.mxu0  ;;  %v437_v26 = vpop.f32.mrf.mxu3 }
  0xa9   : > { %v387_v55 = vadd.f32 %v1901_v42, %v386_v54  ;;  %v438_v5 = vadd.f32 %v1901_v42, %v437_v26 }
  0xab   : > { %v478_v56 = vmax.f32 %v387_v55, 0.0  ;;  %v495_v9 = vmax.f32 %v438_v5, 0.0 }
  0xad   : > { %550 = vmatmul.f32.gmra.mxu1 %v478_v56 }
  0xb0   : > { %v389_v58 = vpop.f32.mrf.mxu0  ;;  %v1936_v30 = vpop.f32.mrf.mxu3 }
  0xb1   : > { %v390_v59 = vadd.f32 %v1901_v42, %v389_v58 }
  0xb3   : > { %v479_v60 = vmax.f32 %v390_v59, 0.0 }
  0xb5   : > { %553 = vmatmul.f32.gmra.mxu1 %v479_v60 }
  0xb8   : > { %v392_v62 = vpop.f32.mrf.mxu0  ;;  %v1939_v34 = vpop.f32.mrf.mxu3 }
  0xb9   : > { %v393_v63 = vadd.f32 %v1901_v42, %v392_v62 }
  0xbb   : > { %v480_v0 = vmax.f32 %v393_v63, 0.0  ;;  %v494_v63 = vmax.f32 %v435_v61, 0.0 }
  0xbd   : > { %556 = vmatmul.f32.gmra.mxu1 %v480_v0 }
  0xc0   : > { %v395_v2 = vpop.f32.mrf.mxu0  ;;  %v1942_v38 = vpop.f32.mrf.mxu3 }
  0xc1   : > { %v396_v3 = vadd.f32 %v1901_v42, %v395_v2 }
  0xc3   : > { %v481_v4 = vmax.f32 %v396_v3, 0.0 }
  0xc5   : > { %559 = vmatmul.f32.gmra.mxu1 %v481_v4 }
  0xc8   : > { %v398_v6 = vpop.f32.mrf.mxu0  ;;  %v1945_v43 = vpop.f32.mrf.mxu3 }
  0xc9   : > { %v399_v7 = vadd.f32 %v1901_v42, %v398_v6 }
  0xcb   : > { %v482_v8 = vmax.f32 %v399_v7, 0.0 }
  0xcd   : > { %562 = vmatmul.f32.gmra.mxu1 %v482_v8 }
  0xd0   : > { %v401_v10 = vpop.f32.mrf.mxu0  ;;  %v1954_v50 = vpop.f32.mrf.mxu3 }
  0xd1   : > { %v402_v11 = vadd.f32 %v1901_v42, %v401_v10 }
  0xd3   : > { %v483_v12 = vmax.f32 %v402_v11, 0.0 }
  0xd5   : > { %565 = vmatmul.f32.gmra.mxu1 %v483_v12 }
  0xd8   : > { %v404_v13 = vpop.f32.mrf.mxu0  ;;  %v1958_v57 = vpop.f32.mrf.mxu3 }
  0xd9   : > { %v405_v14 = vadd.f32 %v1901_v42, %v404_v13 }
  0xdb   : > { %v484_v15 = vmax.f32 %v405_v14, 0.0 }
  0xdd   : > { %568 = vmatmul.f32.gmra.mxu1 %v484_v15 }
  0xe0   : > { %v407_v16 = vpop.f32.mrf.mxu0  ;;  %v1962_v1 = vpop.f32.mrf.mxu3 }
  0xe1   : > { %v408_v17 = vadd.f32 %v1901_v42, %v407_v16 }
  0xe3   : > { %v485_v18 = vmax.f32 %v408_v17, 0.0 }
  0xe5   : > { %571 = vmatmul.f32.gmra.mxu1 %v485_v18 }
  0xe8   : > { %v410_v19 = vpop.f32.mrf.mxu0  ;;  %v1969_v15 = vpop.f32.mrf.mxu3 }
  0xe9   : > { %v411_v20 = vadd.f32 %v1901_v42, %v410_v19 }
  0xeb   : > { %v486_v21 = vmax.f32 %v411_v20, 0.0 }
  0xed   : > { %574 = vmatmul.f32.gmra.mxu1 %v486_v21  ;;  %v441_v21 = vadd.f32 %v1901_v42, %v1936_v30 }
  0xf0   : > { %v413_v23 = vpop.f32.mrf.mxu0 }
  0xf1   : > { %v414_v24 = vadd.f32 %v1901_v42, %v413_v23 }
  0xf3   : > { %v487_v25 = vmax.f32 %v414_v24, 0.0 }
  0xf5   : > { %577 = vmatmul.f32.gmra.mxu1 %v487_v25 }
  0xf8   : > { %v416_v27 = vpop.f32.mrf.mxu0 }
  0xf9   : > { %v417_v28 = vadd.f32 %v1901_v42, %v416_v27  ;;  %v496_v27 = vmax.f32 %v441_v21, 0.0 }
  0xfb   : > { %v488_v29 = vmax.f32 %v417_v28, 0.0 }
  0xfd   : > { %580 = vmatmul.f32.gmra.mxu1 %v488_v29 }
 0x100   : > { %v419_v31 = vpop.f32.mrf.mxu0 }
 0x101   : > { %v420_v32 = vadd.f32 %v1901_v42, %v419_v31 }
 0x103   : > { %v489_v33 = vmax.f32 %v420_v32, 0.0 }
 0x105   : > { %583 = vmatmul.f32.gmra.mxu1 %v489_v33  ;;  %v1977_v33 = vpop.f32.mrf.mxu3 }
 0x108   : > { %v422_v35 = vpop.f32.mrf.mxu0 }
 0x109   : > { %v423_v36 = vadd.f32 %v1901_v42, %v422_v35 }
 0x10b   : > { %v490_v37 = vmax.f32 %v423_v36, 0.0 }
 0x10d   : > { %586 = vmatmul.f32.gmra.mxu1 %v490_v37 }
 0x110   : > { %v425_v39 = vpop.f32.mrf.mxu0 }
 0x111   : > { %v426_v40 = vadd.f32 %v1901_v42, %v425_v39 }
 0x113   : > { %v491_v41 = vmax.f32 %v426_v40, 0.0 }
 0x115   : > { %589 = vmatmul.f32.vlgmr.msra.gmra.mxu2 %v491_v41  ;;  %v444_v41 = vadd.f32 %v1901_v42, %v1939_v34 }
 0x118   : > { %v428_v45 = vpop.f32.mrf.mxu0 }
 0x119   : > { %v429_v46 = vadd.f32 %v1901_v42, %v428_v45 }
 0x11a   : > { %v545_v47 = vpop.f32.mrf.mxu1 }
 0x11b   : > { %v492_v48 = vmax.f32 %v429_v46, 0.0  ;;  %v546_v49 = vadd.f32 %v1950_v44, %v545_v47 }
 0x11d   : > { %v1398_v51 = vmul.f32 -1.442695, %v546_v49  ;;  %592 = vmatmul.f32.gmra.mxu2 %v492_v48 }
 0x11f   : > { %1515 = vpow2.f32 %v1398_v51  ;;  %v497_v51 = vmax.f32 %v444_v41, 0.0  ;;  %v453_v41 = vadd.f32 %v1901_v42, %v1954_v50 }
 0x120   : > { %v431_v52 = vpop.f32.mrf.mxu0 }
 0x121   : > { %v432_v53 = vadd.f32 %v1901_v42, %v431_v52 }
 0x122   : > { %v548_v54 = vpop.f32.mrf.mxu1 }
 0x123   : > { %v493_v55 = vmax.f32 %v432_v53, 0.0  ;;  %v549_v56 = vadd.f32 %v1950_v44, %v548_v54 }
 0x125   : > { %v1516_v58 = vpop.eup %1515  ;;  %v1399_v59 = vmul.f32 -1.442695, %v549_v56  ;;  %595 = vmatmul.f32.gmra.mxu2 %v493_v55 }
 0x126   : > { %v737_v60 = vadd.f32 1.0, %v1516_v58  ;;  %v1983_v58 = vpop.f32.mrf.mxu3 }
 0x127   : > { %1517 = vpow2.f32 %v1399_v59 }
 0x128   : > { %1519 = vrcp.f32 %v737_v60  ;;  %v780_v10 = vand.u32 2147483648, %v737_v60  ;;  %v778_v13 = vand.u32 2147483647, %v737_v60  ;;  %vm774_vm2 = vweird.f32 %v737_v60 }
 0x12a   : > { %v551_v62 = vpop.f32.mrf.mxu1  ;;  %v781_v20 = vor.u32 1.1754944e-38, %v780_v10  ;;  %vm779_vm4 = vcmp.eq.f32.partialorder %v778_v13, 8.507059e+37 }
 0x12b   : > { %v552_v0 = vadd.f32 %v1950_v44, %v551_v62 }
 0x12d   : > { %v1518_v2 = vpop.eup %1517  ;;  %v1400_v3 = vmul.f32 -1.442695, %v552_v0  ;;  %598 = vmatmul.f32.gmra.mxu2 %v494_v63  ;;  %v447_v63 = vadd.f32 %v1901_v42, %v1942_v38 }
 0x12e   : > { %v1520_v4 = vpop.eup %1519  ;;  %v738_v6 = vadd.f32 1.0, %v1518_v2 }
 0x12f   : > { %v770_v7 = vmul.f32 %v1520_v4, %v737_v60  ;;  %1521 = vpow2.f32 %v1400_v3  ;;  %vm775_vm1 = vweird.f32 %v1520_v4 }
 0x130   : > { %1523 = vrcp.f32 %v738_v6  ;;  %vm776_vm3 = vmor %vm774_vm2, %vm775_vm1  ;;  %v795_v28 = vand.u32 2147483648, %v738_v6  ;;  %v793_v32 = vand.u32 2147483647, %v738_v6  ;;  %vm789_vm6 = vweird.f32 %v738_v6 }
 0x131   : > { %v771_v8 = vsub.f32 1.0, %v770_v7 }
 0x132   : > { %v554_v11 = vpop.f32.mrf.mxu1  ;;  %v796_v40 = vor.u32 1.1754944e-38, %v795_v28  ;;  %vm794_vm8 = vcmp.eq.f32.partialorder %v793_v32, 8.507059e+37 }
 0x133   : > { %v772_v12 = vmul.f32 %v1520_v4, %v771_v8  ;;  %v555_v14 = vadd.f32 %v1950_v44, %v554_v11 }
 0x135   : > { %v1522_v16 = vpop.eup %1521  ;;  %v773_v17 = vadd.f32 %v1520_v4, %v772_v12  ;;  %v1401_v18 = vmul.f32 -1.442695, %v555_v14  ;;  %601 = vmatmul.f32.gmra.mxu2 %v495_v9  ;;  %v470_v12 = vpop.f32.mrf.mxu3 }
 0x136   : > { %v1524_v19 = vpop.eup %1523  ;;  %v739_v22 = vadd.f32 1.0, %v1522_v16  ;;  %v471_v16 = vadd.f32 %v1901_v42, %v470_v12 }
 0x137   : > { %v777_v23 = vsel %vm776_vm3, %v1520_v4, %v773_v17  ;;  %v785_v24 = vmul.f32 %v1524_v19, %v738_v6  ;;  %1525 = vpow2.f32 %v1401_v18  ;;  %vm790_vm5 = vweird.f32 %v1524_v19 }
 0x138   : > { %v782_v25 = vsel %vm779_vm4, %v781_v20, %v777_v23  ;;  %1527 = vrcp.f32 %v739_v22  ;;  %vm791_vm7 = vmor %vm789_vm6, %vm790_vm5  ;;  %v810_v52 = vand.u32 2147483648, %v739_v22  ;;  %v808_v55 = vand.u32 2147483647, %v739_v22 }
 0x139   : > { %1249 = vst [vmem:[%s1973_s9] sm:$0xff] %v782_v25  ;;  %v786_v26 = vsub.f32 1.0, %v785_v24  ;;  %vm804_vm10 = vweird.f32 %v739_v22  ;;  %v498_v6 = vmax.f32 %v447_v63, 0.0  ;;  %v506_v25 = vmax.f32 %v471_v16, 0.0 }
 0x13a   : > { %v557_v29 = vpop.f32.mrf.mxu1  ;;  %v811_v62 = vor.u32 1.1754944e-38, %v810_v52  ;;  %vm809_vm12 = vcmp.eq.f32.partialorder %v808_v55, 8.507059e+37  ;;  %v500_v52 = vmax.f32 %v453_v41, 0.0  ;;  %v456_v63 = vadd.f32 %v1901_v42, %v1958_v57 }
 0x13b   : > { %v787_v31 = vmul.f32 %v1524_v19, %v786_v26  ;;  %v558_v30 = vadd.f32 %v1950_v44, %v557_v29  ;;  %634 = vmatmul.f32.vlgmr.msrb.gmra.mxu3 %v506_v25  ;;  %v459_v16 = vadd.f32 %v1901_v42, %v1962_v1 }
 0x13d   : > { %v1526_v35 = vpop.eup %1525  ;;  %v788_v36 = vadd.f32 %v1524_v19, %v787_v31  ;;  %v1402_v37 = vmul.f32 -1.442695, %v558_v30  ;;  %604 = vmatmul.f32.gmra.mxu2 %v496_v27 }
 0x13e   : > { %v1528_v39 = vpop.eup %1527  ;;  %v740_v45 = vadd.f32 1.0, %v1526_v35 }
 0x13f   : > { %v792_v46 = vsel %vm791_vm7, %v1524_v19, %v788_v36  ;;  %v800_v47 = vmul.f32 %v1528_v39, %v739_v22  ;;  %1529 = vpow2.f32 %v1402_v37  ;;  %vm805_vm9 = vweird.f32 %v1528_v39 }
 0x140   : > { %v797_v48 = vsel %vm794_vm8, %v796_v40, %v792_v46  ;;  %1531 = vrcp.f32 %v740_v45  ;;  %vm806_vm11 = vmor %vm804_vm10, %vm805_vm9  ;;  %v825_v7 = vand.u32 2147483648, %v740_v45  ;;  %v823_v10 = vand.u32 2147483647, %v740_v45 }
 0x141   : > { %1250 = vst [vmem:[%s1973_s9 + $0x8] sm:$0xff] %v797_v48  ;;  %v801_v49 = vsub.f32 1.0, %v800_v47  ;;  %vm819_vm14 = vweird.f32 %v740_v45  ;;  %v450_v19 = vadd.f32 %v1901_v42, %v1945_v43  ;;  %v473_v43 = vpop.f32.mrf.mxu3 }
 0x142   : > { %v560_v53 = vpop.f32.mrf.mxu1  ;;  %v826_v18 = vor.u32 1.1754944e-38, %v825_v7  ;;  %vm824_vm0 = vcmp.eq.f32.partialorder %v823_v10, 8.507059e+37  ;;  %v474_v37 = vadd.f32 %v1901_v42, %v473_v43  ;;  %v462_v43 = vadd.f32 %v1901_v42, %v1969_v15 }
 0x143   : > { %v802_v54 = vmul.f32 %v1528_v39, %v801_v49  ;;  %v561_v56 = vadd.f32 %v1950_v44, %v560_v53  ;;  %v499_v26 = vmax.f32 %v450_v19, 0.0 }
 0x145   : > { %v1530_v34 = vpop.eup %1529  ;;  %v803_v59 = vadd.f32 %v1528_v39, %v802_v54  ;;  %v1403_v60 = vmul.f32 -1.442695, %v561_v56  ;;  %607 = vmatmul.f32.gmra.mxu2 %v497_v51  ;;  %v507_v51 = vmax.f32 %v474_v37, 0.0 }
 0x146   : > { %v1532_v61 = vpop.eup %1531  ;;  %v741_v0 = vadd.f32 1.0, %v1530_v34 }
 0x147   : > { %v807_v2 = vsel %vm806_vm11, %v1528_v39, %v803_v59  ;;  %v815_v3 = vmul.f32 %v1532_v61, %v740_v45  ;;  %1533 = vpow2.f32 %v1403_v60  ;;  %vm820_vm13 = vweird.f32 %v1532_v61  ;;  %637 = vmatmul.f32.gmra.mxu3 %v507_v51 }
 0x148   : > { %v812_v4 = vsel %vm809_vm12, %v811_v62, %v807_v2  ;;  %1535 = vrcp.f32 %v741_v0  ;;  %vm821_vm15 = vmor %vm819_vm14, %vm820_vm13  ;;  %v840_v27 = vand.u32 2147483648, %v741_v0  ;;  %v838_v31 = vand.u32 2147483647, %v741_v0 }
 0x149   : > { %1251 = vst [vmem:[%s1973_s9 + $0x10] sm:$0xff] %v812_v4  ;;  %v816_v5 = vsub.f32 1.0, %v815_v3  ;;  %vm834_vm2 = vweird.f32 %v741_v0 }
 0x14a   : > { %v563_v8 = vpop.f32.mrf.mxu1  ;;  %v841_v40 = vor.u32 1.1754944e-38, %v840_v27  ;;  %vm839_vm4 = vcmp.eq.f32.partialorder %v838_v31, 8.507059e+37 }
 0x14b   : > { %v817_v9 = vmul.f32 %v1532_v61, %v816_v5  ;;  %v564_v11 = vadd.f32 %v1950_v44, %v563_v8 }
 0x14d   : > { %v1534_v13 = vpop.eup %1533  ;;  %v818_v38 = vadd.f32 %v1532_v61, %v817_v9  ;;  %v1404_v14 = vmul.f32 -1.442695, %v564_v11  ;;  %610 = vmatmul.f32.gmra.mxu2 %v498_v6  ;;  %v501_v6 = vmax.f32 %v456_v63, 0.0 }
 0x14e   : > { %v1536_v17 = vpop.eup %1535  ;;  %v742_v20 = vadd.f32 1.0, %v1534_v13 }
 0x14f   : > { %v822_v21 = vsel %vm821_vm15, %v1532_v61, %v818_v38  ;;  %v830_v22 = vmul.f32 %v1536_v17, %v741_v0  ;;  %1537 = vpow2.f32 %v1404_v14  ;;  %vm835_vm1 = vweird.f32 %v1536_v17 }
 0x150   : > { %v827_v23 = vsel %vm824_vm0, %v826_v18, %v822_v21  ;;  %1539 = vrcp.f32 %v742_v20  ;;  %vm836_vm3 = vmor %vm834_vm2, %vm835_vm1  ;;  %v855_v53 = vand.u32 2147483648, %v742_v20  ;;  %v853_v56 = vand.u32 2147483647, %v742_v20 }
 0x151   : > { %1252 = vst [vmem:[%s1973_s9 + $0x18] sm:$0xff] %v827_v23  ;;  %v831_v24 = vsub.f32 1.0, %v830_v22  ;;  %vm849_vm6 = vweird.f32 %v742_v20  ;;  %v502_v22 = vmax.f32 %v459_v16, 0.0 }
 0x152   : > { %v566_v28 = vpop.f32.mrf.mxu1  ;;  %v856_v62 = vor.u32 1.1754944e-38, %v855_v53  ;;  %vm854_vm8 = vcmp.eq.f32.partialorder %v853_v56, 8.507059e+37 }
 0x153   : > { %v832_v29 = vmul.f32 %v1536_v17, %v831_v24  ;;  %v567_v32 = vadd.f32 %v1950_v44, %v566_v28 }
 0x155   : > { %v1538_v30 = vpop.eup %1537  ;;  %v833_v35 = vadd.f32 %v1536_v17, %v832_v29  ;;  %v1405_v36 = vmul.f32 -1.442695, %v567_v32  ;;  %613 = vmatmul.f32.gmra.mxu2 %v499_v26 }
 0x156   : > { %v1540_v39 = vpop.eup %1539  ;;  %v743_v45 = vadd.f32 1.0, %v1538_v30 }
 0x157   : > { %v837_v46 = vsel %vm836_vm3, %v1536_v17, %v833_v35  ;;  %v845_v47 = vmul.f32 %v1540_v39, %v742_v20  ;;  %1541 = vpow2.f32 %v1405_v36  ;;  %vm850_vm5 = vweird.f32 %v1540_v39 }
 0x158   : > { %v842_v48 = vsel %vm839_vm4, %v841_v40, %v837_v46  ;;  %1543 = vrcp.f32 %v743_v45  ;;  %vm851_vm7 = vmor %vm849_vm6, %vm850_vm5  ;;  %v870_v7 = vand.u32 2147483648, %v743_v45  ;;  %v868_v10 = vand.u32 2147483647, %v743_v45 }
 0x159   : > { %1253 = vst [vmem:[%s1973_s9 + $0x20] sm:$0xff] %v842_v48  ;;  %v846_v49 = vsub.f32 1.0, %v845_v47  ;;  %vm864_vm10 = vweird.f32 %v743_v45  ;;  %v503_v40 = vmax.f32 %v462_v43, 0.0 }
 0x15a   : > { %v569_v54 = vpop.f32.mrf.mxu1  ;;  %v871_v14 = vor.u32 1.1754944e-38, %v870_v7  ;;  %vm869_vm12 = vcmp.eq.f32.partialorder %v868_v10, 8.507059e+37  ;;  %v468_v7 = vadd.f32 %v1901_v42, %v1983_v58 }
 0x15b   : > { %v847_v55 = vmul.f32 %v1540_v39, %v846_v49  ;;  %v570_v34 = vadd.f32 %v1950_v44, %v569_v54  ;;  %v465_v54 = vadd.f32 %v1901_v42, %v1977_v33 }
 0x15d   : > { %v1542_v50 = vpop.eup %1541  ;;  %v848_v59 = vadd.f32 %v1540_v39, %v847_v55  ;;  %v1406_v60 = vmul.f32 -1.442695, %v570_v34  ;;  %616 = vmatmul.f32.gmra.mxu2 %v500_v52 }
 0x15e   : > { %v1544_v61 = vpop.eup %1543  ;;  %v744_v0 = vadd.f32 1.0, %v1542_v50 }
 0x15f   : > { %v852_v2 = vsel %vm851_vm7, %v1540_v39, %v848_v59  ;;  %v860_v3 = vmul.f32 %v1544_v61, %v743_v45  ;;  %1545 = vpow2.f32 %v1406_v60  ;;  %vm865_vm9 = vweird.f32 %v1544_v61 }
 0x160   : > { %v857_v4 = vsel %vm854_vm8, %v856_v62, %v852_v2  ;;  %1547 = vrcp.f32 %v744_v0  ;;  %vm866_vm11 = vmor %vm864_vm10, %vm865_vm9  ;;  %v885_v23 = vand.u32 2147483648, %v744_v0  ;;  %v883_v26 = vand.u32 2147483647, %v744_v0 }
 0x161   : > { %1254 = vst [vmem:[%s1973_s9 + $0x28] sm:$0xff] %v857_v4  ;;  %v861_v5 = vsub.f32 1.0, %v860_v3  ;;  %vm879_vm14 = vweird.f32 %v744_v0  ;;  %v504_v60 = vmax.f32 %v465_v54, 0.0 }
 0x162   : > { %v572_v8 = vpop.f32.mrf.mxu1  ;;  %v886_v32 = vor.u32 1.1754944e-38, %v885_v23  ;;  %vm884_vm0 = vcmp.eq.f32.partialorder %v883_v26, 8.507059e+37 }
 0x163   : > { %v862_v9 = vmul.f32 %v1544_v61, %v861_v5  ;;  %v573_v11 = vadd.f32 %v1950_v44, %v572_v8 }
 0x165   : > { %v1546_v12 = vpop.eup %1545  ;;  %v863_v57 = vadd.f32 %v1544_v61, %v862_v9  ;;  %v1407_v13 = vmul.f32 -1.442695, %v573_v11  ;;  %619 = vmatmul.f32.gmra.mxu2 %v501_v6 }
 0x166   : > { %v1548_v38 = vpop.eup %1547  ;;  %v745_v17 = vadd.f32 1.0, %v1546_v12 }
 0x167   : > { %v867_v18 = vsel %vm866_vm11, %v1544_v61, %v863_v57  ;;  %v875_v19 = vmul.f32 %v1548_v38, %v744_v0  ;;  %1549 = vpow2.f32 %v1407_v13  ;;  %vm880_vm13 = vweird.f32 %v1548_v38 }
 0x168   : > { %v872_v20 = vsel %vm869_vm12, %v871_v14, %v867_v18  ;;  %1551 = vrcp.f32 %v745_v17  ;;  %vm881_vm15 = vmor %vm879_vm14, %vm880_vm13  ;;  %v900_v41 = vand.u32 2147483648, %v745_v17  ;;  %v898_v47 = vand.u32 2147483647, %v745_v17 }
 0x169   : > { %1255 = vst [vmem:[%s1973_s9 + $0x30] sm:$0xff] %v872_v20  ;;  %v876_v21 = vsub.f32 1.0, %v875_v19  ;;  %vm894_vm2 = vweird.f32 %v745_v17  ;;  %v505_v57 = vmax.f32 %v468_v7, 0.0 }
 0x16a   : > { %v575_v24 = vpop.f32.mrf.mxu1  ;;  %v901_v53 = vor.u32 1.1754944e-38, %v900_v41  ;;  %vm899_vm4 = vcmp.eq.f32.partialorder %v898_v47, 8.507059e+37 }
 0x16b   : > { %v877_v25 = vmul.f32 %v1548_v38, %v876_v21  ;;  %v576_v27 = vadd.f32 %v1950_v44, %v575_v24 }
 0x16d   : > { %v1550_v28 = vpop.eup %1549  ;;  %v878_v1 = vadd.f32 %v1548_v38, %v877_v25  ;;  %v1408_v29 = vmul.f32 -1.442695, %v576_v27  ;;  %622 = vmatmul.f32.gmra.mxu2 %v502_v22 }
 0x16e   : > { %v1552_v31 = vpop.eup %1551  ;;  %v746_v30 = vadd.f32 1.0, %v1550_v28 }
 0x16f   : > { %v882_v35 = vsel %vm881_vm15, %v1548_v38, %v878_v1  ;;  %v890_v36 = vmul.f32 %v1552_v31, %v745_v17  ;;  %1553 = vpow2.f32 %v1408_v29  ;;  %vm895_vm1 = vweird.f32 %v1552_v31 }
 0x170   : > { %v887_v37 = vsel %vm884_vm0, %v886_v32, %v882_v35  ;;  %1555 = vrcp.f32 %v746_v30  ;;  %vm896_vm3 = vmor %vm894_vm2, %vm895_vm1  ;;  %v915_v61 = vand.u32 2147483648, %v746_v30  ;;  %v913_v0 = vand.u32 2147483647, %v746_v30 }
 0x171   : > { %1256 = vst [vmem:[%s1973_s9 + $0x38] sm:$0xff] %v887_v37  ;;  %v891_v39 = vsub.f32 1.0, %v890_v36  ;;  %vm909_vm6 = vweird.f32 %v746_v30 }
 0x172   : > { %v578_v45 = vpop.f32.mrf.mxu1  ;;  %v916_v6 = vor.u32 1.1754944e-38, %v915_v61  ;;  %vm914_vm8 = vcmp.eq.f32.partialorder %v913_v0, 8.507059e+37 }
 0x173   : > { %v892_v46 = vmul.f32 %v1552_v31, %v891_v39  ;;  %v579_v48 = vadd.f32 %v1950_v44, %v578_v45 }
 0x175   : > { %v1554_v49 = vpop.eup %1553  ;;  %v893_v15 = vadd.f32 %v1552_v31, %v892_v46  ;;  %v1409_v51 = vmul.f32 -1.442695, %v579_v48  ;;  %625 = vmatmul.f32.gmra.mxu2 %v503_v40 }
 0x176   : > { %v1556_v52 = vpop.eup %1555  ;;  %v747_v55 = vadd.f32 1.0, %v1554_v49 }
 0x177   : > { %v897_v56 = vsel %vm896_vm3, %v1552_v31, %v893_v15  ;;  %v905_v34 = vmul.f32 %v1556_v52, %v746_v30  ;;  %1557 = vpow2.f32 %v1409_v51  ;;  %vm910_vm5 = vweird.f32 %v1556_v52 }
 0x178   : > { %v902_v50 = vsel %vm899_vm4, %v901_v53, %v897_v56  ;;  %1559 = vrcp.f32 %v747_v55  ;;  %vm911_vm7 = vmor %vm909_vm6, %vm910_vm5  ;;  %v930_v13 = vand.u32 2147483648, %v747_v55  ;;  %v928_v16 = vand.u32 2147483647, %v747_v55 }
 0x179   : > { %1257 = vst [vmem:[%s1973_s9 + $0x40] sm:$0xff] %v902_v50  ;;  %v906_v59 = vsub.f32 1.0, %v905_v34  ;;  %vm924_vm10 = vweird.f32 %v747_v55 }
 0x17a   : > { %v581_v62 = vpop.f32.mrf.mxu1  ;;  %v931_v20 = vor.u32 1.1754944e-38, %v930_v13  ;;  %vm929_vm12 = vcmp.eq.f32.partialorder %v928_v16, 8.507059e+37 }
 0x17b   : > { %v907_v63 = vmul.f32 %v1556_v52, %v906_v59  ;;  %v582_v2 = vadd.f32 %v1950_v44, %v581_v62 }
 0x17d   : > { %v1558_v3 = vpop.eup %1557  ;;  %v908_v33 = vadd.f32 %v1556_v52, %v907_v63  ;;  %v1410_v4 = vmul.f32 -1.442695, %v582_v2  ;;  %628 = vmatmul.f32.gmra.mxu2 %v504_v60 }
 0x17e   : > { %v1560_v5 = vpop.eup %1559  ;;  %v748_v8 = vadd.f32 1.0, %v1558_v3 }
 0x17f   : > { %v912_v9 = vsel %vm911_vm7, %v1556_v52, %v908_v33  ;;  %v920_v10 = vmul.f32 %v1560_v5, %v747_v55  ;;  %1561 = vpow2.f32 %v1410_v4  ;;  %vm925_vm9 = vweird.f32 %v1560_v5 }
 0x180   : > { %v917_v11 = vsel %vm914_vm8, %v916_v6, %v912_v9  ;;  %1563 = vrcp.f32 %v748_v8  ;;  %vm926_vm11 = vmor %vm924_vm10, %vm925_vm9  ;;  %v945_v26 = vand.u32 2147483648, %v748_v8  ;;  %v943_v1 = vand.u32 2147483647, %v748_v8 }
 0x181   : > { %1258 = vst [vmem:[%s1973_s9 + $0x48] sm:$0xff] %v917_v11  ;;  %v921_v12 = vsub.f32 1.0, %v920_v10  ;;  %vm939_vm14 = vweird.f32 %v748_v8 }
 0x182   : > { %v584_v38 = vpop.f32.mrf.mxu1  ;;  %v946_v35 = vor.u32 1.1754944e-38, %v945_v26  ;;  %vm944_vm0 = vcmp.eq.f32.partialorder %v943_v1, 8.507059e+37 }
 0x183   : > { %v922_v14 = vmul.f32 %v1560_v5, %v921_v12  ;;  %v585_v17 = vadd.f32 %v1950_v44, %v584_v38 }
 0x185   : > { %v1562_v18 = vpop.eup %1561  ;;  %v923_v42 = vadd.f32 %v1560_v5, %v922_v14  ;;  %v1411_v58 = vmul.f32 -1.442695, %v585_v17  ;;  %631 = vmatmul.f32.gmra.mxu2 %v505_v57 }
 0x186   : > { %v1564_v19 = vpop.eup %1563  ;;  %v749_v21 = vadd.f32 1.0, %v1562_v18 }
 0x187   : > { %v927_v22 = vsel %vm926_vm11, %v1560_v5, %v923_v42  ;;  %v935_v23 = vmul.f32 %v1564_v19, %v748_v8  ;;  %1565 = vpow2.f32 %v1411_v58  ;;  %vm940_vm13 = vweird.f32 %v1564_v19 }
 0x188   : > { %v932_v24 = vsel %vm929_vm12, %v931_v20, %v927_v22  ;;  %1567 = vrcp.f32 %v749_v21  ;;  %vm941_vm15 = vmor %vm939_vm14, %vm940_vm13  ;;  %v960_v45 = vand.u32 2147483648, %v749_v21  ;;  %v958_v47 = vand.u32 2147483647, %v749_v21 }
 0x189   : > { %1259 = vst [vmem:[%s1973_s9 + $0x50] sm:$0xff] %v932_v24  ;;  %v936_v25 = vsub.f32 1.0, %v935_v23  ;;  %vm954_vm2 = vweird.f32 %v749_v21 }
 0x18a   : > { %v587_v27 = vpop.f32.mrf.mxu1  ;;  %v961_v51 = vor.u32 1.1754944e-38, %v960_v45  ;;  %vm959_vm4 = vcmp.eq.f32.partialorder %v958_v47, 8.507059e+37 }
 0x18b   : > { %v937_v28 = vmul.f32 %v1564_v19, %v936_v25  ;;  %v588_v29 = vadd.f32 %v1950_v44, %v587_v27 }
 0x18d   : > { %v1566_v31 = vpop.eup %1565  ;;  %v938_v32 = vadd.f32 %v1564_v19, %v937_v28  ;;  %v1412_v43 = vmul.f32 -1.442695, %v588_v29 }
 0x18e   : > { %v1568_v30 = vpop.eup %1567  ;;  %v750_v36 = vadd.f32 1.0, %v1566_v31 }
 0x18f   : > { %v942_v37 = vsel %vm941_vm15, %v1564_v19, %v938_v32  ;;  %v950_v39 = vmul.f32 %v1568_v30, %v749_v21  ;;  %1569 = vpow2.f32 %v1412_v43  ;;  %vm955_vm1 = vweird.f32 %v1568_v30 }
 0x190   : > { %v947_v40 = vsel %vm944_vm0, %v946_v35, %v942_v37  ;;  %1571 = vrcp.f32 %v750_v36  ;;  %vm956_vm3 = vmor %vm954_vm2, %vm955_vm1  ;;  %v975_v59 = vand.u32 2147483648, %v750_v36  ;;  %v973_v61 = vand.u32 2147483647, %v750_v36 }
 0x191   : > { %1260 = vst [vmem:[%s1973_s9 + $0x58] sm:$0xff] %v947_v40  ;;  %v951_v41 = vsub.f32 1.0, %v950_v39  ;;  %vm969_vm6 = vweird.f32 %v750_v36 }
 0x192   : > { %v976_v2 = vor.u32 1.1754944e-38, %v975_v59  ;;  %vm974_vm8 = vcmp.eq.f32.partialorder %v973_v61, 8.507059e+37 }
 0x193   : > { %v952_v46 = vmul.f32 %v1568_v30, %v951_v41 }
 0x195   : > { %v1570_v48 = vpop.eup %1569  ;;  %v953_v49 = vadd.f32 %v1568_v30, %v952_v46 }
 0x196   : > { %v1572_v15 = vpop.eup %1571  ;;  %v751_v52 = vadd.f32 1.0, %v1570_v48 }
 0x197   : > { %v957_v53 = vsel %vm956_vm3, %v1568_v30, %v953_v49  ;;  %v965_v54 = vmul.f32 %v1572_v15, %v750_v36  ;;  %vm970_vm5 = vweird.f32 %v1572_v15 }
 0x198   : > { %v962_v55 = vsel %vm959_vm4, %v961_v51, %v957_v53  ;;  %1573 = vrcp.f32 %v751_v52  ;;  %v590_v56 = vpop.f32.mrf.mxu2  ;;  %vm971_vm7 = vmor %vm969_vm6, %vm970_vm5  ;;  %v990_v8 = vand.u32 2147483648, %v751_v52  ;;  %v988_v11 = vand.u32 2147483647, %v751_v52 }
 0x199   : > { %1261 = vst [vmem:[%s1973_s9 + $0x60] sm:$0xff] %v962_v55  ;;  %v966_v34 = vsub.f32 1.0, %v965_v54  ;;  %v591_v50 = vadd.f32 %v1950_v44, %v590_v56  ;;  %vm984_vm10 = vweird.f32 %v751_v52 }
 0x19a   : > { %v991_v38 = vor.u32 1.1754944e-38, %v990_v8  ;;  %vm989_vm12 = vcmp.eq.f32.partialorder %v988_v11, 8.507059e+37 }
 0x19b   : > { %v967_v60 = vmul.f32 %v1572_v15, %v966_v34  ;;  %v1413_v62 = vmul.f32 -1.442695, %v591_v50 }
 0x19d   : > { %v968_v63 = vadd.f32 %v1572_v15, %v967_v60  ;;  %1575 = vpow2.f32 %v1413_v62 }
 0x19e   : > { %v1574_v0 = vpop.eup %1573 }
 0x19f   : > { %v972_v3 = vsel %vm971_vm7, %v1572_v15, %v968_v63  ;;  %v980_v33 = vmul.f32 %v1574_v0, %v751_v52  ;;  %vm985_vm9 = vweird.f32 %v1574_v0 }
 0x1a0   : > { %v977_v4 = vsel %vm974_vm8, %v976_v2, %v972_v3  ;;  %v593_v5 = vpop.f32.mrf.mxu2  ;;  %vm986_vm11 = vmor %vm984_vm10, %vm985_vm9 }
 0x1a1   : > { %1262 = vst [vmem:[%s1973_s9 + $0x68] sm:$0xff] %v977_v4  ;;  %v981_v6 = vsub.f32 1.0, %v980_v33  ;;  %v594_v7 = vadd.f32 %v1950_v44, %v593_v5 }
 0x1a3   : > { %v1576_v9 = vpop.eup %1575  ;;  %v982_v10 = vmul.f32 %v1574_v0, %v981_v6  ;;  %v1414_v12 = vmul.f32 -1.442695, %v594_v7 }
 0x1a4   : > { %v752_v57 = vadd.f32 1.0, %v1576_v9 }
 0x1a5   : > { %v983_v13 = vadd.f32 %v1574_v0, %v982_v10  ;;  %1577 = vpow2.f32 %v1414_v12 }
 0x1a6   : > { %1579 = vrcp.f32 %v752_v57  ;;  %v1005_v23 = vand.u32 2147483648, %v752_v57  ;;  %v1003_v26 = vand.u32 2147483647, %v752_v57  ;;  %vm999_vm14 = vweird.f32 %v752_v57 }
 0x1a7   : > { %v987_v14 = vsel %vm986_vm11, %v1574_v0, %v983_v13 }
 0x1a8   : > { %v992_v16 = vsel %vm989_vm12, %v991_v38, %v987_v14  ;;  %v596_v17 = vpop.f32.mrf.mxu2  ;;  %v1006_v32 = vor.u32 1.1754944e-38, %v1005_v23  ;;  %vm1004_vm0 = vcmp.eq.f32.partialorder %v1003_v26, 8.507059e+37 }
 0x1a9   : > { %1263 = vst [vmem:[%s1973_s9 + $0x70] sm:$0xff] %v992_v16  ;;  %v597_v18 = vadd.f32 %v1950_v44, %v596_v17 }
 0x1ab   : > { %v1578_v42 = vpop.eup %1577  ;;  %v1415_v58 = vmul.f32 -1.442695, %v597_v18 }
 0x1ac   : > { %v1580_v19 = vpop.eup %1579  ;;  %v753_v20 = vadd.f32 1.0, %v1578_v42 }
 0x1ad   : > { %v995_v21 = vmul.f32 %v1580_v19, %v752_v57  ;;  %1581 = vpow2.f32 %v1415_v58  ;;  %vm1000_vm13 = vweird.f32 %v1580_v19 }
 0x1ae   : > { %1583 = vrcp.f32 %v753_v20  ;;  %vm1001_vm15 = vmor %vm999_vm14, %vm1000_vm13  ;;  %v1020_v39 = vand.u32 2147483648, %v753_v20  ;;  %v1018_v45 = vand.u32 2147483647, %v753_v20  ;;  %vm1014_vm2 = vweird.f32 %v753_v20 }
 0x1af   : > { %v996_v22 = vsub.f32 1.0, %v995_v21 }
 0x1b0   : > { %v599_v24 = vpop.f32.mrf.mxu2  ;;  %v1021_v51 = vor.u32 1.1754944e-38, %v1020_v39  ;;  %vm1019_vm4 = vcmp.eq.f32.partialorder %v1018_v45, 8.507059e+37 }
 0x1b1   : > { %v997_v25 = vmul.f32 %v1580_v19, %v996_v22  ;;  %v600_v27 = vadd.f32 %v1950_v44, %v599_v24 }
 0x1b3   : > { %v1582_v28 = vpop.eup %1581  ;;  %v998_v1 = vadd.f32 %v1580_v19, %v997_v25  ;;  %v1416_v29 = vmul.f32 -1.442695, %v600_v27 }
 0x1b4   : > { %v1584_v31 = vpop.eup %1583  ;;  %v754_v43 = vadd.f32 1.0, %v1582_v28 }
 0x1b5   : > { %v1002_v30 = vsel %vm1001_vm15, %v1580_v19, %v998_v1  ;;  %v1010_v35 = vmul.f32 %v1584_v31, %v753_v20  ;;  %1585 = vpow2.f32 %v1416_v29  ;;  %vm1015_vm1 = vweird.f32 %v1584_v31 }
 0x1b6   : > { %v1007_v36 = vsel %vm1004_vm0, %v1006_v32, %v1002_v30  ;;  %1587 = vrcp.f32 %v754_v43  ;;  %vm1016_vm3 = vmor %vm1014_vm2, %vm1015_vm1  ;;  %v1035_v34 = vand.u32 2147483648, %v754_v43  ;;  %v1033_v60 = vand.u32 2147483647, %v754_v43 }
 0x1b7   : > { %1264 = vst [vmem:[%s1973_s9 + $0x78] sm:$0xff] %v1007_v36  ;;  %v1011_v37 = vsub.f32 1.0, %v1010_v35  ;;  %vm1029_vm6 = vweird.f32 %v754_v43 }
 0x1b8   : > { %v602_v40 = vpop.f32.mrf.mxu2  ;;  %v1036_v3 = vor.u32 1.1754944e-38, %v1035_v34  ;;  %vm1034_vm8 = vcmp.eq.f32.partialorder %v1033_v60, 8.507059e+37 }
 0x1b9   : > { %v1012_v41 = vmul.f32 %v1584_v31, %v1011_v37  ;;  %v603_v46 = vadd.f32 %v1950_v44, %v602_v40 }
 0x1bb   : > { %v1586_v47 = vpop.eup %1585  ;;  %v1013_v48 = vadd.f32 %v1584_v31, %v1012_v41  ;;  %v1417_v49 = vmul.f32 -1.442695, %v603_v46 }
 0x1bc   : > { %v1588_v15 = vpop.eup %1587  ;;  %v755_v52 = vadd.f32 1.0, %v1586_v47 }
 0x1bd   : > { %v1017_v53 = vsel %vm1016_vm3, %v1584_v31, %v1013_v48  ;;  %v1025_v54 = vmul.f32 %v1588_v15, %v754_v43  ;;  %1589 = vpow2.f32 %v1417_v49  ;;  %vm1030_vm5 = vweird.f32 %v1588_v15 }
 0x1be   : > { %v1022_v55 = vsel %vm1019_vm4, %v1021_v51, %v1017_v53  ;;  %1591 = vrcp.f32 %v755_v52  ;;  %vm1031_vm7 = vmor %vm1029_vm6, %vm1030_vm5  ;;  %v1050_v8 = vand.u32 2147483648, %v755_v52  ;;  %v1048_v11 = vand.u32 2147483647, %v755_v52  ;;  %v635_v30 = vpop.f32.mrf.mxu3 }
 0x1bf   : > { %1265 = vst [vmem:[%s1973_s9 + $0x80] sm:$0xff] %v1022_v55  ;;  %v1026_v56 = vsub.f32 1.0, %v1025_v54  ;;  %vm1044_vm10 = vweird.f32 %v755_v52 }
 0x1c0   : > { %v605_v50 = vpop.f32.mrf.mxu2  ;;  %v1051_v16 = vor.u32 1.1754944e-38, %v1050_v8  ;;  %vm1049_vm12 = vcmp.eq.f32.partialorder %v1048_v11, 8.507059e+37 }
 0x1c1   : > { %v1027_v59 = vmul.f32 %v1588_v15, %v1026_v56  ;;  %v606_v61 = vadd.f32 %v1950_v44, %v605_v50 }
 0x1c3   : > { %v1590_v62 = vpop.eup %1589  ;;  %v1028_v63 = vadd.f32 %v1588_v15, %v1027_v59  ;;  %v1418_v0 = vmul.f32 -1.442695, %v606_v61 }
 0x1c4   : > { %v1592_v2 = vpop.eup %1591  ;;  %v756_v33 = vadd.f32 1.0, %v1590_v62 }
 0x1c5   : > { %v1032_v4 = vsel %vm1031_vm7, %v1588_v15, %v1028_v63  ;;  %v1040_v5 = vmul.f32 %v1592_v2, %v755_v52  ;;  %1593 = vpow2.f32 %v1418_v0  ;;  %vm1045_vm9 = vweird.f32 %v1592_v2 }
 0x1c6   : > { %v1037_v6 = vsel %vm1034_vm8, %v1036_v3, %v1032_v4  ;;  %1595 = vrcp.f32 %v756_v33  ;;  %vm1046_vm11 = vmor %vm1044_vm10, %vm1045_vm9  ;;  %v1065_v20 = vand.u32 2147483648, %v756_v33  ;;  %v1063_v23 = vand.u32 2147483647, %v756_v33 }
 0x1c7   : > { %1266 = vst [vmem:[%s1973_s9 + $0x88] sm:$0xff] %v1037_v6  ;;  %v1041_v7 = vsub.f32 1.0, %v1040_v5  ;;  %vm1059_vm14 = vweird.f32 %v756_v33 }
 0x1c8   : > { %v608_v9 = vpop.f32.mrf.mxu2  ;;  %v1066_v1 = vor.u32 1.1754944e-38, %v1065_v20  ;;  %vm1064_vm0 = vcmp.eq.f32.partialorder %v1063_v23, 8.507059e+37 }
 0x1c9   : > { %v1042_v10 = vmul.f32 %v1592_v2, %v1041_v7  ;;  %v609_v12 = vadd.f32 %v1950_v44, %v608_v9 }
 0x1ca   : > { %v638_v56 = vpop.f32.mrf.mxu3 }
 0x1cb   : > { %v1594_v57 = vpop.eup %1593  ;;  %v1043_v13 = vadd.f32 %v1592_v2, %v1042_v10  ;;  %v1419_v38 = vmul.f32 -1.442695, %v609_v12 }
 0x1cc   : > { %v1596_v14 = vpop.eup %1595  ;;  %v757_v17 = vadd.f32 1.0, %v1594_v57 }
 0x1cd   : > { %v1047_v18 = vsel %vm1046_vm11, %v1592_v2, %v1043_v13  ;;  %v1055_v42 = vmul.f32 %v1596_v14, %v756_v33  ;;  %1597 = vpow2.f32 %v1419_v38  ;;  %vm1060_vm13 = vweird.f32 %v1596_v14 }
 0x1ce   : > { %v1052_v58 = vsel %vm1049_vm12, %v1051_v16, %v1047_v18  ;;  %1599 = vrcp.f32 %v757_v17  ;;  %vm1061_vm15 = vmor %vm1059_vm14, %vm1060_vm13  ;;  %v1078_v37 = vand.u32 2147483647, %v757_v17  ;;  %v1080_v39 = vand.u32 2147483648, %v757_v17 }
 0x1cf   : > { %1267 = vst [vmem:[%s1973_s9 + $0x90] sm:$0xff] %v1052_v58  ;;  %v1056_v19 = vsub.f32 1.0, %v1055_v42  ;;  %vm1074_vm2 = vweird.f32 %v757_v17 }
 0x1d0   : > { %v611_v21 = vpop.f32.mrf.mxu2  ;;  %v1081_v51 = vor.u32 1.1754944e-38, %v1080_v39  ;;  %vm1079_vm4 = vcmp.eq.f32.partialorder %v1078_v37, 8.507059e+37 }
 0x1d1   : > { %v1057_v22 = vmul.f32 %v1596_v14, %v1056_v19  ;;  %v612_v24 = vadd.f32 %v1950_v44, %v611_v21  ;;  %v2041_v44 = vld [vmem:[%s2142_s4] ss:$0 sm:$0xff] }
 0x1d2   : > { %v636_v36 = vadd.f32 %v2041_v44, %v635_v30  ;;  %v639_v50 = vadd.f32 %v2041_v44, %v638_v56 }
 0x1d3   : > { %v1598_v25 = vpop.eup %1597  ;;  %v1058_v26 = vadd.f32 %v1596_v14, %v1057_v22  ;;  %v1420_v27 = vmul.f32 -1.442695, %v612_v24 }
 0x1d4   : > { %v1600_v28 = vpop.eup %1599  ;;  %v758_v29 = vadd.f32 1.0, %v1598_v25  ;;  %v1428_v46 = vmul.f32 -1.442695, %v636_v36  ;;  %v1429_v2 = vmul.f32 -1.442695, %v639_v50 }
 0x1d5   : > { %v1062_v31 = vsel %vm1061_vm15, %v1596_v14, %v1058_v26  ;;  %v1070_v32 = vmul.f32 %v1600_v28, %v757_v17  ;;  %1601 = vpow2.f32 %v1420_v27  ;;  %vm1075_vm1 = vweird.f32 %v1600_v28 }
 0x1d6   : > { %v1067_v43 = vsel %vm1064_vm0, %v1066_v1, %v1062_v31  ;;  %1603 = vrcp.f32 %v758_v29  ;;  %vm1076_vm3 = vmor %vm1074_vm2, %vm1075_vm1  ;;  %v1093_v59 = vand.u32 2147483647, %v758_v29  ;;  %v1095_v60 = vand.u32 2147483648, %v758_v29 }
 0x1d7   : > { %1268 = vst [vmem:[%s1973_s9 + $0x98] sm:$0xff] %v1067_v43  ;;  %v1071_v35 = vsub.f32 1.0, %v1070_v32  ;;  %1605 = vpow2.f32 %v1428_v46  ;;  %vm1089_vm6 = vweird.f32 %v758_v29 }
 0x1d8   : > { %v614_v40 = vpop.f32.mrf.mxu2  ;;  %v1096_v7 = vor.u32 1.1754944e-38, %v1095_v60  ;;  %vm1094_vm8 = vcmp.eq.f32.partialorder %v1093_v59, 8.507059e+37 }
 0x1d9   : > { %v1072_v41 = vmul.f32 %v1600_v28, %v1071_v35  ;;  %v615_v45 = vadd.f32 %v2041_v44, %v614_v40 }
 0x1db   : > { %v1602_v47 = vpop.eup %1601  ;;  %v1073_v48 = vadd.f32 %v1600_v28, %v1072_v41  ;;  %v1421_v49 = vmul.f32 -1.442695, %v615_v45 }
 0x1dc   : > { %v1604_v15 = vpop.eup %1603  ;;  %v759_v52 = vadd.f32 1.0, %v1602_v47 }
 0x1dd   : > { %v1077_v53 = vsel %vm1076_vm3, %v1600_v28, %v1073_v48  ;;  %v1085_v54 = vmul.f32 %v1604_v15, %v758_v29  ;;  %1607 = vpow2.f32 %v1421_v49  ;;  %v1606_v62 = vpop.eup %1605  ;;  %vm1090_vm5 = vweird.f32 %v1604_v15 }
 0x1de   : > { %v1082_v55 = vsel %vm1079_vm4, %v1081_v51, %v1077_v53  ;;  %1609 = vrcp.f32 %v759_v52  ;;  %v2048_v3 = vadd.f32 1.0, %v1606_v62  ;;  %vm1091_vm7 = vmor %vm1089_vm6, %vm1090_vm5  ;;  %v1110_v57 = vand.u32 2147483648, %v759_v52 }
 0x1df   : > { %1269 = vst [vmem:[%s1973_s9 + $0xa0] sm:$0xff] %v1082_v55  ;;  %v1086_v34 = vsub.f32 1.0, %v1085_v54  ;;  %1611 = vpow2.f32 %v1429_v2  ;;  %v1108_v16 = vand.u32 2147483647, %v759_v52  ;;  %vm1104_vm10 = vweird.f32 %v759_v52 }
 0x1e0   : > { %v617_v61 = vpop.f32.mrf.mxu2  ;;  %1613 = vrcp.f32 %v2048_v3  ;;  %v1111_v23 = vor.u32 1.1754944e-38, %v1110_v57  ;;  %vm1224_vm14 = vweird.f32 %v2048_v3  ;;  %v1230_v43 = vand.u32 2147483648, %v2048_v3 }
 0x1e1   : > { %v1087_v63 = vmul.f32 %v1604_v15, %v1086_v34  ;;  %v618_v0 = vadd.f32 %v2041_v44, %v617_v61  ;;  %vm1109_vm12 = vcmp.eq.f32.partialorder %v1108_v16, 8.507059e+37  ;;  %v1228_v37 = vand.u32 2147483647, %v2048_v3 }
 0x1e3   : > { %v1608_v33 = vpop.eup %1607  ;;  %v1088_v4 = vadd.f32 %v1604_v15, %v1087_v63  ;;  %v1422_v5 = vmul.f32 -1.442695, %v618_v0  ;;  %vm1229_vm4 = vcmp.eq.f32.partialorder %v1228_v37, 8.507059e+37 }
 0x1e4   : > { %v1610_v6 = vpop.eup %1609  ;;  %v760_v8 = vadd.f32 1.0, %v1608_v33 }
 0x1e5   : > { %v1092_v9 = vsel %vm1091_vm7, %v1604_v15, %v1088_v4  ;;  %v1100_v10 = vmul.f32 %v1610_v6, %v759_v52  ;;  %1615 = vpow2.f32 %v1422_v5  ;;  %v1612_v38 = vpop.eup %1611  ;;  %vm1105_vm9 = vweird.f32 %v1610_v6 }
 0x1e6   : > { %v1097_v11 = vsel %vm1094_vm8, %v1096_v7, %v1092_v9  ;;  %1617 = vrcp.f32 %v760_v8  ;;  %v1614_v18 = vpop.eup %1613  ;;  %v2053_v42 = vadd.f32 1.0, %v1612_v38  ;;  %vm1106_vm11 = vmor %vm1104_vm10, %vm1105_vm9  ;;  %v1123_v1 = vand.u32 2147483647, %v760_v8 }
 0x1e7   : > { %1270 = vst [vmem:[%s1973_s9 + $0xa8] sm:$0xff] %v1097_v11  ;;  %v1101_v12 = vsub.f32 1.0, %v1100_v10  ;;  %v1220_v21 = vmul.f32 %v1614_v18, %v2048_v3  ;;  %v1125_v29 = vand.u32 2147483648, %v760_v8  ;;  %vm1225_vm15 = vweird.f32 %v1614_v18 }
 0x1e8   : > { %v620_v13 = vpop.f32.mrf.mxu2  ;;  %1619 = vrcp.f32 %v2053_v42  ;;  %vm1119_vm0 = vweird.f32 %v760_v8  ;;  %vm1124_vm2 = vcmp.eq.f32.partialorder %v1123_v1, 8.507059e+37  ;;  %vm2071_vm3 = vmor %vm1224_vm14, %vm1225_vm15  ;;  %v1231_v52 = vor.u32 1.1754944e-38, %v1230_v43 }
 0x1e9   : > { %v1102_v14 = vmul.f32 %v1610_v6, %v1101_v12  ;;  %v621_v17 = vadd.f32 %v2041_v44, %v620_v13  ;;  %v1221_v31 = vsub.f32 1.0, %v1220_v21  ;;  %v1126_v49 = vor.u32 1.1754944e-38, %v1125_v29 }
 0x1ea   : > { %vm1239_vm6 = vweird.f32 %v2053_v42  ;;  %v1243_v3 = vand.u32 2147483647, %v2053_v42  ;;  %v1245_v33 = vand.u32 2147483648, %v2053_v42 }
 0x1eb   : > { %v1616_v58 = vpop.eup %1615  ;;  %v1103_v19 = vadd.f32 %v1610_v6, %v1102_v14  ;;  %v1423_v20 = vmul.f32 -1.442695, %v621_v17  ;;  %v1222_v36 = vmul.f32 %v1614_v18, %v1221_v31 }
 0x1ec   : > { %v1618_v22 = vpop.eup %1617  ;;  %v2056_v24 = vadd.f32 1.0, %v1616_v58  ;;  %v1246_v11 = vor.u32 1.1754944e-38, %v1245_v33 }
 0x1ed   : > { %v1107_v25 = vsel %vm1106_vm11, %v1610_v6, %v1103_v19  ;;  %v1115_v26 = vmul.f32 %v1618_v22, %v760_v8  ;;  %1621 = vpow2.f32 %v1423_v20  ;;  %vm1120_vm13 = vweird.f32 %v1618_v22 }
 0x1ee   : > { %v1112_v27 = vsel %vm1109_vm12, %v1111_v23, %v1107_v25  ;;  %1623 = vrcp.f32 %v2056_v24  ;;  %v1620_v39 = vpop.eup %1619  ;;  %vm1121_vm1 = vmor %vm1119_vm0, %vm1120_vm13  ;;  %v1223_v46 = vadd.f32 %v1614_v18, %v1222_v36  ;;  %v1138_v34 = vand.u32 2147483647, %v2056_v24 }
 0x1ef   : > { %1271 = vst [vmem:[%s1973_s9 + $0xb0] sm:$0xff] %v1112_v27  ;;  %v1116_v28 = vsub.f32 1.0, %v1115_v26  ;;  %v1235_v47 = vmul.f32 %v1620_v39, %v2053_v42  ;;  %v1140_v60 = vand.u32 2147483648, %v2056_v24  ;;  %vm1240_vm7 = vweird.f32 %v1620_v39 }
 0x1f0   : > { %v623_v32 = vpop.f32.mrf.mxu2  ;;  %v1227_v50 = vsel %vm2071_vm3, %v1614_v18, %v1223_v46  ;;  %vm1134_vm8 = vweird.f32 %v2056_v24  ;;  %vm1139_vm10 = vcmp.eq.f32.partialorder %v1138_v34, 8.507059e+37  ;;  %vm1241_vm11 = vmor %vm1239_vm6, %vm1240_vm7  ;;  %vm1244_vm12 = vcmp.eq.f32.partialorder %v1243_v3, 8.507059e+37 }
 0x1f1   : > { %v1117_v30 = vmul.f32 %v1618_v22, %v1116_v28  ;;  %v624_v35 = vadd.f32 %v2041_v44, %v623_v32  ;;  %v1236_v59 = vsub.f32 1.0, %v1235_v47  ;;  %v1232_v61 = vsel %vm1229_vm4, %v1231_v52, %v1227_v50 }
 0x1f2   : > { %1279 = vst [vmem:[%s1973_s9 + $0xf0] sm:$0xff] %v1232_v61  ;;  %v1141_v9 = vor.u32 1.1754944e-38, %v1140_v60 }
 0x1f3   : > { %v1622_v40 = vpop.eup %1621  ;;  %v1118_v41 = vadd.f32 %v1618_v22, %v1117_v30  ;;  %v1424_v45 = vmul.f32 -1.442695, %v624_v35  ;;  %v1237_v2 = vmul.f32 %v1620_v39, %v1236_v59 }
 0x1f4   : > { %v1624_v48 = vpop.eup %1623  ;;  %v2066_v15 = vadd.f32 1.0, %v1622_v40 }
 0x1f5   : > { %v1122_v53 = vsel %vm1121_vm1, %v1618_v22, %v1118_v41  ;;  %v1130_v54 = vmul.f32 %v1624_v48, %v2056_v24  ;;  %1625 = vpow2.f32 %v1424_v45  ;;  %vm1135_vm5 = vweird.f32 %v1624_v48 }
 0x1f6   : > { %v1127_v55 = vsel %vm1124_vm2, %v1126_v49, %v1122_v53  ;;  %1627 = vrcp.f32 %v2066_v15  ;;  %vm1136_vm9 = vmor %vm1134_vm8, %vm1135_vm5  ;;  %v1238_v7 = vadd.f32 %v1620_v39, %v1237_v2  ;;  %v1155_v16 = vand.u32 2147483648, %v2066_v15 }
 0x1f7   : > { %1272 = vst [vmem:[%s1973_s9 + $0xb8] sm:$0xff] %v1127_v55  ;;  %v1131_v56 = vsub.f32 1.0, %v1130_v54  ;;  %v1153_v42 = vand.u32 2147483647, %v2066_v15  ;;  %vm1149_vm14 = vweird.f32 %v2066_v15 }
 0x1f8   : > { %v626_v62 = vpop.f32.mrf.mxu2  ;;  %v1242_v14 = vsel %vm1241_vm11, %v1620_v39, %v1238_v7  ;;  %v1156_v24 = vor.u32 1.1754944e-38, %v1155_v16 }
 0x1f9   : > { %v1132_v63 = vmul.f32 %v1624_v48, %v1131_v56  ;;  %v627_v0 = vadd.f32 %v2041_v44, %v626_v62  ;;  %v1247_v17 = vsel %vm1244_vm12, %v1246_v11, %v1242_v14  ;;  %vm1154_vm0 = vcmp.eq.f32.partialorder %v1153_v42, 8.507059e+37 }
 0x1fa   : > { %1280 = vst [vmem:[%s1973_s9 + $0xf8] sm:$0xff] %v1247_v17 }
 0x1fb   : > { %v1626_v4 = vpop.eup %1625  ;;  %v1133_v5 = vadd.f32 %v1624_v48, %v1132_v63  ;;  %v1425_v6 = vmul.f32 -1.442695, %v627_v0 }
 0x1fc   : > { %v1628_v8 = vpop.eup %1627  ;;  %v763_v10 = vadd.f32 1.0, %v1626_v4 }
 0x1fd   : > { %v1137_v12 = vsel %vm1136_vm9, %v1624_v48, %v1133_v5  ;;  %v1145_v57 = vmul.f32 %v1628_v8, %v2066_v15  ;;  %1629 = vpow2.f32 %v1425_v6  ;;  %vm1150_vm13 = vweird.f32 %v1628_v8 }
 0x1fe   : > { %v1142_v13 = vsel %vm1139_vm10, %v1141_v9, %v1137_v12  ;;  %1631 = vrcp.f32 %v763_v10  ;;  %vm1151_vm15 = vmor %vm1149_vm14, %vm1150_vm13  ;;  %v1170_v29 = vand.u32 2147483648, %v763_v10  ;;  %v1168_v43 = vand.u32 2147483647, %v763_v10 }
 0x1ff   : > { %1273 = vst [vmem:[%s1973_s9 + $0xc0] sm:$0xff] %v1142_v13  ;;  %v1146_v38 = vsub.f32 1.0, %v1145_v57  ;;  %vm1164_vm2 = vweird.f32 %v763_v10 }
 0x200   : > { %v629_v18 = vpop.f32.mrf.mxu2  ;;  %v1171_v40 = vor.u32 1.1754944e-38, %v1170_v29  ;;  %vm1169_vm4 = vcmp.eq.f32.partialorder %v1168_v43, 8.507059e+37 }
 0x201   : > { %v1147_v58 = vmul.f32 %v1628_v8, %v1146_v38  ;;  %v630_v19 = vadd.f32 %v2041_v44, %v629_v18 }
 0x203   : > { %v1630_v20 = vpop.eup %1629  ;;  %v1148_v21 = vadd.f32 %v1628_v8, %v1147_v58  ;;  %v1426_v22 = vmul.f32 -1.442695, %v630_v19 }
 0x204   : > { %v1632_v23 = vpop.eup %1631  ;;  %v764_v25 = vadd.f32 1.0, %v1630_v20 }
 0x205   : > { %v1152_v26 = vsel %vm1151_vm15, %v1628_v8, %v1148_v21  ;;  %v1160_v27 = vmul.f32 %v1632_v23, %v763_v10  ;;  %1633 = vpow2.f32 %v1426_v22  ;;  %vm1165_vm1 = vweird.f32 %v1632_v23 }
 0x206   : > { %v1157_v28 = vsel %vm1154_vm0, %v1156_v24, %v1152_v26  ;;  %1635 = vrcp.f32 %v764_v25  ;;  %vm1166_vm3 = vmor %vm1164_vm2, %vm1165_vm1  ;;  %v1185_v49 = vand.u32 2147483648, %v764_v25  ;;  %vm1179_vm6 = vweird.f32 %v764_v25 }
 0x207   : > { %1274 = vst [vmem:[%s1973_s9 + $0xc8] sm:$0xff] %v1157_v28  ;;  %v1161_v1 = vsub.f32 1.0, %v1160_v27 }
 0x208   : > { %v632_v31 = vpop.f32.mrf.mxu2  ;;  %v1186_v54 = vor.u32 1.1754944e-38, %v1185_v49 }
 0x209   : > { %v1162_v32 = vmul.f32 %v1632_v23, %v1161_v1  ;;  %v633_v30 = vadd.f32 %v2041_v44, %v632_v31  ;;  %v1183_v44 = vand.u32 2147483647, %v764_v25 }
 0x20b   : > { %v1634_v35 = vpop.eup %1633  ;;  %v1163_v36 = vadd.f32 %v1632_v23, %v1162_v32  ;;  %v1427_v37 = vmul.f32 -1.442695, %v633_v30  ;;  %vm1184_vm8 = vcmp.eq.f32.partialorder %v1183_v44, 8.507059e+37 }
 0x20c   : > { %v1636_v39 = vpop.eup %1635  ;;  %v765_v41 = vadd.f32 1.0, %v1634_v35 }
 0x20d   : > { %v1167_v45 = vsel %vm1166_vm3, %v1632_v23, %v1163_v36  ;;  %v1175_v46 = vmul.f32 %v1636_v39, %v764_v25  ;;  %1637 = vpow2.f32 %v1427_v37  ;;  %vm1180_vm5 = vweird.f32 %v1636_v39 }
 0x20e   : > { %v1172_v47 = vsel %vm1169_vm4, %v1171_v40, %v1167_v45  ;;  %1639 = vrcp.f32 %v765_v41  ;;  %vm1181_vm7 = vmor %vm1179_vm6, %vm1180_vm5  ;;  %v1200_v60 = vand.u32 2147483648, %v765_v41  ;;  %v1198_v62 = vand.u32 2147483647, %v765_v41 }
 0x20f   : > { %1275 = vst [vmem:[%s1973_s9 + $0xd0] sm:$0xff] %v1172_v47  ;;  %v1176_v48 = vsub.f32 1.0, %v1175_v46  ;;  %vm1194_vm10 = vweird.f32 %v765_v41 }
 0x210   : > { %v1201_v2 = vor.u32 1.1754944e-38, %v1200_v60  ;;  %vm1199_vm12 = vcmp.eq.f32.partialorder %v1198_v62, 8.507059e+37 }
 0x211   : > { %v1177_v15 = vmul.f32 %v1636_v39, %v1176_v48 }
 0x213   : > { %v1638_v51 = vpop.eup %1637  ;;  %v1178_v52 = vadd.f32 %v1636_v39, %v1177_v15 }
 0x214   : > { %v1640_v53 = vpop.eup %1639  ;;  %v766_v55 = vadd.f32 1.0, %v1638_v51 }
 0x215   : > { %v1182_v56 = vsel %vm1181_vm7, %v1636_v39, %v1178_v52  ;;  %v1190_v34 = vmul.f32 %v1640_v53, %v765_v41  ;;  %vm1195_vm9 = vweird.f32 %v1640_v53 }
 0x216   : > { %v1187_v50 = vsel %vm1184_vm8, %v1186_v54, %v1182_v56  ;;  %1641 = vrcp.f32 %v766_v55  ;;  %vm1196_vm11 = vmor %vm1194_vm10, %vm1195_vm9  ;;  %v1215_v6 = vand.u32 2147483648, %v766_v55  ;;  %v1213_v8 = vand.u32 2147483647, %v766_v55 }
 0x217   : > { %1276 = vst [vmem:[%s1973_s9 + $0xd8] sm:$0xff] %v1187_v50  ;;  %v1191_v59 = vsub.f32 1.0, %v1190_v34  ;;  %vm1209_vm14 = vweird.f32 %v766_v55 }
 0x218   : > { %v1216_v10 = vor.u32 1.1754944e-38, %v1215_v6  ;;  %vm1214_vm0 = vcmp.eq.f32.partialorder %v1213_v8, 8.507059e+37 }
 0x219   : > { %v1192_v61 = vmul.f32 %v1640_v53, %v1191_v59 }
 0x21b   : > { %v1193_v63 = vadd.f32 %v1640_v53, %v1192_v61 }
 0x21c   : > { %v1642_v0 = vpop.eup %1641 }
 0x21d   : > { %v1197_v3 = vsel %vm1196_vm11, %v1640_v53, %v1193_v63  ;;  %v1205_v33 = vmul.f32 %v1642_v0, %v766_v55  ;;  %vm1210_vm13 = vweird.f32 %v1642_v0 }
 0x21e   : > { %v1202_v4 = vsel %vm1199_vm12, %v1201_v2, %v1197_v3  ;;  %vm1211_vm15 = vmor %vm1209_vm14, %vm1210_vm13 }
 0x21f   : > { %1277 = vst [vmem:[%s1973_s9 + $0xe0] sm:$0xff] %v1202_v4  ;;  %v1206_v5 = vsub.f32 1.0, %v1205_v33 }
 0x221   : > { %v1207_v7 = vmul.f32 %v1642_v0, %v1206_v5 }
 0x223   : > { %v1208_v9 = vadd.f32 %v1642_v0, %v1207_v7 }
 0x225   : > { %v1212_v11 = vsel %vm1211_vm15, %v1642_v0, %v1208_v9 }
 0x226   : > { %v1217_v12 = vsel %vm1214_vm0, %v1216_v10, %v1212_v11 }
 0x227   : > { %1278 = vst [vmem:[%s1973_s9 + $0xe8] sm:$0xff] %v1217_v12 }
 0x228   : > { %1671 = shalt.err (!%p1668_p3)
}
 0x229   : > { %s1708_s7 = smov 128   ;;  %s1709_s9 = smov 8  }
 0x22a   : > { %1472 = dma.vmem_to_hbm [thread:$0]  (%p1778_p5), %s1295_s22, 4096, %s1297_s16, %s1282_s23, %s1708_s7, %s1708_s7, %s1709_s9  }
 0x22b PF: > { %p1478_p4 = scmp.ge.s32.totalorder %s1706_s21, 2  ;;  %s1311_s11 = sand.u32 1, %s1694_s18  }
 0x22c   : > { %s1312_s12 = scalar_lea.sflag [#allocation3], %s1311_s11 }
 0x22d   : > { %p1475_p7 = pnand %p1478_p4, %p1782_p6 }
 0x22f   : > { %p1476_p8 = pneg %p1475_p7 }
 0x231   : > { %1689 = dma.done.wait (%p1476_p8), %s1312_s12, 4096  }
 0x232   : > { %1691 = vsyncadd (%p1476_p8), %s1312_s12, 4294963200  ;;  %p15_p9 = scmp.ge.s32.totalorder %s1765_s24, 4   ;;  %s2148_s18 = smov %s1698_s19 }
 0x233   : > { %s2149_s19 = smov %s1702_s20  ;;  %s2150_s20 = smov %s1776_s27 }
 0x234   : > { %s2151_s21 = smov %s1765_s24  ;;  %17 = sbr.rel (!%p15_p9) target bundleno = 3 (0x3), region = 75 }
 0x239   :  { %1318 = vsyncpa [#allocation3], 1 }
 0x23a   :  { %1320 = vsyncpa [#allocation3 + $0x1], 1 }

</bundles_post_ra>
